<compile_context>
chip_gen: v5e
topology: v5e:2x2
jax: 0.10.0
libtpu: 0.0.40
codegen_flags: <defaults>
</compile_context>

<pallas_src>
from functools import partial

import numpy as np
import jax
import jax.numpy as jnp
from jax.experimental import pallas as pl
from jax.experimental.pallas import tpu as pltpu


# Lane offset of the "odd output column" half in the conv GEMM outputs.
# 128 keeps every in-kernel lane slice tile-aligned.
_HALF = 128


# ----------------------------------------------------------------------------
# The single fused kernel (one batch tile of `tb` samples per grid step)
# ----------------------------------------------------------------------------
def _lenet_kernel(a1_ref, t1_ref, b1_ref, t2_ref, b2_ref,
                  wf1_ref, bf1_ref, wf2_ref, bf2_ref, wf3_ref, bf3_ref,
                  out_ref, *, tb, cdt):
    f32 = jnp.float32

    # --------------- conv1: one fused-K GEMM for 28 rows x tb samples -------
    # a1 rows are ordered (q, m, n) with conv-output row h = 4*m + q, so both
    # halves of the 2x2 row pooling below are contiguous row blocks.
    # a1[(q*7+m)*tb + n, ki*96 + w*3 + c] = x[n, c, 4m+q+ki, w]
    y1 = jnp.dot(a1_ref[...], t1_ref[...],
                 preferred_element_type=f32)            # (28*tb, 212)

    r = 7 * tb
    b1 = b1_ref[...]                                    # (1, 84)

    def pool1(q0):
        # rows q0, q0+1 are the two conv rows feeding one pooled row
        z = jnp.maximum(y1[q0 * r:(q0 + 1) * r], y1[(q0 + 1) * r:(q0 + 2) * r])
        z = jnp.maximum(z[:, 0:84], z[:, _HALF:_HALF + 84])   # width pool
        return jnp.maximum(z + b1, 0.0).astype(cdt)           # bias+ReLU commute

    # p1[gp][m*tb + n, w*6 + c] = pool1[n, c, 2m+gp, w]
    p1 = (pool1(0), pool1(2))                           # each (7*tb, 84)

    # --------------- conv2: per-ki accumulation, M batched over (row, n) ----
    b2 = b2_ref[...]                                    # (1, 80)
    y2 = []
    for par in range(2):          # parity of conv2 output row h2 = 2*g2 + par
        acc = None
        for ki in range(5):
            j = par + ki
            a = p1[j % 2][(j // 2) * tb:(j // 2 + 5) * tb, :]   # (5*tb, 84)
            t = jnp.dot(a, t2_ref[ki], preferred_element_type=f32)
            acc = t if acc is None else acc + t
        y2.append(acc)                                  # (5*tb, 208)

    def pool_w2(y):
        return jnp.maximum(y[:, 0:80], y[:, _HALF:_HALF + 80])

    p2 = jnp.maximum(jnp.maximum(pool_w2(y2[0]), pool_w2(y2[1])) + b2, 0.0)
    p2 = p2.astype(cdt)           # (5*tb, 80): p2[g2*tb+n, w*16+oc] = pool2[n,oc,g2,w]

    # --------------- fc1 -> ReLU -> fc2 -> ReLU -> fc3, M = tb samples ------
    # fc1 contraction split over the 5 pooled rows keeps operands contiguous;
    # the NCHW flatten permutation is folded into wf1 at prep time.
    z = None
    for g2 in range(5):
        t = jnp.dot(p2[g2 * tb:(g2 + 1) * tb, :], wf1_ref[g2],
                    preferred_element_type=f32)
        z = t if z is None else z + t
    z = jnp.maximum(z + bf1_ref[...], 0.0).astype(cdt)                    # (tb, 120)
    z = jnp.maximum(jnp.dot(z, wf2_ref[...], preferred_element_type=f32)
                    + bf2_ref[...], 0.0).astype(cdt)                      # (tb, 84)
    # fc3 weights/bias are zero-padded to 128 lanes -> full-tile unmasked store.
    out_ref[...] = (jnp.dot(z, wf3_ref[...], preferred_element_type=f32)
                    + bf3_ref[...])                                       # (tb, 128)


# ----------------------------------------------------------------------------
# Wrapper: XLA-side im2col relayout + one gridded pallas_call
# ----------------------------------------------------------------------------
def lenet_forward(x_nchw, prep, *, tb=8):
    N, C, H, W = x_nchw.shape
    assert (C, H, W) == (3, 32, 32), "LeNet expects 3x32x32 inputs"
    assert tb % 8 == 0, "batch tile must be a multiple of 8 sublanes"
    cdt = prep["t1"].dtype                      # compute dtype (bf16 or f32)

    n_pad = ((N + tb - 1) // tb) * tb
    n_tiles = n_pad // tb

    # NCHW -> row-planar (N, 32, 96), lane = w*3 + c.
    x = jnp.transpose(x_nchw, (0, 2, 3, 1)).reshape(N, H, W * C)
    if n_pad != N:
        x = jnp.concatenate(
            [x, jnp.zeros((n_pad - N, H, W * C), x.dtype)], axis=0)

    # im2col over the 5 kernel rows: win[n, h, ki*96 + :] = x[n, h+ki, :]
    win = jnp.concatenate([x[:, ki:ki + 28, :] for ki in range(5)], axis=-1)
    # Reorder conv rows h -> groups (q, m) with h = 4m + q (pooling-friendly),
    # then group by batch tile with samples minor: row = ((i*28 + hg)*tb + n).
    hs = np.array([4 * m + q for q in range(4) for m in range(7)])
    a1 = win[:, hs, :]                                           # (n_pad, 28, 480)
    a1 = (a1.reshape(n_tiles, tb, 28, 480)
            .transpose(0, 2, 1, 3)
            .reshape(n_tiles * 28 * tb, 480)
            .astype(cdt))

    out = pl.pallas_call(
        partial(_lenet_kernel, tb=tb, cdt=cdt),
        out_shape=jax.ShapeDtypeStruct((n_pad, 128), jnp.float32),
        grid_spec=pltpu.PrefetchScalarGridSpec(
            num_scalar_prefetch=0,
            grid=(n_tiles,),
            in_specs=[
                pl.BlockSpec((28 * tb, 480), lambda i: (i, 0)),    # a1 tile
                pl.BlockSpec((480, 212), lambda i: (0, 0)),        # t1 (resident)
                pl.BlockSpec((1, 84), lambda i: (0, 0)),           # b1
                pl.BlockSpec((5, 84, 208), lambda i: (0, 0, 0)),   # t2
                pl.BlockSpec((1, 80), lambda i: (0, 0)),           # b2
                pl.BlockSpec((5, 80, 120), lambda i: (0, 0, 0)),   # wf1
                pl.BlockSpec((1, 120), lambda i: (0, 0)),          # bf1
                pl.BlockSpec((120, 84), lambda i: (0, 0)),         # wf2
                pl.BlockSpec((1, 84), lambda i: (0, 0)),           # bf2
                pl.BlockSpec((84, 128), lambda i: (0, 0)),         # wf3 (padded)
                pl.BlockSpec((1, 128), lambda i: (0, 0)),          # bf3 (padded)
            ],
            out_specs=pl.BlockSpec((tb, 128), lambda i: (i, 0)),
        ),
        compiler_params=pltpu.CompilerParams(
            dimension_semantics=("parallel",)),   # v7x megacore; no-op on v5e/v6e
    )(a1, prep["t1"], prep["b1"], prep["t2"], prep["b2"],
      prep["wf1"], prep["bf1"], prep["wf2"], prep["bf2"],
      prep["wf3"], prep["bf3"])
    return out[:N, :10]


# ----------------------------------------------------------------------------
# One-time weight repacking (host side, outside the hot path)
# ----------------------------------------------------------------------------
def prepare_params(p, compute_dtype=jnp.bfloat16):
    w1 = np.asarray(p["conv1_w"], np.float32)   # (6, 3, 5, 5)
    b1 = np.asarray(p["conv1_b"], np.float32)
    w2 = np.asarray(p["conv2_w"], np.float32)   # (16, 6, 5, 5)
    b2 = np.asarray(p["conv2_b"], np.float32)
    f1w = np.asarray(p["fc1_w"], np.float32)    # (120, 400)
    f1b = np.asarray(p["fc1_b"], np.float32)
    f2w = np.asarray(p["fc2_w"], np.float32)    # (84, 120)
    f2b = np.asarray(p["fc2_b"], np.float32)
    f3w = np.asarray(p["fc3_w"], np.float32)    # (10, 84)
    f3b = np.asarray(p["fc3_b"], np.float32)

    # conv1 block-Toeplitz, fused over the 5 kernel rows (K = 5*96 = 480):
    # t1[ki*96 + w*3 + c, dw*128 + wp*6 + oc] = w1[oc, c, ki, w - (2*wp+dw)]
    t1 = np.zeros((5, 96, _HALF + 84), np.float32)
    for ki in range(5):
        for wp in range(14):
            for dw in range(2):
                for kj in range(5):
                    w = 2 * wp + dw + kj
                    t1[ki, w * 3:(w + 1) * 3,
                       dw * _HALF + wp * 6:dw * _HALF + (wp + 1) * 6] = \
                        w1[:, :, ki, kj].T
    t1 = t1.reshape(5 * 96, _HALF + 84)

    # conv2 block-Toeplitz, one (84, 208) block per kernel row ki:
    # t2[ki, w*6 + c, dw*128 + wp*16 + oc] = w2[oc, c, ki, w - (2*wp+dw)]
    t2 = np.zeros((5, 84, _HALF + 80), np.float32)
    for ki in range(5):
        for wp in range(5):
            for dw in range(2):
                for kj in range(5):
                    w = 2 * wp + dw + kj
                    t2[ki, w * 6:(w + 1) * 6,
                       dw * _HALF + wp * 16:dw * _HALF + (wp + 1) * 16] = \
                        w2[:, :, ki, kj].T

    # fc1: fold torch's NCHW flatten (idx = c*25 + h*5 + w) into row order
    # (h, w*16 + c), split by h into five (80, 120) blocks.
    wf1 = f1w.reshape(120, 16, 5, 5).transpose(2, 3, 1, 0).reshape(5, 80, 120)

    # fc3 padded to 128 output lanes for an unmasked full-tile store.
    wf3 = np.zeros((84, 128), np.float32)
    wf3[:, :10] = f3w.T
    bf3 = np.zeros((1, 128), np.float32)
    bf3[0, :10] = f3b

    cdt, f32 = compute_dtype, jnp.float32
    return {
        "t1": jnp.asarray(t1, cdt),                         # (480, 212)
        "b1": jnp.asarray(np.tile(b1, 14)[None, :], f32),   # (1, 84)
        "t2": jnp.asarray(t2, cdt),                         # (5, 84, 208)
        "b2": jnp.asarray(np.tile(b2, 5)[None, :], f32),    # (1, 80)
        "wf1": jnp.asarray(wf1, cdt),                       # (5, 80, 120)
        "bf1": jnp.asarray(f1b[None, :], f32),
        "wf2": jnp.asarray(f2w.T, cdt),                     # (120, 84)
        "bf2": jnp.asarray(f2b[None, :], f32),
        "wf3": jnp.asarray(wf3, cdt),                       # (84, 128)
        "bf3": jnp.asarray(bf3, f32),                       # (1, 128)
    }


# ----------------------------------------------------------------------------
# Parameter init (PyTorch layouts) and a plain-XLA reference for validation
# ----------------------------------------------------------------------------
def init_params(key):
    ks = jax.random.split(key, 10)

    def norm(k, shape, fan_in):
        return jax.random.normal(k, shape, jnp.float32) / jnp.sqrt(fan_in)

    return {
        "conv1_w": norm(ks[0], (6, 3, 5, 5), 3 * 5 * 5),
        "conv1_b": norm(ks[1], (6,), 3 * 5 * 5),
        "conv2_w": norm(ks[2], (16, 6, 5, 5), 6 * 5 * 5),
        "conv2_b": norm(ks[3], (16,), 6 * 5 * 5),
        "fc1_w": norm(ks[4], (120, 400), 400),
        "fc1_b": norm(ks[5], (120,), 400),
        "fc2_w": norm(ks[6], (84, 120), 120),
        "fc2_b": norm(ks[7], (84,), 120),
        "fc3_w": norm(ks[8], (10, 84), 84),
        "fc3_b": norm(ks[9], (10,), 84),
    }


def lenet_reference(x, p):
    hp = jax.lax.Precision.HIGHEST

    def pool(y):
        n, c, h, w = y.shape
        return y.reshape(n, c, h // 2, 2, w // 2, 2).max(axis=(3, 5))

    y = jax.lax.conv_general_dilated(
        x, p["conv1_w"], (1, 1), "VALID",
        dimension_numbers=("NCHW", "OIHW", "NCHW"), precision=hp)
    y = pool(jax.nn.relu(y + p["conv1_b"][None, :, None, None]))
    y = jax.lax.conv_general_dilated(
        y, p["conv2_w"], (1, 1), "VALID",
        dimension_numbers=("NCHW", "OIHW", "NCHW"), precision=hp)
    y = pool(jax.nn.relu(y + p["conv2_b"][None, :, None, None]))
    y = y.reshape(y.shape[0], -1)
    y = jax.nn.relu(jnp.dot(y, p["fc1_w"].T, precision=hp) + p["fc1_b"])
    y = jax.nn.relu(jnp.dot(y, p["fc2_w"].T, precision=hp) + p["fc2_b"])
    return jnp.dot(y, p["fc3_w"].T, precision=hp) + p["fc3_b"]


if __name__ == "__main__":
    key = jax.random.PRNGKey(0)
    k_in, k_p = jax.random.split(key)
    x = jax.random.normal(k_in, (2, 3, 32, 32), jnp.float32)

    params = init_params(k_p)
    ref = jax.block_until_ready(lenet_reference(x, params))

    fwd = jax.jit(lenet_forward)

    # Strict correctness check: same kernel, f32 MXU inputs, tight tolerance.
    prep_f32 = prepare_params(params, jnp.float32)
    out_f32 = jax.block_until_ready(fwd(x, prep_f32))
    assert out_f32.shape == (2, 10), out_f32.shape
    err32 = float(jnp.max(jnp.abs(out_f32 - ref)))
    assert err32 < 2e-2, "f32 path max abs err = %f" % err32

    # Fast path: bf16 MXU inputs with f32 accumulation (loose tolerance).
    prep_bf16 = prepare_params(params, jnp.bfloat16)
    out_bf16 = jax.block_until_ready(fwd(x, prep_bf16))
    assert out_bf16.shape == (2, 10), out_bf16.shape
    err16 = float(jnp.max(jnp.abs(out_bf16 - ref)))
    assert err16 < 2e-1, "bf16 path max abs err = %f" % err16

    print("KERNEL_OK")
</pallas_src>

<mosaic_0001>
module attributes {stable_mosaic.version = 11 : i64} {
  func.func @_lenet_kernel(%arg0: i32, %arg1: memref<224x480xf32, #tpu.memory_space<vmem>>, %arg2: memref<480x212xf32, #tpu.memory_space<vmem>>, %arg3: memref<1x84xf32, #tpu.memory_space<vmem>>, %arg4: memref<5x84x208xf32, #tpu.memory_space<vmem>>, %arg5: memref<1x80xf32, #tpu.memory_space<vmem>>, %arg6: memref<5x80x120xf32, #tpu.memory_space<vmem>>, %arg7: memref<1x120xf32, #tpu.memory_space<vmem>>, %arg8: memref<120x84xf32, #tpu.memory_space<vmem>>, %arg9: memref<1x84xf32, #tpu.memory_space<vmem>>, %arg10: memref<84x128xf32, #tpu.memory_space<vmem>>, %arg11: memref<1x128xf32, #tpu.memory_space<vmem>>, %arg12: memref<8x128xf32, #tpu.memory_space<vmem>>) attributes {dimension_semantics = [#tpu.dimension_semantics<parallel>], iteration_bounds = array<i64: 1>, scalar_prefetch = 0 : i64, scratch_operands = 0 : i64, tpu.core_type = #tpu.core_type<tc>, window_params = [{transform_indices = @transform_0, window_bounds = array<i64: 224, 480>}, {pipeline_mode = #tpu.pipeline_mode<synchronous>, transform_indices = @transform_1, window_bounds = array<i64: 480, 212>}, {pipeline_mode = #tpu.pipeline_mode<synchronous>, transform_indices = @transform_2, window_bounds = array<i64: 1, 84>}, {pipeline_mode = #tpu.pipeline_mode<synchronous>, transform_indices = @transform_3, window_bounds = array<i64: 5, 84, 208>}, {pipeline_mode = #tpu.pipeline_mode<synchronous>, transform_indices = @transform_4, window_bounds = array<i64: 1, 80>}, {pipeline_mode = #tpu.pipeline_mode<synchronous>, transform_indices = @transform_5, window_bounds = array<i64: 5, 80, 120>}, {pipeline_mode = #tpu.pipeline_mode<synchronous>, transform_indices = @transform_6, window_bounds = array<i64: 1, 120>}, {pipeline_mode = #tpu.pipeline_mode<synchronous>, transform_indices = @transform_7, window_bounds = array<i64: 120, 84>}, {pipeline_mode = #tpu.pipeline_mode<synchronous>, transform_indices = @transform_8, window_bounds = array<i64: 1, 84>}, {pipeline_mode = #tpu.pipeline_mode<synchronous>, transform_indices = @transform_9, window_bounds = array<i64: 84, 128>}, {pipeline_mode = #tpu.pipeline_mode<synchronous>, transform_indices = @transform_10, window_bounds = array<i64: 1, 128>}, {transform_indices = @transform_11, window_bounds = array<i64: 8, 128>}]} {
    %c0 = arith.constant 0 : index
    %c0_0 = arith.constant 0 : index
    %0 = vector.load %arg1[%c0, %c0_0] : memref<224x480xf32, #tpu.memory_space<vmem>>, vector<224x480xf32>
    %c0_1 = arith.constant 0 : index
    %c0_2 = arith.constant 0 : index
    %1 = vector.load %arg2[%c0_1, %c0_2] : memref<480x212xf32, #tpu.memory_space<vmem>>, vector<480x212xf32>
    %cst = arith.constant dense<0.000000e+00> : vector<224x212xf32>
    %2 = tpu.matmul %0, %1, %cst {dimension_numbers = #tpu.dot_dimension_numbers<[1], [0], [0], [1], [0, 0, 1, 1], [], []>} : vector<224x480xf32>, vector<480x212xf32>, vector<224x212xf32> -> vector<224x212xf32>
    %c0_3 = arith.constant 0 : index
    %c0_4 = arith.constant 0 : index
    %3 = vector.load %arg3[%c0_3, %c0_4] : memref<1x84xf32, #tpu.memory_space<vmem>>, vector<1x84xf32>
    %4 = vector.extract_strided_slice %2 {offsets = [0, 0], sizes = [56, 212], strides = [1, 1]} : vector<224x212xf32> to vector<56x212xf32>
    %5 = vector.extract_strided_slice %2 {offsets = [56, 0], sizes = [56, 212], strides = [1, 1]} : vector<224x212xf32> to vector<56x212xf32>
    %6 = arith.maximumf %4, %5 : vector<56x212xf32>
    %7 = vector.extract_strided_slice %6 {offsets = [0, 0], sizes = [56, 84], strides = [1, 1]} : vector<56x212xf32> to vector<56x84xf32>
    %8 = vector.extract_strided_slice %6 {offsets = [0, 128], sizes = [56, 84], strides = [1, 1]} : vector<56x212xf32> to vector<56x84xf32>
    %9 = arith.maximumf %7, %8 : vector<56x84xf32>
    %10 = vector.broadcast %3 : vector<1x84xf32> to vector<56x84xf32>
    %11 = arith.addf %9, %10 : vector<56x84xf32>
    %cst_5 = arith.constant 0.000000e+00 : f32
    %12 = vector.broadcast %cst_5 : f32 to vector<56x84xf32>
    %13 = arith.maximumf %11, %12 : vector<56x84xf32>
    %14 = vector.extract_strided_slice %2 {offsets = [112, 0], sizes = [56, 212], strides = [1, 1]} : vector<224x212xf32> to vector<56x212xf32>
    %15 = vector.extract_strided_slice %2 {offsets = [168, 0], sizes = [56, 212], strides = [1, 1]} : vector<224x212xf32> to vector<56x212xf32>
    %16 = arith.maximumf %14, %15 : vector<56x212xf32>
    %17 = vector.extract_strided_slice %16 {offsets = [0, 0], sizes = [56, 84], strides = [1, 1]} : vector<56x212xf32> to vector<56x84xf32>
    %18 = vector.extract_strided_slice %16 {offsets = [0, 128], sizes = [56, 84], strides = [1, 1]} : vector<56x212xf32> to vector<56x84xf32>
    %19 = arith.maximumf %17, %18 : vector<56x84xf32>
    %20 = vector.broadcast %3 : vector<1x84xf32> to vector<56x84xf32>
    %21 = arith.addf %19, %20 : vector<56x84xf32>
    %cst_6 = arith.constant 0.000000e+00 : f32
    %22 = vector.broadcast %cst_6 : f32 to vector<56x84xf32>
    %23 = arith.maximumf %21, %22 : vector<56x84xf32>
    %c0_7 = arith.constant 0 : index
    %c0_8 = arith.constant 0 : index
    %24 = vector.load %arg5[%c0_7, %c0_8] : memref<1x80xf32, #tpu.memory_space<vmem>>, vector<1x80xf32>
    %25 = vector.extract_strided_slice %13 {offsets = [0, 0], sizes = [40, 84], strides = [1, 1]} : vector<56x84xf32> to vector<40x84xf32>
    %c0_9 = arith.constant 0 : index
    %c0_10 = arith.constant 0 : index
    %c0_11 = arith.constant 0 : index
    %26 = vector.load %arg4[%c0_9, %c0_10, %c0_11] : memref<5x84x208xf32, #tpu.memory_space<vmem>>, vector<1x84x208xf32>
    %27 = vector.shape_cast %26 : vector<1x84x208xf32> to vector<84x208xf32>
    %cst_12 = arith.constant dense<0.000000e+00> : vector<40x208xf32>
    %28 = tpu.matmul %25, %27, %cst_12 {dimension_numbers = #tpu.dot_dimension_numbers<[1], [0], [0], [1], [0, 0, 1, 1], [], []>} : vector<40x84xf32>, vector<84x208xf32>, vector<40x208xf32> -> vector<40x208xf32>
    %29 = vector.extract_strided_slice %23 {offsets = [0, 0], sizes = [40, 84], strides = [1, 1]} : vector<56x84xf32> to vector<40x84xf32>
    %c1 = arith.constant 1 : index
    %c0_13 = arith.constant 0 : index
    %c0_14 = arith.constant 0 : index
    %30 = vector.load %arg4[%c1, %c0_13, %c0_14] : memref<5x84x208xf32, #tpu.memory_space<vmem>>, vector<1x84x208xf32>
    %31 = vector.shape_cast %30 : vector<1x84x208xf32> to vector<84x208xf32>
    %cst_15 = arith.constant dense<0.000000e+00> : vector<40x208xf32>
    %32 = tpu.matmul %29, %31, %cst_15 {dimension_numbers = #tpu.dot_dimension_numbers<[1], [0], [0], [1], [0, 0, 1, 1], [], []>} : vector<40x84xf32>, vector<84x208xf32>, vector<40x208xf32> -> vector<40x208xf32>
    %33 = arith.addf %28, %32 : vector<40x208xf32>
    %34 = vector.extract_strided_slice %13 {offsets = [8, 0], sizes = [40, 84], strides = [1, 1]} : vector<56x84xf32> to vector<40x84xf32>
    %c2 = arith.constant 2 : index
    %c0_16 = arith.constant 0 : index
    %c0_17 = arith.constant 0 : index
    %35 = vector.load %arg4[%c2, %c0_16, %c0_17] : memref<5x84x208xf32, #tpu.memory_space<vmem>>, vector<1x84x208xf32>
    %36 = vector.shape_cast %35 : vector<1x84x208xf32> to vector<84x208xf32>
    %cst_18 = arith.constant dense<0.000000e+00> : vector<40x208xf32>
    %37 = tpu.matmul %34, %36, %cst_18 {dimension_numbers = #tpu.dot_dimension_numbers<[1], [0], [0], [1], [0, 0, 1, 1], [], []>} : vector<40x84xf32>, vector<84x208xf32>, vector<40x208xf32> -> vector<40x208xf32>
    %38 = arith.addf %33, %37 : vector<40x208xf32>
    %39 = vector.extract_strided_slice %23 {offsets = [8, 0], sizes = [40, 84], strides = [1, 1]} : vector<56x84xf32> to vector<40x84xf32>
    %c3 = arith.constant 3 : index
    %c0_19 = arith.constant 0 : index
    %c0_20 = arith.constant 0 : index
    %40 = vector.load %arg4[%c3, %c0_19, %c0_20] : memref<5x84x208xf32, #tpu.memory_space<vmem>>, vector<1x84x208xf32>
    %41 = vector.shape_cast %40 : vector<1x84x208xf32> to vector<84x208xf32>
    %cst_21 = arith.constant dense<0.000000e+00> : vector<40x208xf32>
    %42 = tpu.matmul %39, %41, %cst_21 {dimension_numbers = #tpu.dot_dimension_numbers<[1], [0], [0], [1], [0, 0, 1, 1], [], []>} : vector<40x84xf32>, vector<84x208xf32>, vector<40x208xf32> -> vector<40x208xf32>
    %43 = arith.addf %38, %42 : vector<40x208xf32>
    %44 = vector.extract_strided_slice %13 {offsets = [16, 0], sizes = [40, 84], strides = [1, 1]} : vector<56x84xf32> to vector<40x84xf32>
    %c4 = arith.constant 4 : index
    %c0_22 = arith.constant 0 : index
    %c0_23 = arith.constant 0 : index
    %45 = vector.load %arg4[%c4, %c0_22, %c0_23] : memref<5x84x208xf32, #tpu.memory_space<vmem>>, vector<1x84x208xf32>
    %46 = vector.shape_cast %45 : vector<1x84x208xf32> to vector<84x208xf32>
    %cst_24 = arith.constant dense<0.000000e+00> : vector<40x208xf32>
    %47 = tpu.matmul %44, %46, %cst_24 {dimension_numbers = #tpu.dot_dimension_numbers<[1], [0], [0], [1], [0, 0, 1, 1], [], []>} : vector<40x84xf32>, vector<84x208xf32>, vector<40x208xf32> -> vector<40x208xf32>
    %48 = arith.addf %43, %47 : vector<40x208xf32>
    %49 = vector.extract_strided_slice %23 {offsets = [0, 0], sizes = [40, 84], strides = [1, 1]} : vector<56x84xf32> to vector<40x84xf32>
    %c0_25 = arith.constant 0 : index
    %c0_26 = arith.constant 0 : index
    %c0_27 = arith.constant 0 : index
    %50 = vector.load %arg4[%c0_25, %c0_26, %c0_27] : memref<5x84x208xf32, #tpu.memory_space<vmem>>, vector<1x84x208xf32>
    %51 = vector.shape_cast %50 : vector<1x84x208xf32> to vector<84x208xf32>
    %cst_28 = arith.constant dense<0.000000e+00> : vector<40x208xf32>
    %52 = tpu.matmul %49, %51, %cst_28 {dimension_numbers = #tpu.dot_dimension_numbers<[1], [0], [0], [1], [0, 0, 1, 1], [], []>} : vector<40x84xf32>, vector<84x208xf32>, vector<40x208xf32> -> vector<40x208xf32>
    %53 = vector.extract_strided_slice %13 {offsets = [8, 0], sizes = [40, 84], strides = [1, 1]} : vector<56x84xf32> to vector<40x84xf32>
    %c1_29 = arith.constant 1 : index
    %c0_30 = arith.constant 0 : index
    %c0_31 = arith.constant 0 : index
    %54 = vector.load %arg4[%c1_29, %c0_30, %c0_31] : memref<5x84x208xf32, #tpu.memory_space<vmem>>, vector<1x84x208xf32>
    %55 = vector.shape_cast %54 : vector<1x84x208xf32> to vector<84x208xf32>
    %cst_32 = arith.constant dense<0.000000e+00> : vector<40x208xf32>
    %56 = tpu.matmul %53, %55, %cst_32 {dimension_numbers = #tpu.dot_dimension_numbers<[1], [0], [0], [1], [0, 0, 1, 1], [], []>} : vector<40x84xf32>, vector<84x208xf32>, vector<40x208xf32> -> vector<40x208xf32>
    %57 = arith.addf %52, %56 : vector<40x208xf32>
    %58 = vector.extract_strided_slice %23 {offsets = [8, 0], sizes = [40, 84], strides = [1, 1]} : vector<56x84xf32> to vector<40x84xf32>
    %c2_33 = arith.constant 2 : index
    %c0_34 = arith.constant 0 : index
    %c0_35 = arith.constant 0 : index
    %59 = vector.load %arg4[%c2_33, %c0_34, %c0_35] : memref<5x84x208xf32, #tpu.memory_space<vmem>>, vector<1x84x208xf32>
    %60 = vector.shape_cast %59 : vector<1x84x208xf32> to vector<84x208xf32>
    %cst_36 = arith.constant dense<0.000000e+00> : vector<40x208xf32>
    %61 = tpu.matmul %58, %60, %cst_36 {dimension_numbers = #tpu.dot_dimension_numbers<[1], [0], [0], [1], [0, 0, 1, 1], [], []>} : vector<40x84xf32>, vector<84x208xf32>, vector<40x208xf32> -> vector<40x208xf32>
    %62 = arith.addf %57, %61 : vector<40x208xf32>
    %63 = vector.extract_strided_slice %13 {offsets = [16, 0], sizes = [40, 84], strides = [1, 1]} : vector<56x84xf32> to vector<40x84xf32>
    %c3_37 = arith.constant 3 : index
    %c0_38 = arith.constant 0 : index
    %c0_39 = arith.constant 0 : index
    %64 = vector.load %arg4[%c3_37, %c0_38, %c0_39] : memref<5x84x208xf32, #tpu.memory_space<vmem>>, vector<1x84x208xf32>
    %65 = vector.shape_cast %64 : vector<1x84x208xf32> to vector<84x208xf32>
    %cst_40 = arith.constant dense<0.000000e+00> : vector<40x208xf32>
    %66 = tpu.matmul %63, %65, %cst_40 {dimension_numbers = #tpu.dot_dimension_numbers<[1], [0], [0], [1], [0, 0, 1, 1], [], []>} : vector<40x84xf32>, vector<84x208xf32>, vector<40x208xf32> -> vector<40x208xf32>
    %67 = arith.addf %62, %66 : vector<40x208xf32>
    %68 = vector.extract_strided_slice %23 {offsets = [16, 0], sizes = [40, 84], strides = [1, 1]} : vector<56x84xf32> to vector<40x84xf32>
    %c4_41 = arith.constant 4 : index
    %c0_42 = arith.constant 0 : index
    %c0_43 = arith.constant 0 : index
    %69 = vector.load %arg4[%c4_41, %c0_42, %c0_43] : memref<5x84x208xf32, #tpu.memory_space<vmem>>, vector<1x84x208xf32>
    %70 = vector.shape_cast %69 : vector<1x84x208xf32> to vector<84x208xf32>
    %cst_44 = arith.constant dense<0.000000e+00> : vector<40x208xf32>
    %71 = tpu.matmul %68, %70, %cst_44 {dimension_numbers = #tpu.dot_dimension_numbers<[1], [0], [0], [1], [0, 0, 1, 1], [], []>} : vector<40x84xf32>, vector<84x208xf32>, vector<40x208xf32> -> vector<40x208xf32>
    %72 = arith.addf %67, %71 : vector<40x208xf32>
    %73 = vector.extract_strided_slice %48 {offsets = [0, 0], sizes = [40, 80], strides = [1, 1]} : vector<40x208xf32> to vector<40x80xf32>
    %74 = vector.extract_strided_slice %48 {offsets = [0, 128], sizes = [40, 80], strides = [1, 1]} : vector<40x208xf32> to vector<40x80xf32>
    %75 = arith.maximumf %73, %74 : vector<40x80xf32>
    %76 = vector.extract_strided_slice %72 {offsets = [0, 0], sizes = [40, 80], strides = [1, 1]} : vector<40x208xf32> to vector<40x80xf32>
    %77 = vector.extract_strided_slice %72 {offsets = [0, 128], sizes = [40, 80], strides = [1, 1]} : vector<40x208xf32> to vector<40x80xf32>
    %78 = arith.maximumf %76, %77 : vector<40x80xf32>
    %79 = arith.maximumf %75, %78 : vector<40x80xf32>
    %80 = vector.broadcast %24 : vector<1x80xf32> to vector<40x80xf32>
    %81 = arith.addf %79, %80 : vector<40x80xf32>
    %cst_45 = arith.constant 0.000000e+00 : f32
    %82 = vector.broadcast %cst_45 : f32 to vector<40x80xf32>
    %83 = arith.maximumf %81, %82 : vector<40x80xf32>
    %84 = vector.extract_strided_slice %83 {offsets = [0, 0], sizes = [8, 80], strides = [1, 1]} : vector<40x80xf32> to vector<8x80xf32>
    %c0_46 = arith.constant 0 : index
    %c0_47 = arith.constant 0 : index
    %c0_48 = arith.constant 0 : index
    %85 = vector.load %arg6[%c0_46, %c0_47, %c0_48] : memref<5x80x120xf32, #tpu.memory_space<vmem>>, vector<1x80x120xf32>
    %86 = vector.shape_cast %85 : vector<1x80x120xf32> to vector<80x120xf32>
    %cst_49 = arith.constant dense<0.000000e+00> : vector<8x120xf32>
    %87 = tpu.matmul %84, %86, %cst_49 {dimension_numbers = #tpu.dot_dimension_numbers<[1], [0], [0], [1], [0, 0, 1, 1], [], []>} : vector<8x80xf32>, vector<80x120xf32>, vector<8x120xf32> -> vector<8x120xf32>
    %88 = vector.extract_strided_slice %83 {offsets = [8, 0], sizes = [8, 80], strides = [1, 1]} : vector<40x80xf32> to vector<8x80xf32>
    %c1_50 = arith.constant 1 : index
    %c0_51 = arith.constant 0 : index
    %c0_52 = arith.constant 0 : index
    %89 = vector.load %arg6[%c1_50, %c0_51, %c0_52] : memref<5x80x120xf32, #tpu.memory_space<vmem>>, vector<1x80x120xf32>
    %90 = vector.shape_cast %89 : vector<1x80x120xf32> to vector<80x120xf32>
    %cst_53 = arith.constant dense<0.000000e+00> : vector<8x120xf32>
    %91 = tpu.matmul %88, %90, %cst_53 {dimension_numbers = #tpu.dot_dimension_numbers<[1], [0], [0], [1], [0, 0, 1, 1], [], []>} : vector<8x80xf32>, vector<80x120xf32>, vector<8x120xf32> -> vector<8x120xf32>
    %92 = arith.addf %87, %91 : vector<8x120xf32>
    %93 = vector.extract_strided_slice %83 {offsets = [16, 0], sizes = [8, 80], strides = [1, 1]} : vector<40x80xf32> to vector<8x80xf32>
    %c2_54 = arith.constant 2 : index
    %c0_55 = arith.constant 0 : index
    %c0_56 = arith.constant 0 : index
    %94 = vector.load %arg6[%c2_54, %c0_55, %c0_56] : memref<5x80x120xf32, #tpu.memory_space<vmem>>, vector<1x80x120xf32>
    %95 = vector.shape_cast %94 : vector<1x80x120xf32> to vector<80x120xf32>
    %cst_57 = arith.constant dense<0.000000e+00> : vector<8x120xf32>
    %96 = tpu.matmul %93, %95, %cst_57 {dimension_numbers = #tpu.dot_dimension_numbers<[1], [0], [0], [1], [0, 0, 1, 1], [], []>} : vector<8x80xf32>, vector<80x120xf32>, vector<8x120xf32> -> vector<8x120xf32>
    %97 = arith.addf %92, %96 : vector<8x120xf32>
    %98 = vector.extract_strided_slice %83 {offsets = [24, 0], sizes = [8, 80], strides = [1, 1]} : vector<40x80xf32> to vector<8x80xf32>
    %c3_58 = arith.constant 3 : index
    %c0_59 = arith.constant 0 : index
    %c0_60 = arith.constant 0 : index
    %99 = vector.load %arg6[%c3_58, %c0_59, %c0_60] : memref<5x80x120xf32, #tpu.memory_space<vmem>>, vector<1x80x120xf32>
    %100 = vector.shape_cast %99 : vector<1x80x120xf32> to vector<80x120xf32>
    %cst_61 = arith.constant dense<0.000000e+00> : vector<8x120xf32>
    %101 = tpu.matmul %98, %100, %cst_61 {dimension_numbers = #tpu.dot_dimension_numbers<[1], [0], [0], [1], [0, 0, 1, 1], [], []>} : vector<8x80xf32>, vector<80x120xf32>, vector<8x120xf32> -> vector<8x120xf32>
    %102 = arith.addf %97, %101 : vector<8x120xf32>
    %103 = vector.extract_strided_slice %83 {offsets = [32, 0], sizes = [8, 80], strides = [1, 1]} : vector<40x80xf32> to vector<8x80xf32>
    %c4_62 = arith.constant 4 : index
    %c0_63 = arith.constant 0 : index
    %c0_64 = arith.constant 0 : index
    %104 = vector.load %arg6[%c4_62, %c0_63, %c0_64] : memref<5x80x120xf32, #tpu.memory_space<vmem>>, vector<1x80x120xf32>
    %105 = vector.shape_cast %104 : vector<1x80x120xf32> to vector<80x120xf32>
    %cst_65 = arith.constant dense<0.000000e+00> : vector<8x120xf32>
    %106 = tpu.matmul %103, %105, %cst_65 {dimension_numbers = #tpu.dot_dimension_numbers<[1], [0], [0], [1], [0, 0, 1, 1], [], []>} : vector<8x80xf32>, vector<80x120xf32>, vector<8x120xf32> -> vector<8x120xf32>
    %107 = arith.addf %102, %106 : vector<8x120xf32>
    %c0_66 = arith.constant 0 : index
    %c0_67 = arith.constant 0 : index
    %108 = vector.load %arg7[%c0_66, %c0_67] : memref<1x120xf32, #tpu.memory_space<vmem>>, vector<1x120xf32>
    %109 = vector.broadcast %108 : vector<1x120xf32> to vector<8x120xf32>
    %110 = arith.addf %107, %109 : vector<8x120xf32>
    %cst_68 = arith.constant 0.000000e+00 : f32
    %111 = vector.broadcast %cst_68 : f32 to vector<8x120xf32>
    %112 = arith.maximumf %110, %111 : vector<8x120xf32>
    %c0_69 = arith.constant 0 : index
    %c0_70 = arith.constant 0 : index
    %113 = vector.load %arg8[%c0_69, %c0_70] : memref<120x84xf32, #tpu.memory_space<vmem>>, vector<120x84xf32>
    %cst_71 = arith.constant dense<0.000000e+00> : vector<8x84xf32>
    %114 = tpu.matmul %112, %113, %cst_71 {dimension_numbers = #tpu.dot_dimension_numbers<[1], [0], [0], [1], [0, 0, 1, 1], [], []>} : vector<8x120xf32>, vector<120x84xf32>, vector<8x84xf32> -> vector<8x84xf32>
    %c0_72 = arith.constant 0 : index
    %c0_73 = arith.constant 0 : index
    %115 = vector.load %arg9[%c0_72, %c0_73] : memref<1x84xf32, #tpu.memory_space<vmem>>, vector<1x84xf32>
    %116 = vector.broadcast %115 : vector<1x84xf32> to vector<8x84xf32>
    %117 = arith.addf %114, %116 : vector<8x84xf32>
    %cst_74 = arith.constant 0.000000e+00 : f32
    %118 = vector.broadcast %cst_74 : f32 to vector<8x84xf32>
    %119 = arith.maximumf %117, %118 : vector<8x84xf32>
    %c0_75 = arith.constant 0 : index
    %c0_76 = arith.constant 0 : index
    %120 = vector.load %arg10[%c0_75, %c0_76] : memref<84x128xf32, #tpu.memory_space<vmem>>, vector<84x128xf32>
    %cst_77 = arith.constant dense<0.000000e+00> : vector<8x128xf32>
    %121 = tpu.matmul %119, %120, %cst_77 {dimension_numbers = #tpu.dot_dimension_numbers<[1], [0], [0], [1], [0, 0, 1, 1], [], []>} : vector<8x84xf32>, vector<84x128xf32>, vector<8x128xf32> -> vector<8x128xf32>
    %c0_78 = arith.constant 0 : index
    %c0_79 = arith.constant 0 : index
    %122 = vector.load %arg11[%c0_78, %c0_79] : memref<1x128xf32, #tpu.memory_space<vmem>>, vector<1x128xf32>
    %123 = vector.broadcast %122 : vector<1x128xf32> to vector<8x128xf32>
    %124 = arith.addf %121, %123 : vector<8x128xf32>
    %c0_80 = arith.constant 0 : index
    %c0_81 = arith.constant 0 : index
    %125 = vector.load %arg12[%c0_80, %c0_81] : memref<8x128xf32, #tpu.memory_space<vmem>>, vector<8x128xf32>
    tpu.vector_store %arg12[%c0_80, %c0_81], %124 {strides = array<i32>} : memref<8x128xf32, #tpu.memory_space<vmem>>, vector<8x128xf32>,
    return
  }
  func.func @transform_0(%arg0: i32) -> (i32, i32) {
    %c0_i32 = arith.constant 0 : i32
    %c0_i32_0 = arith.constant 0 : i32
    return %arg0, %c0_i32 : i32, i32
  }
  func.func @transform_1(%arg0: i32) -> (i32, i32) {
    %c0_i32 = arith.constant 0 : i32
    %c0_i32_0 = arith.constant 0 : i32
    %c0_i32_1 = arith.constant 0 : i32
    return %c0_i32, %c0_i32_0 : i32, i32
  }
  func.func @transform_2(%arg0: i32) -> (i32, i32) {
    %c0_i32 = arith.constant 0 : i32
    %c0_i32_0 = arith.constant 0 : i32
    %c0_i32_1 = arith.constant 0 : i32
    return %c0_i32, %c0_i32_0 : i32, i32
  }
  func.func @transform_3(%arg0: i32) -> (i32, i32, i32) {
    %c0_i32 = arith.constant 0 : i32
    %c0_i32_0 = arith.constant 0 : i32
    %c0_i32_1 = arith.constant 0 : i32
    %c0_i32_2 = arith.constant 0 : i32
    return %c0_i32, %c0_i32_0, %c0_i32_1 : i32, i32, i32
  }
  func.func @transform_4(%arg0: i32) -> (i32, i32) {
    %c0_i32 = arith.constant 0 : i32
    %c0_i32_0 = arith.constant 0 : i32
    %c0_i32_1 = arith.constant 0 : i32
    return %c0_i32, %c0_i32_0 : i32, i32
  }
  func.func @transform_5(%arg0: i32) -> (i32, i32, i32) {
    %c0_i32 = arith.constant 0 : i32
    %c0_i32_0 = arith.constant 0 : i32
    %c0_i32_1 = arith.constant 0 : i32
    %c0_i32_2 = arith.constant 0 : i32
    return %c0_i32, %c0_i32_0, %c0_i32_1 : i32, i32, i32
  }
  func.func @transform_6(%arg0: i32) -> (i32, i32) {
    %c0_i32 = arith.constant 0 : i32
    %c0_i32_0 = arith.constant 0 : i32
    %c0_i32_1 = arith.constant 0 : i32
    return %c0_i32, %c0_i32_0 : i32, i32
  }
  func.func @transform_7(%arg0: i32) -> (i32, i32) {
    %c0_i32 = arith.constant 0 : i32
    %c0_i32_0 = arith.constant 0 : i32
    %c0_i32_1 = arith.constant 0 : i32
    return %c0_i32, %c0_i32_0 : i32, i32
  }
  func.func @transform_8(%arg0: i32) -> (i32, i32) {
    %c0_i32 = arith.constant 0 : i32
    %c0_i32_0 = arith.constant 0 : i32
    %c0_i32_1 = arith.constant 0 : i32
    return %c0_i32, %c0_i32_0 : i32, i32
  }
  func.func @transform_9(%arg0: i32) -> (i32, i32) {
    %c0_i32 = arith.constant 0 : i32
    %c0_i32_0 = arith.constant 0 : i32
    %c0_i32_1 = arith.constant 0 : i32
    return %c0_i32, %c0_i32_0 : i32, i32
  }
  func.func @transform_10(%arg0: i32) -> (i32, i32) {
    %c0_i32 = arith.constant 0 : i32
    %c0_i32_0 = arith.constant 0 : i32
    %c0_i32_1 = arith.constant 0 : i32
    return %c0_i32, %c0_i32_0 : i32, i32
  }
  func.func @transform_11(%arg0: i32) -> (i32, i32) {
    %c0_i32 = arith.constant 0 : i32
    %c0_i32_0 = arith.constant 0 : i32
    return %arg0, %c0_i32 : i32, i32
  }
}

</mosaic_0001>

<bundles_post_ra>
// kernel: lenet_forward.1
= control target key start
LH: loop header
LB: loop body
LE: loop exit
PB: predicated region body
PF: predicated region fallthrough
CT: control target
= control target key end

     0   :  { %vm270_vm0 = vcmask 785408   ;;  %vm1299_vm1 = vcmask 1043456   ;;  %vm1283_vm2 = vcmask 687104   ;;  %vm2175_vm3 = vcmask 654336   ;;  %s5691_s1 = inlined_call_operand.vmem [shape: f32[480,212], index: 1, kind: input, shape index: {}]   ;;  %s5692_s0 = inlined_call_operand.vmem [shape: f32[224,480], index: 0, kind: input, shape index: {}]   ;;  %s5693_s3 = inlined_call_operand.vmem [shape: f32[5,84,208], index: 3, kind: input, shape index: {}]   ;;  %s5694_s2 = inlined_call_operand.vmem [shape: f32[1,84], index: 2, kind: input, shape index: {}]   ;;  %s5695_s4 = inlined_call_operand.vmem [shape: f32[1,80], index: 4, kind: input, shape index: {}]   ;;  %s5696_s5 = inlined_call_operand.vmem [shape: f32[5,80,120], index: 5, kind: input, shape index: {}]   ;;  %s5697_s7 = inlined_call_operand.vmem [shape: f32[120,84], index: 7, kind: input, shape index: {}]   ;;  %s5698_s6 = inlined_call_operand.vmem [shape: f32[1,120], index: 6, kind: input, shape index: {}]   ;;  %s5699_s8 = inlined_call_operand.vmem [shape: f32[1,84], index: 8, kind: input, shape index: {}]   ;;  %s5700_s9 = inlined_call_operand.vmem [shape: f32[84,128], index: 9, kind: input, shape index: {}]   ;;  %s5701_s10 = inlined_call_operand.vmem [shape: f32[1,128], index: 10, kind: input, shape index: {}]   ;;  %s5702_s11 = inlined_call_operand.vmem [shape: f32[8,128], index: 11, kind: output, shape index: {}]  }
   0x1   :  { %v212_v0 = vld [vmem:[%s5691_s1 + $0x1f0] sm:$0xff]  ;;  %v210_v3 = vld [vmem:[%s5691_s1 + $0x1e0] sm:$0xff]  ;;  %v2973_v53 = vld [vmem:[%s5692_s0 + $0x18] sm:$0xff]  ;;  %vm2352_vm4 = vcmask 982016  }
   0x2   :  { %v244_v1 = vld [vmem:[%s5691_s1 + $0x2f0] sm:$0xff]  ;;  %456 = vmatpush.msra.mxu1 %v212_v0  ;;  %v242_v4 = vld [vmem:[%s5691_s1 + $0x2e0] sm:$0xff]  ;;  %v181_v55 = vld [vmem:[%s5691_s1 + $0xf8] sm:$0xff] }
   0x3   :  { %v180_v2 = vld [vmem:[%s5691_s1 + $0xf0] sm:$0xff]  ;;  %557 = vmatpush.msra.mxu2 %v244_v1  ;;  %v178_v5 = vld [vmem:[%s5691_s1 + $0xe0] sm:$0xff]  ;;  %v179_v60 = vld [vmem:[%s5691_s1 + $0xe8] sm:$0xff] }
   0x4   :  { %355 = vmatpush.msra.mxu0 %v180_v2  ;;  %v208_v6 = vld [vmem:[%s5691_s1 + $0x1d0] sm:$0xff]  ;;  %457 = vmatpush.msra.mxu1 %v210_v3  ;;  %v206_v10 = vld [vmem:[%s5691_s1 + $0x1c0] sm:$0xff]  ;;  %v3004_v62 = vld [vmem:[%s5692_s0 + $0x8] sm:$0xff] }
   0x5   :  { %v240_v7 = vld [vmem:[%s5691_s1 + $0x2d0] sm:$0xff]  ;;  %558 = vmatpush.msra.mxu2 %v242_v4  ;;  %v238_v11 = vld [vmem:[%s5691_s1 + $0x2c0] sm:$0xff]  ;;  %v269_v1 = vld [vmem:[%s5691_s1 + $0x3b8] sm:$0xff] }
   0x6   :  { %v268_v8 = vld [vmem:[%s5691_s1 + $0x3b0] sm:$0xff]  ;;  %356 = vmatpush.msra.mxu0 %v178_v5  ;;  %v266_v12 = vld [vmem:[%s5691_s1 + $0x3a0] sm:$0xff]  ;;  %458 = vmatpush.msra.mxu1 %v208_v6  ;;  %v213_v3 = vld [vmem:[%s5691_s1 + $0x1f8] sm:$0xff] }
   0x7   :  { %v176_v9 = vld [vmem:[%s5691_s1 + $0xd0] sm:$0xff]  ;;  %662 = vmatpush.msra.mxu3 %v268_v8  ;;  %559 = vmatpush.msra.mxu2 %v240_v7  ;;  %v174_v13 = vld [vmem:[%s5691_s1 + $0xc0] sm:$0xff]  ;;  %v245_v4 = vld [vmem:[%s5691_s1 + $0x2f8] sm:$0xff] }
   0x8   :  { %v264_v14 = vld [vmem:[%s5691_s1 + $0x390] sm:$0xff]  ;;  %357 = vmatpush.msra.mxu0 %v176_v9  ;;  %459 = vmatpush.msra.mxu1 %v206_v10  ;;  %v262_v18 = vld [vmem:[%s5691_s1 + $0x380] sm:$0xff]  ;;  %v3033_v5 = vld [vmem:[%s5692_s0 + $0x38] sm:$0xff] }
   0x9   :  { %663 = vmatpush.msra.mxu3 %v266_v12  ;;  %v204_v15 = vld [vmem:[%s5691_s1 + $0x1b0] sm:$0xff]  ;;  %560 = vmatpush.msra.mxu2 %v238_v11  ;;  %v202_v19 = vld [vmem:[%s5691_s1 + $0x1a0] sm:$0xff]  ;;  %v267_v6 = vld [vmem:[%s5691_s1 + $0x3a8] sm:$0xff] }
   0xa   :  { %v236_v16 = vld [vmem:[%s5691_s1 + $0x2b0] sm:$0xff]  ;;  %358 = vmatpush.msra.mxu0 %v174_v13  ;;  %v234_v20 = vld [vmem:[%s5691_s1 + $0x2a0] sm:$0xff]  ;;  %460 = vmatpush.msra.mxu1 %v204_v15  ;;  %v211_v7 = vld [vmem:[%s5691_s1 + $0x1e8] sm:$0xff] }
   0xb   :  { %v172_v17 = vld [vmem:[%s5691_s1 + $0xb0] sm:$0xff]  ;;  %664 = vmatpush.msra.mxu3 %v264_v14  ;;  %561 = vmatpush.msra.mxu2 %v236_v16  ;;  %v170_v21 = vld [vmem:[%s5691_s1 + $0xa0] sm:$0xff]  ;;  %v243_v8 = vld [vmem:[%s5691_s1 + $0x2e8] sm:$0xff] }
   0xc   :  { %v260_v22 = vld [vmem:[%s5691_s1 + $0x370] sm:$0xff]  ;;  %359 = vmatpush.msra.mxu0 %v172_v17  ;;  %461 = vmatpush.msra.mxu1 %v202_v19  ;;  %v258_v26 = vld [vmem:[%s5691_s1 + $0x360] sm:$0xff]  ;;  %v177_v9 = vld [vmem:[%s5691_s1 + $0xd8] sm:$0xff] }
   0xd   :  { %665 = vmatpush.msra.mxu3 %v262_v18  ;;  %v200_v23 = vld [vmem:[%s5691_s1 + $0x190] sm:$0xff]  ;;  %562 = vmatpush.msra.mxu2 %v234_v20  ;;  %v198_v27 = vld [vmem:[%s5691_s1 + $0x180] sm:$0xff]  ;;  %v209_v10 = vld [vmem:[%s5691_s1 + $0x1d8] sm:$0xff] }
   0xe   :  { %v232_v24 = vld [vmem:[%s5691_s1 + $0x290] sm:$0xff]  ;;  %360 = vmatpush.msra.mxu0 %v170_v21  ;;  %v230_v28 = vld [vmem:[%s5691_s1 + $0x280] sm:$0xff]  ;;  %462 = vmatpush.msra.mxu1 %v200_v23  ;;  %v241_v11 = vld [vmem:[%s5691_s1 + $0x2d8] sm:$0xff] }
   0xf   :  { %v168_v25 = vld [vmem:[%s5691_s1 + $0x90] sm:$0xff]  ;;  %666 = vmatpush.msra.mxu3 %v260_v22  ;;  %563 = vmatpush.msra.mxu2 %v232_v24  ;;  %v166_v29 = vld [vmem:[%s5691_s1 + $0x80] sm:$0xff]  ;;  %v265_v12 = vld [vmem:[%s5691_s1 + $0x398] sm:$0xff] }
  0x10   :  { %v256_v30 = vld [vmem:[%s5691_s1 + $0x350] sm:$0xff]  ;;  %361 = vmatpush.msra.mxu0 %v168_v25  ;;  %463 = vmatpush.msra.mxu1 %v198_v27  ;;  %v254_v34 = vld [vmem:[%s5691_s1 + $0x340] sm:$0xff]  ;;  %v3062_v13 = vld [vmem:[%s5692_s0 + $0x28] sm:$0xff] }
  0x11   :  { %667 = vmatpush.msra.mxu3 %v258_v26  ;;  %v196_v31 = vld [vmem:[%s5691_s1 + $0x170] sm:$0xff]  ;;  %564 = vmatpush.msra.mxu2 %v230_v28  ;;  %v194_v35 = vld [vmem:[%s5691_s1 + $0x160] sm:$0xff]  ;;  %v175_v14 = vld [vmem:[%s5691_s1 + $0xc8] sm:$0xff] }
  0x12   :  { %v228_v32 = vld [vmem:[%s5691_s1 + $0x270] sm:$0xff]  ;;  %362 = vmatpush.msra.mxu0 %v166_v29  ;;  %v226_v36 = vld [vmem:[%s5691_s1 + $0x260] sm:$0xff]  ;;  %464 = vmatpush.msra.mxu1 %v196_v31  ;;  %v3082_v17 = vld [vmem:[%s5692_s0 + $0x58] sm:$0xff] }
  0x13   :  { %v164_v33 = vld [vmem:[%s5691_s1 + $0x70] sm:$0xff]  ;;  %668 = vmatpush.msra.mxu3 %v256_v30  ;;  %565 = vmatpush.msra.mxu2 %v228_v32  ;;  %v162_v37 = vld [vmem:[%s5691_s1 + $0x60] sm:$0xff]  ;;  %v207_v18 = vld [vmem:[%s5691_s1 + $0x1c8] sm:$0xff] }
  0x14   :  { %v252_v38 = vld [vmem:[%s5691_s1 + $0x330] sm:$0xff]  ;;  %363 = vmatpush.msra.mxu0 %v164_v33  ;;  %465 = vmatpush.msra.mxu1 %v194_v35  ;;  %v250_v42 = vld [vmem:[%s5691_s1 + $0x320] sm:$0xff]  ;;  %v239_v19 = vld [vmem:[%s5691_s1 + $0x2c8] sm:$0xff] }
  0x15   :  { %669 = vmatpush.msra.mxu3 %v254_v34  ;;  %v192_v39 = vld [vmem:[%s5691_s1 + $0x150] sm:$0xff]  ;;  %566 = vmatpush.msra.mxu2 %v226_v36  ;;  %v190_v43 = vld [vmem:[%s5691_s1 + $0x140] sm:$0xff]  ;;  %v3096_v20 = vld [vmem:[%s5692_s0 + $0x48] sm:$0xff] }
  0x16   :  { %v224_v40 = vld [vmem:[%s5691_s1 + $0x250] sm:$0xff]  ;;  %364 = vmatpush.msra.mxu0 %v162_v37  ;;  %v222_v44 = vld [vmem:[%s5691_s1 + $0x240] sm:$0xff]  ;;  %466 = vmatpush.msra.mxu1 %v192_v39  ;;  %v3113_v23 = vld [vmem:[%s5692_s0 + $0x78] sm:$0xff] }
  0x17   :  { %v160_v41 = vld [vmem:[%s5691_s1 + $0x50] sm:$0xff]  ;;  %670 = vmatpush.msra.mxu3 %v252_v38  ;;  %567 = vmatpush.msra.mxu2 %v224_v40  ;;  %v158_v45 = vld [vmem:[%s5691_s1 + $0x40] sm:$0xff]  ;;  %v173_v24 = vld [vmem:[%s5691_s1 + $0xb8] sm:$0xff] }
  0x18   :  { %v248_v46 = vld [vmem:[%s5691_s1 + $0x310] sm:$0xff]  ;;  %365 = vmatpush.msra.mxu0 %v160_v41  ;;  %467 = vmatpush.msra.mxu1 %v190_v43  ;;  %v246_v50 = vld [vmem:[%s5691_s1 + $0x300] sm:$0xff]  ;;  %v3124_v25 = vld [vmem:[%s5692_s0 + $0x68] sm:$0xff] }
  0x19   :  { %671 = vmatpush.msra.mxu3 %v250_v42  ;;  %v188_v47 = vld [vmem:[%s5691_s1 + $0x130] sm:$0xff]  ;;  %568 = vmatpush.msra.mxu2 %v222_v44  ;;  %v186_v51 = vld [vmem:[%s5691_s1 + $0x120] sm:$0xff]  ;;  %v3141_v28 = vld [vmem:[%s5692_s0 + $0x98] sm:$0xff] }
  0x1a   :  { %v220_v48 = vld [vmem:[%s5691_s1 + $0x230] sm:$0xff]  ;;  %366 = vmatpush.msra.mxu0 %v158_v45  ;;  %v218_v52 = vld [vmem:[%s5691_s1 + $0x220] sm:$0xff]  ;;  %468 = vmatpush.msra.mxu1 %v188_v47  ;;  %v263_v29 = vld [vmem:[%s5691_s1 + $0x388] sm:$0xff] }
  0x1b   :  { %v156_v49 = vld [vmem:[%s5691_s1 + $0x30] sm:$0xff]  ;;  %672 = vmatpush.msra.mxu3 %v248_v46  ;;  %569 = vmatpush.msra.mxu2 %v220_v48  ;;  %v154_v54 = vld [vmem:[%s5691_s1 + $0x20] sm:$0xff]  ;;  %v205_v30 = vld [vmem:[%s5691_s1 + $0x1b8] sm:$0xff] }
  0x1c   :  { %367 = vmatpush.msra.mxu0 %v156_v49  ;;  %v184_v56 = vld [vmem:[%s5691_s1 + $0x110] sm:$0xff]  ;;  %469 = vmatpush.msra.mxu1 %v186_v51  ;;  %v182_v59 = vld [vmem:[%s5691_s1 + $0x100] sm:$0xff]  ;;  %v237_v31 = vld [vmem:[%s5691_s1 + $0x2b8] sm:$0xff] }
  0x1d   :  { %673 = vmatpush.msra.mxu3 %v246_v50  ;;  %570 = vmatpush.msra.mxu2 %v218_v52  ;;  %v216_v57 = vld [vmem:[%s5691_s1 + $0x210] sm:$0xff]  ;;  %v214_v61 = vld [vmem:[%s5691_s1 + $0x200] sm:$0xff]  ;;  %v3158_v32 = vld [vmem:[%s5692_s0 + $0x88] sm:$0xff] }
  0x1e   :  { %v152_v58 = vld [vmem:[%s5691_s1 + $0x10] sm:$0xff]  ;;  %2423 = vmatmul.msk.f32.vlgmr.msra.gmra.mxu3 %vm270_vm0, %v2973_v53  ;;  %368 = vmatpush.msra.mxu0 %v154_v54  ;;  %v150_v0 = vld [vmem:[%s5691_s1] sm:$0xff]  ;;  %v3175_v35 = vld [vmem:[%s5692_s0 + $0xb8] sm:$0xff] }
  0x1f   :  { %759 = vmatpush.msrb.mxu3 %v181_v55  ;;  %470 = vmatpush.msra.mxu1 %v184_v56  ;;  %v3009_v63 = vld [vmem:[%s5692_s0 + $0x10] sm:$0xff]  ;;  %v3020_v2 = vld [vmem:[%s5692_s0] sm:$0xff]  ;;  %v171_v36 = vld [vmem:[%s5691_s1 + $0xa8] sm:$0xff] }
  0x20   :  { %571 = vmatpush.msra.mxu2 %v216_v57  ;;  %369 = vmatpush.msra.mxu0 %v152_v58  ;;  %v3070_v15 = vld [vmem:[%s5692_s0 + $0x30] sm:$0xff]  ;;  %v3075_v16 = vld [vmem:[%s5692_s0 + $0x20] sm:$0xff]  ;;  %v3186_v37 = vld [vmem:[%s5692_s0 + $0xa8] sm:$0xff] }
  0x21   :  { %471 = vmatpush.msra.mxu1 %v182_v59  ;;  %760 = vmatpush.msrb.mxu3 %v179_v60  ;;  %v3101_v21 = vld [vmem:[%s5692_s0 + $0x50] sm:$0xff]  ;;  %v3106_v22 = vld [vmem:[%s5692_s0 + $0x40] sm:$0xff]  ;;  %v3203_v40 = vld [vmem:[%s5692_s0 + $0xd8] sm:$0xff] }
  0x22   :  { %572 = vmatpush.msra.mxu2 %v214_v61  ;;  %472 = vmatmul.f32.vlgmr.msra.gmra.mxu1 %v3004_v62  ;;  %v3129_v26 = vld [vmem:[%s5692_s0 + $0x70] sm:$0xff]  ;;  %v3134_v27 = vld [vmem:[%s5692_s0 + $0x60] sm:$0xff]  ;;  %v203_v41 = vld [vmem:[%s5691_s1 + $0x1a8] sm:$0xff] }
  0x23   :  { %573 = vmatmul.f32.vlgmr.msra.gmra.mxu2 %v3009_v63  ;;  %370 = vmatpush.msra.mxu0 %v150_v0  ;;  %v3163_v33 = vld [vmem:[%s5692_s0 + $0x90] sm:$0xff]  ;;  %v3168_v34 = vld [vmem:[%s5692_s0 + $0x80] sm:$0xff]  ;;  %v235_v42 = vld [vmem:[%s5691_s1 + $0x2a8] sm:$0xff] }
  0x24   :  { %1066 = vmatpush.msrb.mxu2 %v269_v1  ;;  %371 = vmatmul.f32.vlgmr.msra.gmra.mxu0 %v3020_v2  ;;  %v3191_v38 = vld [vmem:[%s5692_s0 + $0xb0] sm:$0xff]  ;;  %v3196_v39 = vld [vmem:[%s5692_s0 + $0xa0] sm:$0xff]  ;;  %v261_v43 = vld [vmem:[%s5691_s1 + $0x378] sm:$0xff] }
  0x25   :  { %860 = vmatpush.msrb.mxu0 %v213_v3  ;;  %961 = vmatpush.msrb.mxu1 %v245_v4  ;;  %v3220_v44 = vld [vmem:[%s5692_s0 + $0xc8] sm:$0xff]  ;;  %v3225_v45 = vld [vmem:[%s5692_s0 + $0xd0] sm:$0xff]  ;;  %v3230_v46 = vld [vmem:[%s5692_s0 + $0xc0] sm:$0xff] }
  0x26   :  { %2424 = vmatmul.msk.f32.gmra.mxu3 %vm270_vm0, %v3033_v5  ;;  %1067 = vmatpush.msrb.mxu2 %v267_v6  ;;  %v3237_v47 = vld [vmem:[%s5692_s0 + $0xf8] sm:$0xff]  ;;  %v3251_v50 = vld [vmem:[%s5692_s0 + $0xe8] sm:$0xff]  ;;  %v3256_v51 = vld [vmem:[%s5692_s0 + $0xf0] sm:$0xff] }
  0x27   :  { %861 = vmatpush.msrb.mxu0 %v211_v7  ;;  %962 = vmatpush.msrb.mxu1 %v243_v8  ;;  %v169_v48 = vld [vmem:[%s5691_s1 + $0x98] sm:$0xff]  ;;  %v3261_v52 = vld [vmem:[%s5692_s0 + $0xe0] sm:$0xff]  ;;  %v167_v56 = vld [vmem:[%s5691_s1 + $0x88] sm:$0xff] }
  0x28   :  { %761 = vmatpush.msrb.mxu3 %v177_v9  ;;  %1068 = vmatpush.msrb.mxu2 %v265_v12  ;;  %v201_v49 = vld [vmem:[%s5691_s1 + $0x198] sm:$0xff]  ;;  %v259_v57 = vld [vmem:[%s5691_s1 + $0x368] sm:$0xff]  ;;  %v3290_v59 = vld [vmem:[%s5692_s0 + $0x110] sm:$0xff] }
  0x29   :  { %862 = vmatpush.msrb.mxu0 %v209_v10  ;;  %963 = vmatpush.msrb.mxu1 %v241_v11  ;;  %v3268_v54 = vld [vmem:[%s5692_s0 + $0x118] sm:$0xff]  ;;  %v3285_v58 = vld [vmem:[%s5692_s0 + $0x108] sm:$0xff]  ;;  %v3295_v60 = vld [vmem:[%s5692_s0 + $0x100] sm:$0xff] }
  0x2a   :  { %475 = vmatmul.f32.gmra.mxu1 %v3062_v13  ;;  %762 = vmatpush.msrb.mxu3 %v175_v14  ;;  %v233_v55 = vld [vmem:[%s5691_s1 + $0x298] sm:$0xff]  ;;  %v199_v0 = vld [vmem:[%s5691_s1 + $0x188] sm:$0xff]  ;;  %v3321_v4 = vld [vmem:[%s5692_s0 + $0x130] sm:$0xff] }
  0x2b   :  { %576 = vmatmul.f32.gmra.mxu2 %v3070_v15  ;;  %863 = vmatpush.msrb.mxu0 %v207_v18  ;;  %v3302_v61 = vld [vmem:[%s5692_s0 + $0x138] sm:$0xff]  ;;  %v231_v1 = vld [vmem:[%s5691_s1 + $0x288] sm:$0xff]  ;;  %v3326_v6 = vld [vmem:[%s5692_s0 + $0x120] sm:$0xff] }
  0x2c   :  { %374 = vmatmul.f32.gmra.mxu0 %v3075_v16  ;;  %964 = vmatpush.msrb.mxu1 %v239_v19  ;;  %v3316_v3 = vld [vmem:[%s5692_s0 + $0x128] sm:$0xff]  ;;  %v3333_v7 = vld [vmem:[%s5692_s0 + $0x158] sm:$0xff]  ;;  %v3349_v10 = vld [vmem:[%s5692_s0 + $0x150] sm:$0xff] }
  0x2d   :  { %763 = vmatpush.msrb.mxu3 %v173_v24  ;;  %1069 = vmatpush.msrb.mxu2 %v263_v29  ;;  %v165_v8 = vld [vmem:[%s5691_s1 + $0x78] sm:$0xff]  ;;  %v3344_v9 = vld [vmem:[%s5692_s0 + $0x148] sm:$0xff]  ;;  %v3354_v11 = vld [vmem:[%s5692_s0 + $0x140] sm:$0xff] }
  0x2e   :  { %2425 = vmatmul.msk.f32.gmra.mxu3 %vm270_vm0, %v3082_v17  ;;  %864 = vmatpush.msrb.mxu0 %v205_v30  ;;  %v3361_v12 = vld [vmem:[%s5692_s0 + $0x178] sm:$0xff]  ;;  %v3378_v24 = vld [vmem:[%s5692_s0 + $0x168] sm:$0xff]  ;;  %v3383_v29 = vld [vmem:[%s5692_s0 + $0x170] sm:$0xff] }
  0x2f   :  { %965 = vmatpush.msrb.mxu1 %v237_v31  ;;  %764 = vmatpush.msrb.mxu3 %v171_v36  ;;  %5818 = vst [vmem:[#allocation2_spill] sm:$0xff] %v3361_v12  ;;  %v257_v14 = vld [vmem:[%s5691_s1 + $0x358] sm:$0xff]  ;;  %v3388_v30 = vld [vmem:[%s5692_s0 + $0x160] sm:$0xff]  ;;  %v163_v36 = vld [vmem:[%s5691_s1 + $0x68] sm:$0xff] }
  0x30   :  { %865 = vmatpush.msrb.mxu0 %v203_v41  ;;  %1070 = vmatpush.msrb.mxu2 %v261_v43  ;;  %v197_v18 = vld [vmem:[%s5691_s1 + $0x178] sm:$0xff]  ;;  %5819 = vst [vmem:[#allocation3_spill] sm:$0xff] %v3378_v24  ;;  %v3406_v41 = vld [vmem:[%s5692_s0 + $0x188] sm:$0xff]  ;;  %v3416_v43 = vld [vmem:[%s5692_s0 + $0x180] sm:$0xff] }
  0x31   :  { %966 = vmatpush.msrb.mxu1 %v235_v42  ;;  %765 = vmatpush.msrb.mxu3 %v169_v48  ;;  %v229_v19 = vld [vmem:[%s5691_s1 + $0x278] sm:$0xff]  ;;  %5820 = vst [vmem:[#allocation4_spill] sm:$0xff] %v3383_v29  ;;  %v3411_v42 = vld [vmem:[%s5692_s0 + $0x190] sm:$0xff] }
  0x32   :  { %478 = vmatmul.f32.gmra.mxu1 %v3096_v20  ;;  %866 = vmatpush.msrb.mxu0 %v201_v49  ;;  %5821 = vst [vmem:[#allocation5_spill] sm:$0xff] %v3388_v30  ;;  %v3395_v31 = vld [vmem:[%s5692_s0 + $0x198] sm:$0xff]  ;;  %v195_v49 = vld [vmem:[%s5691_s1 + $0x168] sm:$0xff] }
  0x33   :  { %579 = vmatmul.f32.gmra.mxu2 %v3101_v21  ;;  %967 = vmatpush.msrb.mxu1 %v233_v55  ;;  %5822 = vst [vmem:[#allocation6_spill] sm:$0xff] %v3395_v31  ;;  %v3423_v48 = vld [vmem:[%s5692_s0 + $0x1b8] sm:$0xff]  ;;  %v227_v55 = vld [vmem:[%s5691_s1 + $0x268] sm:$0xff] }
  0x34   :  { %377 = vmatmul.f32.gmra.mxu0 %v3106_v22  ;;  %766 = vmatpush.msrb.mxu3 %v167_v56  ;;  %5823 = vst [vmem:[#allocation7_spill] sm:$0xff] %v3406_v41  ;;  %v3437_v56 = vld [vmem:[%s5692_s0 + $0x1a8] sm:$0xff] }
  0x35   :  { %1071 = vmatpush.msrb.mxu2 %v259_v57  ;;  %867 = vmatpush.msrb.mxu0 %v199_v0  ;;  %5824 = vst [vmem:[#allocation8_spill] sm:$0xff] %v3411_v42  ;;  %v3442_v57 = vld [vmem:[%s5692_s0 + $0x1b0] sm:$0xff]  ;;  %v3447_v0 = vld [vmem:[%s5692_s0 + $0x1a0] sm:$0xff] }
  0x36   :  { %2426 = vmatmul.msk.f32.gmra.mxu3 %vm270_vm0, %v3113_v23  ;;  %968 = vmatpush.msrb.mxu1 %v231_v1  ;;  %5825 = vst [vmem:[#allocation9_spill] sm:$0xff] %v3416_v43  ;;  %v255_v1 = vld [vmem:[%s5691_s1 + $0x348] sm:$0xff] }
  0x37   :  { %767 = vmatpush.msrb.mxu3 %v165_v8  ;;  %1072 = vmatpush.msrb.mxu2 %v257_v14  ;;  %5826 = vst [vmem:[#allocation10_spill] sm:$0xff] %v3423_v48  ;;  %v3457_v8 = vld [vmem:[%s5692_s0 + $0x1d8] sm:$0xff] }
  0x38   :  { %868 = vmatpush.msrb.mxu0 %v197_v18  ;;  %969 = vmatpush.msrb.mxu1 %v229_v19  ;;  %5827 = vst [vmem:[#allocation11_spill] sm:$0xff] %v3437_v56  ;;  %v161_v14 = vld [vmem:[%s5691_s1 + $0x58] sm:$0xff]  ;;  %v3468_v18 = vld [vmem:[%s5692_s0 + $0x1c8] sm:$0xff]  ;;  %v3473_v19 = vld [vmem:[%s5692_s0 + $0x1d0] sm:$0xff] }
  0x39   :  { %768 = vmatpush.msrb.mxu3 %v163_v36  ;;  %5828 = vst [vmem:[#allocation12_spill] sm:$0xff] %v3442_v57  ;;  %1073 = vmatpush.msrb.mxu2 %v255_v1  ;;  %v3478_v36 = vld [vmem:[%s5692_s0 + $0x1c0] sm:$0xff]  ;;  %v225_v1 = vld [vmem:[%s5691_s1 + $0x258] sm:$0xff] }
  0x3a   :  { %481 = vmatmul.f32.gmra.mxu1 %v3124_v25  ;;  %869 = vmatpush.msrb.mxu0 %v195_v49  ;;  %5829 = vst [vmem:[#allocation13_spill] sm:$0xff] %v3447_v0  ;;  %v193_v49 = vld [vmem:[%s5691_s1 + $0x158] sm:$0xff] }
  0x3b   :  { %582 = vmatmul.f32.gmra.mxu2 %v3129_v26  ;;  %970 = vmatpush.msrb.mxu1 %v227_v55  ;;  %5830 = vst [vmem:[#allocation14_spill] sm:$0xff] %v3457_v8  ;;  %v3488_v55 = vld [vmem:[%s5692_s0 + $0x1f8] sm:$0xff] }
  0x3c   :  { %380 = vmatmul.f32.gmra.mxu0 %v3134_v27  ;;  %769 = vmatpush.msrb.mxu3 %v161_v14  ;;  %5831 = vst [vmem:[#allocation15_spill] sm:$0xff] %v3468_v18  ;;  %v3499_v14 = vld [vmem:[%s5692_s0 + $0x1e8] sm:$0xff] }
  0x3d   :  { %5832 = vst [vmem:[#allocation16_spill] sm:$0xff] %v3473_v19  ;;  %870 = vmatpush.msrb.mxu0 %v193_v49  ;;  %971 = vmatpush.msrb.mxu1 %v225_v1  ;;  %v3504_v49 = vld [vmem:[%s5692_s0 + $0x1f0] sm:$0xff]  ;;  %v159_v1 = vld [vmem:[%s5691_s1 + $0x48] sm:$0xff] }
  0x3e   :  { %2427 = vmatmul.msk.f32.gmra.mxu3 %vm270_vm0, %v3141_v28  ;;  %5833 = vst [vmem:[#allocation17_spill] sm:$0xff] %v3478_v36 }
  0x3f   :  { %5834 = vst [vmem:[#allocation18_spill] sm:$0xff] %v3488_v55  ;;  %770 = vmatpush.msrb.mxu3 %v159_v1  ;;  %v3535_v1 = vld [vmem:[%s5692_s0 + $0x210] sm:$0xff] }
  0x40   :  { %5835 = vst [vmem:[#allocation19_spill] sm:$0xff] %v3499_v14 }
  0x41   :  { %5836 = vst [vmem:[#allocation20_spill] sm:$0xff] %v3504_v49 }
  0x42   :  { %484 = vmatmul.f32.gmra.mxu1 %v3158_v32  ;;  %5840 = vst [vmem:[#allocation24_spill] sm:$0xff] %v3535_v1 }
  0x43   :  { %585 = vmatmul.f32.gmra.mxu2 %v3163_v33 }
  0x44   :  { %383 = vmatmul.f32.gmra.mxu0 %v3168_v34 }
  0x46   :  { %2428 = vmatmul.msk.f32.gmra.mxu3 %vm270_vm0, %v3175_v35 }
  0x4a   :  { %487 = vmatmul.f32.gmra.mxu1 %v3186_v37 }
  0x4b   :  { %588 = vmatmul.f32.gmra.mxu2 %v3191_v38 }
  0x4c   :  { %386 = vmatmul.f32.gmra.mxu0 %v3196_v39 }
  0x4e   :  { %2429 = vmatmul.msk.f32.gmra.mxu3 %vm270_vm0, %v3203_v40 }
  0x52   :  { %490 = vmatmul.f32.gmra.mxu1 %v3220_v44 }
  0x53   :  { %591 = vmatmul.f32.gmra.mxu2 %v3225_v45 }
  0x54   :  { %389 = vmatmul.f32.gmra.mxu0 %v3230_v46 }
  0x56   :  { %2430 = vmatmul.msk.f32.gmra.mxu3 %vm270_vm0, %v3237_v47 }
  0x5a   :  { %493 = vmatmul.f32.gmra.mxu1 %v3251_v50 }
  0x5b   :  { %594 = vmatmul.f32.gmra.mxu2 %v3256_v51 }
  0x5c   :  { %392 = vmatmul.f32.gmra.mxu0 %v3261_v52 }
  0x5e   :  { %2431 = vmatmul.msk.f32.gmra.mxu3 %vm270_vm0, %v3268_v54 }
  0x62   :  { %496 = vmatmul.f32.gmra.mxu1 %v3285_v58 }
  0x63   :  { %597 = vmatmul.f32.gmra.mxu2 %v3290_v59 }
  0x64   :  { %395 = vmatmul.f32.gmra.mxu0 %v3295_v60 }
  0x66   :  { %2432 = vmatmul.msk.f32.gmra.mxu3 %vm270_vm0, %v3302_v61 }
  0x6a   :  { %499 = vmatmul.f32.gmra.mxu1 %v3316_v3 }
  0x6b   :  { %600 = vmatmul.f32.gmra.mxu2 %v3321_v4 }
  0x6c   :  { %398 = vmatmul.f32.gmra.mxu0 %v3326_v6 }
  0x6e   :  { %2433 = vmatmul.msk.f32.gmra.mxu3 %vm270_vm0, %v3333_v7 }
  0x72   :  { %502 = vmatmul.f32.gmra.mxu1 %v3344_v9 }
  0x73   :  { %603 = vmatmul.f32.gmra.mxu2 %v3349_v10 }
  0x74   :  { %401 = vmatmul.f32.gmra.mxu0 %v3354_v11 }
  0x76   :  { %2434 = vmatmul.msk.f32.gmra.mxu3 %vm270_vm0, %v3361_v12  ;;  %v3734_v12 = vld [vmem:[%s5692_s0 + $0x2d0] sm:$0xff] }
  0x77   :  { %5867 = vst [vmem:[#allocation51_spill] sm:$0xff] %v3734_v12 }
  0x7a   :  { %505 = vmatmul.f32.gmra.mxu1 %v3378_v24  ;;  %v3701_v24 = vld [vmem:[%s5692_s0 + $0x2b0] sm:$0xff] }
  0x7b   :  { %606 = vmatmul.f32.gmra.mxu2 %v3383_v29  ;;  %5863 = vst [vmem:[#allocation47_spill] sm:$0xff] %v3701_v24  ;;  %v3767_v29 = vld [vmem:[%s5692_s0 + $0x2f0] sm:$0xff] }
  0x7c   :  { %404 = vmatmul.f32.gmra.mxu0 %v3388_v30  ;;  %5871 = vst [vmem:[#allocation55_spill] sm:$0xff] %v3767_v29  ;;  %v3800_v30 = vld [vmem:[%s5692_s0 + $0x310] sm:$0xff] }
  0x7d   :  { %5875 = vst [vmem:[#allocation59_spill] sm:$0xff] %v3800_v30 }
  0x7e   :  { %2435 = vmatmul.msk.f32.gmra.mxu3 %vm270_vm0, %v3395_v31  ;;  %v3630_v31 = vld [vmem:[%s5692_s0 + $0x268] sm:$0xff] }
  0x7f   :  { %5853 = vst [vmem:[#allocation37_spill] sm:$0xff] %v3630_v31 }
  0x82   :  { %508 = vmatmul.f32.gmra.mxu1 %v3406_v41 }
  0x83   :  { %609 = vmatmul.f32.gmra.mxu2 %v3411_v42  ;;  %v3663_v42 = vld [vmem:[%s5692_s0 + $0x288] sm:$0xff] }
  0x84   :  { %407 = vmatmul.f32.gmra.mxu0 %v3416_v43  ;;  %5858 = vst [vmem:[#allocation42_spill] sm:$0xff] %v3663_v42 }
  0x86   :  { %2436 = vmatmul.msk.f32.gmra.mxu3 %vm270_vm0, %v3423_v48 }
  0x8a   :  { %511 = vmatmul.f32.gmra.mxu1 %v3437_v56  ;;  %v3553_v56 = vld [vmem:[%s5692_s0 + $0x238] sm:$0xff] }
  0x8b   :  { %612 = vmatmul.f32.gmra.mxu2 %v3442_v57  ;;  %5842 = vst [vmem:[#allocation26_spill] sm:$0xff] %v3553_v56 }
  0x8c   :  { %410 = vmatmul.f32.gmra.mxu0 %v3447_v0 }
  0x8e   :  { %2437 = vmatmul.msk.f32.gmra.mxu3 %vm270_vm0, %v3457_v8  ;;  %v3522_v8 = vld [vmem:[%s5692_s0 + $0x218] sm:$0xff] }
  0x8f   :  { %5838 = vst [vmem:[#allocation22_spill] sm:$0xff] %v3522_v8 }
  0x92   :  { %514 = vmatmul.f32.gmra.mxu1 %v3468_v18  ;;  %v3509_v18 = vld [vmem:[%s5692_s0 + $0x1e0] sm:$0xff] }
  0x93   :  { %615 = vmatmul.f32.gmra.mxu2 %v3473_v19  ;;  %5837 = vst [vmem:[#allocation21_spill] sm:$0xff] %v3509_v18 }
  0x94   :  { %413 = vmatmul.f32.gmra.mxu0 %v3478_v36  ;;  %v3530_v36 = vld [vmem:[%s5692_s0 + $0x208] sm:$0xff] }
  0x95   :  { %5839 = vst [vmem:[#allocation23_spill] sm:$0xff] %v3530_v36 }
  0x96   :  { %2438 = vmatmul.msk.f32.gmra.mxu3 %vm270_vm0, %v3488_v55  ;;  %v253_v55 = vld [vmem:[%s5691_s1 + $0x338] sm:$0xff] }
  0x97   :  { %1074 = vmatpush.msrb.mxu2 %v253_v55  ;;  %v3540_v55 = vld [vmem:[%s5692_s0 + $0x200] sm:$0xff] }
  0x98   :  { %5841 = vst [vmem:[#allocation25_spill] sm:$0xff] %v3540_v55 }
  0x9a   :  { %517 = vmatmul.f32.gmra.mxu1 %v3499_v14 }
  0x9b   :  { %618 = vmatmul.f32.gmra.mxu2 %v3504_v49 }
  0x9c   :  { %416 = vmatmul.f32.gmra.mxu0 %v3509_v18  ;;  %v223_v18 = vld [vmem:[%s5691_s1 + $0x248] sm:$0xff] }
  0x9d   :  { %972 = vmatpush.msrb.mxu1 %v223_v18 }
  0x9e   :  { %2439 = vmatmul.msk.f32.gmra.mxu3 %vm270_vm0, %v3522_v8  ;;  %v191_v8 = vld [vmem:[%s5691_s1 + $0x148] sm:$0xff] }
  0x9f   :  { %v473_v19 = vpop.f32.mrf.mxu1  ;;  %871 = vmatpush.msrb.mxu0 %v191_v8  ;;  %v3561_v8 = vld [vmem:[%s5692_s0 + $0x228] sm:$0xff] }
  0xa0   :  { %5843 = vst [vmem:[#allocation27_spill] sm:$0xff] %v3561_v8 }
  0xa1   :  { %v372_v14 = vpop.f32.mrf.mxu0  ;;  %v675_v49 = vpop.f32.mrf.mxu3 }
  0xa2   :  { %520 = vmatmul.f32.gmra.mxu1 %v3530_v36  ;;  %v474_v48 = vadd.f32 %v473_v19, %v372_v14  ;;  %v3566_v36 = vld [vmem:[%s5692_s0 + $0x230] sm:$0xff]  ;;  %v3573_v14 = vld [vmem:[%s5692_s0 + $0x220] sm:$0xff] }
  0xa3   :  { %621 = vmatmul.f32.gmra.mxu2 %v3535_v1  ;;  %5844 = vst [vmem:[#allocation28_spill] sm:$0xff] %v3566_v36 }
  0xa4   :  { %419 = vmatmul.f32.gmra.mxu0 %v3540_v55  ;;  %5846 = vst [vmem:[#allocation30_spill] sm:$0xff] %v3573_v14  ;;  %v3597_v55 = vld [vmem:[%s5692_s0 + $0x248] sm:$0xff] }
  0xa5   :  { %5848 = vst [vmem:[#allocation32_spill] sm:$0xff] %v3597_v55 }
  0xa6   :  { %v574_v57 = vpop.f32.mrf.mxu2  ;;  %2440 = vmatmul.msk.f32.gmra.mxu3 %vm270_vm0, %v3553_v56 }
  0xa7   :  { %v575_v0 = vadd.f32 %v574_v57, %v474_v48  ;;  %v476_v41 = vpop.f32.mrf.mxu1  ;;  %v157_v48 = vld [vmem:[%s5691_s1 + $0x38] sm:$0xff] }
  0xa8   :  { %771 = vmatpush.msrb.mxu3 %v157_v48  ;;  %v3583_v57 = vld [vmem:[%s5692_s0 + $0x258] sm:$0xff] }
  0xa9   :  { %v3568_v18 = vadd.f32 %v675_v49, %v575_v0  ;;  %v375_v1 = vpop.f32.mrf.mxu0  ;;  %v678_v19 = vpop.f32.mrf.mxu3  ;;  %5847 = vst [vmem:[#allocation31_spill] sm:$0xff] %v3583_v57  ;;  %v251_v0 = vld [vmem:[%s5691_s1 + $0x328] sm:$0xff]  ;;  %v189_v49 = vld [vmem:[%s5691_s1 + $0x138] sm:$0xff] }
  0xaa   :  { %523 = vmatmul.f32.gmra.mxu1 %v3561_v8  ;;  %1075 = vmatpush.msrb.mxu2 %v251_v0  ;;  %v477_v8 = vadd.f32 %v476_v41, %v375_v1  ;;  %v3602_v0 = vld [vmem:[%s5692_s0 + $0x250] sm:$0xff] }
  0xab   :  { %5845 = vst [vmem:[#allocation29_spill] sm:$0xff] %v3568_v18  ;;  %624 = vmatmul.f32.gmra.mxu2 %v3566_v36  ;;  %872 = vmatpush.msrb.mxu0 %v189_v49  ;;  %v3609_v49 = vld [vmem:[%s5692_s0 + $0x240] sm:$0xff] }
  0xac   :  { %422 = vmatmul.f32.gmra.mxu0 %v3573_v14  ;;  %5849 = vst [vmem:[#allocation33_spill] sm:$0xff] %v3602_v0 }
  0xad   :  { %5851 = vst [vmem:[#allocation35_spill] sm:$0xff] %v3609_v49 }
  0xae   :  { %v577_v48 = vpop.f32.mrf.mxu2  ;;  %2441 = vmatmul.msk.f32.gmra.mxu3 %vm270_vm0, %v3583_v57 }
  0xaf   :  { %v578_v56 = vadd.f32 %v577_v48, %v477_v8  ;;  %v479_v36 = vpop.f32.mrf.mxu1  ;;  %v221_v8 = vld [vmem:[%s5691_s1 + $0x238] sm:$0xff] }
  0xb0   :  { %973 = vmatpush.msrb.mxu1 %v221_v8  ;;  %v3635_v8 = vld [vmem:[%s5692_s0 + $0x270] sm:$0xff] }
  0xb1   :  { %v3604_v14 = vadd.f32 %v678_v19, %v578_v56  ;;  %v378_v41 = vpop.f32.mrf.mxu0  ;;  %v681_v1 = vpop.f32.mrf.mxu3  ;;  %v3619_v56 = vld [vmem:[%s5692_s0 + $0x278] sm:$0xff]  ;;  %v155_v19 = vld [vmem:[%s5691_s1 + $0x28] sm:$0xff]  ;;  %5854 = vst [vmem:[#allocation38_spill] sm:$0xff] %v3635_v8 }
  0xb2   :  { %526 = vmatmul.f32.gmra.mxu1 %v3597_v55  ;;  %5852 = vst [vmem:[#allocation36_spill] sm:$0xff] %v3619_v56  ;;  %v480_v48 = vadd.f32 %v479_v36, %v378_v41  ;;  %772 = vmatpush.msrb.mxu3 %v155_v19  ;;  %v3642_v19 = vld [vmem:[%s5692_s0 + $0x260] sm:$0xff] }
  0xb3   :  { %5850 = vst [vmem:[#allocation34_spill] sm:$0xff] %v3604_v14  ;;  %627 = vmatmul.f32.gmra.mxu2 %v3602_v0 }
  0xb4   :  { %425 = vmatmul.f32.gmra.mxu0 %v3609_v49  ;;  %5856 = vst [vmem:[#allocation40_spill] sm:$0xff] %v3642_v19 }
  0xb6   :  { %v580_v57 = vpop.f32.mrf.mxu2  ;;  %2442 = vmatmul.msk.f32.gmra.mxu3 %vm270_vm0, %v3619_v56 }
  0xb7   :  { %v581_v55 = vadd.f32 %v580_v57, %v480_v48  ;;  %v482_v0 = vpop.f32.mrf.mxu1  ;;  %v3649_v57 = vld [vmem:[%s5692_s0 + $0x298] sm:$0xff] }
  0xb8   :  { %5857 = vst [vmem:[#allocation41_spill] sm:$0xff] %v3649_v57 }
  0xb9   :  { %v3637_v49 = vadd.f32 %v681_v1, %v581_v55  ;;  %v381_v36 = vpop.f32.mrf.mxu0  ;;  %v684_v41 = vpop.f32.mrf.mxu3  ;;  %v187_v55 = vld [vmem:[%s5691_s1 + $0x128] sm:$0xff] }
  0xba   :  { %529 = vmatmul.f32.gmra.mxu1 %v3630_v31  ;;  %v219_v1 = vld [vmem:[%s5691_s1 + $0x228] sm:$0xff]  ;;  %v483_v48 = vadd.f32 %v482_v0, %v381_v36  ;;  %873 = vmatpush.msrb.mxu0 %v187_v55  ;;  %v3675_v55 = vld [vmem:[%s5692_s0 + $0x280] sm:$0xff] }
  0xbb   :  { %5855 = vst [vmem:[#allocation39_spill] sm:$0xff] %v3637_v49  ;;  %630 = vmatmul.f32.gmra.mxu2 %v3635_v8  ;;  %974 = vmatpush.msrb.mxu1 %v219_v1 }
  0xbc   :  { %428 = vmatmul.f32.gmra.mxu0 %v3642_v19  ;;  %v3668_v19 = vld [vmem:[%s5692_s0 + $0x290] sm:$0xff]  ;;  %5860 = vst [vmem:[#allocation44_spill] sm:$0xff] %v3675_v55 }
  0xbd   :  { %5859 = vst [vmem:[#allocation43_spill] sm:$0xff] %v3668_v19 }
  0xbe   :  { %v583_v31 = vpop.f32.mrf.mxu2  ;;  %2443 = vmatmul.msk.f32.gmra.mxu3 %vm270_vm0, %v3649_v57 }
  0xbf   :  { %v584_v56 = vadd.f32 %v583_v31, %v483_v48  ;;  %v485_v8 = vpop.f32.mrf.mxu1  ;;  %v3682_v31 = vld [vmem:[%s5692_s0 + $0x2b8] sm:$0xff] }
  0xc0   :  { %5861 = vst [vmem:[#allocation45_spill] sm:$0xff] %v3682_v31 }
  0xc1   :  { %v3670_v43 = vadd.f32 %v684_v41, %v584_v56  ;;  %v384_v0 = vpop.f32.mrf.mxu0  ;;  %v687_v36 = vpop.f32.mrf.mxu3  ;;  %v249_v56 = vld [vmem:[%s5691_s1 + $0x318] sm:$0xff] }
  0xc2   :  { %532 = vmatmul.f32.gmra.mxu1 %v3663_v42  ;;  %v153_v41 = vld [vmem:[%s5691_s1 + $0x18] sm:$0xff]  ;;  %1076 = vmatpush.msrb.mxu2 %v249_v56  ;;  %v486_v1 = vadd.f32 %v485_v8, %v384_v0  ;;  %v3708_v56 = vld [vmem:[%s5692_s0 + $0x2a0] sm:$0xff] }
  0xc3   :  { %633 = vmatmul.f32.gmra.mxu2 %v3668_v19  ;;  %773 = vmatpush.msrb.mxu3 %v153_v41  ;;  %v3696_v19 = vld [vmem:[%s5692_s0 + $0x2a8] sm:$0xff]  ;;  %5864 = vst [vmem:[#allocation48_spill] sm:$0xff] %v3708_v56  ;;  %v3715_v41 = vld [vmem:[%s5692_s0 + $0x2d8] sm:$0xff] }
  0xc4   :  { %431 = vmatmul.f32.gmra.mxu0 %v3675_v55  ;;  %5862 = vst [vmem:[#allocation46_spill] sm:$0xff] %v3696_v19 }
  0xc5   :  { %5865 = vst [vmem:[#allocation49_spill] sm:$0xff] %v3715_v41 }
  0xc6   :  { %v586_v48 = vpop.f32.mrf.mxu2  ;;  %2444 = vmatmul.msk.f32.gmra.mxu3 %vm270_vm0, %v3682_v31 }
  0xc7   :  { %v587_v42 = vadd.f32 %v586_v48, %v486_v1  ;;  %v488_v57 = vpop.f32.mrf.mxu1 }
  0xc9   :  { %v3703_v55 = vadd.f32 %v687_v36, %v587_v42  ;;  %v387_v8 = vpop.f32.mrf.mxu0  ;;  %v690_v0 = vpop.f32.mrf.mxu3  ;;  %v185_v42 = vld [vmem:[%s5691_s1 + $0x118] sm:$0xff] }
  0xca   :  { %535 = vmatmul.f32.gmra.mxu1 %v3696_v19  ;;  %v217_v36 = vld [vmem:[%s5691_s1 + $0x218] sm:$0xff]  ;;  %v489_v1 = vadd.f32 %v488_v57, %v387_v8  ;;  %874 = vmatpush.msrb.mxu0 %v185_v42  ;;  %v3741_v42 = vld [vmem:[%s5692_s0 + $0x2c0] sm:$0xff] }
  0xcb   :  { %636 = vmatmul.f32.gmra.mxu2 %v3701_v24  ;;  %975 = vmatpush.msrb.mxu1 %v217_v36  ;;  %v3729_v24 = vld [vmem:[%s5692_s0 + $0x2c8] sm:$0xff]  ;;  %5868 = vst [vmem:[#allocation52_spill] sm:$0xff] %v3741_v42  ;;  %v3748_v36 = vld [vmem:[%s5692_s0 + $0x2f8] sm:$0xff] }
  0xcc   :  { %434 = vmatmul.f32.gmra.mxu0 %v3708_v56  ;;  %5866 = vst [vmem:[#allocation50_spill] sm:$0xff] %v3729_v24 }
  0xcd   :  { %5869 = vst [vmem:[#allocation53_spill] sm:$0xff] %v3748_v36 }
  0xce   :  { %v589_v48 = vpop.f32.mrf.mxu2  ;;  %2445 = vmatmul.msk.f32.gmra.mxu3 %vm270_vm0, %v3715_v41 }
  0xcf   :  { %v590_v19 = vadd.f32 %v589_v48, %v489_v1  ;;  %v491_v31 = vpop.f32.mrf.mxu1 }
  0xd1   :  { %v3736_v56 = vadd.f32 %v690_v0, %v590_v19  ;;  %v390_v57 = vpop.f32.mrf.mxu0  ;;  %v693_v8 = vpop.f32.mrf.mxu3  ;;  %v151_v19 = vld [vmem:[%s5691_s1 + $0x8] sm:$0xff] }
  0xd2   :  { %538 = vmatmul.f32.gmra.mxu1 %v3729_v24  ;;  %v247_v0 = vld [vmem:[%s5691_s1 + $0x308] sm:$0xff]  ;;  %774 = vmatpush.msrb.mxu3 %v151_v19  ;;  %v492_v1 = vadd.f32 %v491_v31, %v390_v57  ;;  %v3774_v19 = vld [vmem:[%s5692_s0 + $0x2e0] sm:$0xff] }
  0xd3   :  { %639 = vmatmul.f32.gmra.mxu2 %v3734_v12  ;;  %v3762_v12 = vld [vmem:[%s5692_s0 + $0x2e8] sm:$0xff]  ;;  %5872 = vst [vmem:[#allocation56_spill] sm:$0xff] %v3774_v19 }
  0xd4   :  { %437 = vmatmul.f32.gmra.mxu0 %v3741_v42  ;;  %1077 = vmatpush.msrb.mxu2 %v247_v0  ;;  %5870 = vst [vmem:[#allocation54_spill] sm:$0xff] %v3762_v12  ;;  %v3781_v0 = vld [vmem:[%s5692_s0 + $0x318] sm:$0xff] }
  0xd5   :  { %5873 = vst [vmem:[#allocation57_spill] sm:$0xff] %v3781_v0 }
  0xd6   :  { %v592_v48 = vpop.f32.mrf.mxu2  ;;  %2446 = vmatmul.msk.f32.gmra.mxu3 %vm270_vm0, %v3748_v36 }
  0xd7   :  { %v593_v24 = vadd.f32 %v592_v48, %v492_v1  ;;  %v494_v41 = vpop.f32.mrf.mxu1 }
  0xd9   :  { %v3769_v42 = vadd.f32 %v693_v8, %v593_v24  ;;  %v393_v31 = vpop.f32.mrf.mxu0  ;;  %v696_v57 = vpop.f32.mrf.mxu3  ;;  %v183_v24 = vld [vmem:[%s5691_s1 + $0x108] sm:$0xff] }
  0xda   :  { %541 = vmatmul.f32.gmra.mxu1 %v3762_v12  ;;  %v215_v8 = vld [vmem:[%s5691_s1 + $0x208] sm:$0xff]  ;;  %v495_v1 = vadd.f32 %v494_v41, %v393_v31  ;;  %875 = vmatpush.msrb.mxu0 %v183_v24  ;;  %v3807_v24 = vld [vmem:[%s5692_s0 + $0x300] sm:$0xff] }
  0xdb   :  { %642 = vmatmul.f32.gmra.mxu2 %v3767_v29  ;;  %976 = vmatpush.msrb.mxu1 %v215_v8  ;;  %v3795_v29 = vld [vmem:[%s5692_s0 + $0x308] sm:$0xff] }
  0xdc   :  { %440 = vmatmul.f32.gmra.mxu0 %v3774_v19  ;;  %5874 = vst [vmem:[#allocation58_spill] sm:$0xff] %v3795_v29  ;;  %v3824_v8 = vld [vmem:[%s5692_s0 + $0x328] sm:$0xff] }
  0xdd   :  { %5878 = vst [vmem:[#allocation62_spill] sm:$0xff] %v3824_v8 }
  0xde   :  { %v595_v48 = vpop.f32.mrf.mxu2  ;;  %2447 = vmatmul.msk.f32.gmra.mxu3 %vm270_vm0, %v3781_v0 }
  0xdf   :  { %v596_v12 = vadd.f32 %v595_v48, %v495_v1  ;;  %v497_v36 = vpop.f32.mrf.mxu1  ;;  %v3816_v1 = vld [vmem:[%s5692_s0 + $0x338] sm:$0xff] }
  0xe0   :  { %5877 = vst [vmem:[#allocation61_spill] sm:$0xff] %v3816_v1 }
  0xe1   :  { %v3802_v19 = vadd.f32 %v696_v57, %v596_v12  ;;  %v396_v41 = vpop.f32.mrf.mxu0  ;;  %v699_v31 = vpop.f32.mrf.mxu3 }
  0xe2   :  { %544 = vmatmul.f32.gmra.mxu1 %v3795_v29  ;;  %v498_v12 = vadd.f32 %v497_v36, %v396_v41  ;;  %v3829_v29 = vld [vmem:[%s5692_s0 + $0x330] sm:$0xff]  ;;  %v3836_v41 = vld [vmem:[%s5692_s0 + $0x320] sm:$0xff] }
  0xe3   :  { %5876 = vst [vmem:[#allocation60_spill] sm:$0xff] %v3802_v19  ;;  %645 = vmatmul.f32.gmra.mxu2 %v3800_v30 }
  0xe4   :  { %443 = vmatmul.f32.gmra.mxu0 %v3807_v24  ;;  %5879 = vst [vmem:[#allocation63_spill] sm:$0xff] %v3829_v29 }
  0xe5   :  { %5881 = vst [vmem:[#allocation65_spill] sm:$0xff] %v3836_v41 }
  0xe6   :  { %v598_v57 = vpop.f32.mrf.mxu2  ;;  %2448 = vmatmul.msk.f32.gmra.mxu3 %vm270_vm0, %v3816_v1 }
  0xe7   :  { %v599_v48 = vadd.f32 %v598_v57, %v498_v12  ;;  %v500_v0 = vpop.f32.mrf.mxu1  ;;  %v3845_v57 = vld [vmem:[%s5692_s0 + $0x358] sm:$0xff]  ;;  %v3853_v12 = vld [vmem:[%s5692_s0 + $0x348] sm:$0xff] }
  0xe8   :  { %5882 = vst [vmem:[#allocation66_spill] sm:$0xff] %v3845_v57 }
  0xe9   :  { %v3831_v19 = vadd.f32 %v699_v31, %v599_v48  ;;  %v399_v18 = vpop.f32.mrf.mxu0  ;;  %v702_v36 = vpop.f32.mrf.mxu3  ;;  %5883 = vst [vmem:[#allocation67_spill] sm:$0xff] %v3853_v12 }
  0xea   :  { %547 = vmatmul.f32.gmra.mxu1 %v3824_v8  ;;  %v501_v31 = vadd.f32 %v500_v0, %v399_v18  ;;  %v3858_v8 = vld [vmem:[%s5692_s0 + $0x350] sm:$0xff]  ;;  %v3865_v0 = vld [vmem:[%s5692_s0 + $0x340] sm:$0xff] }
  0xeb   :  { %5880 = vst [vmem:[#allocation64_spill] sm:$0xff] %v3831_v19  ;;  %648 = vmatmul.f32.gmra.mxu2 %v3829_v29 }
  0xec   :  { %446 = vmatmul.f32.gmra.mxu0 %v3836_v41  ;;  %5884 = vst [vmem:[#allocation68_spill] sm:$0xff] %v3858_v8 }
  0xed   :  { %5886 = vst [vmem:[#allocation70_spill] sm:$0xff] %v3865_v0 }
  0xee   :  { %v601_v48 = vpop.f32.mrf.mxu2  ;;  %2449 = vmatmul.msk.f32.gmra.mxu3 %vm270_vm0, %v3845_v57 }
  0xef   :  { %v602_v1 = vadd.f32 %v601_v48, %v501_v31  ;;  %v503_v30 = vpop.f32.mrf.mxu1  ;;  %v3874_v48 = vld [vmem:[%s5692_s0 + $0x378] sm:$0xff]  ;;  %v3882_v31 = vld [vmem:[%s5692_s0 + $0x368] sm:$0xff] }
  0xf0   :  { %5887 = vst [vmem:[#allocation71_spill] sm:$0xff] %v3874_v48 }
  0xf1   :  { %v3860_v19 = vadd.f32 %v702_v36, %v602_v1  ;;  %v402_v14 = vpop.f32.mrf.mxu0  ;;  %v705_v18 = vpop.f32.mrf.mxu3  ;;  %5888 = vst [vmem:[#allocation72_spill] sm:$0xff] %v3882_v31 }
  0xf2   :  { %550 = vmatmul.f32.gmra.mxu1 %v3853_v12  ;;  %v504_v1 = vadd.f32 %v503_v30, %v402_v14  ;;  %v3887_v12 = vld [vmem:[%s5692_s0 + $0x370] sm:$0xff]  ;;  %v3894_v14 = vld [vmem:[%s5692_s0 + $0x360] sm:$0xff] }
  0xf3   :  { %5885 = vst [vmem:[#allocation69_spill] sm:$0xff] %v3860_v19  ;;  %651 = vmatmul.f32.gmra.mxu2 %v3858_v8 }
  0xf4   :  { %449 = vmatmul.f32.gmra.mxu0 %v3865_v0 }
  0xf6   :  { %v604_v36 = vpop.f32.mrf.mxu2  ;;  %2450 = vmatmul.msk.f32.gmra.mxu3 %vm270_vm0, %v3874_v48 }
  0xf7   :  { %v605_v57 = vadd.f32 %v604_v36, %v504_v1  ;;  %v506_v29 = vpop.f32.mrf.mxu1  ;;  %v5956_v1 = vld [vmem:[#allocation59_spill] sm:$0xff] }
  0xf9   :  { %v3889_v19 = vadd.f32 %v705_v18, %v605_v57  ;;  %v405_v49 = vpop.f32.mrf.mxu0  ;;  %v708_v30 = vpop.f32.mrf.mxu3 }
  0xfa   :  { %553 = vmatmul.f32.gmra.mxu1 %v3882_v31  ;;  %v507_v36 = vadd.f32 %v506_v29, %v405_v49 }
  0xfb   :  { %654 = vmatmul.f32.gmra.mxu2 %v3887_v12 }
  0xfc   :  { %452 = vmatmul.f32.gmra.mxu0 %v3894_v14 }
  0xfe   :  { %v607_v48 = vpop.f32.mrf.mxu2  ;;  %775 = vmatmul.f32.vlgmr.msrb.gmra.mxu3 %v3020_v2 }
  0xff   :  { %v608_v57 = vadd.f32 %v607_v48, %v507_v36  ;;  %v509_v18 = vpop.f32.mrf.mxu1 }
 0x101   :  { %v3902_v8 = vadd.f32 %v708_v30, %v608_v57  ;;  %v408_v0 = vpop.f32.mrf.mxu0  ;;  %v711_v41 = vpop.f32.mrf.mxu3 }
 0x102   :  { %977 = vmatmul.f32.vlgmr.msrb.gmra.mxu1 %v3009_v63  ;;  %v510_v29 = vadd.f32 %v509_v18, %v408_v0  ;;  %v4277_v63 = vld [vmem:[%s5693_s3 + $0x8] sm:$0xff] }
 0x103   :  { %2451 = vmatmul.msk.f32.vlgmr.msrb.gmra.mxu2 %vm270_vm0, %v2973_v53 }
 0x104   :  { %876 = vmatmul.f32.vlgmr.msrb.gmra.mxu0 %v3004_v62 }
 0x106   :  { %v610_v49 = vpop.f32.mrf.mxu2  ;;  %778 = vmatmul.f32.gmra.mxu3 %v3075_v16 }
 0x107   :  { %v611_v2 = vadd.f32 %v610_v49, %v510_v29  ;;  %v512_v48 = vpop.f32.mrf.mxu1 }
 0x109   :  { %v3911_v30 = vadd.f32 %v711_v41, %v611_v2  ;;  %v411_v36 = vpop.f32.mrf.mxu0  ;;  %v714_v57 = vpop.f32.mrf.mxu3 }
 0x10a   :  { %980 = vmatmul.f32.gmra.mxu1 %v3070_v15  ;;  %v513_v53 = vadd.f32 %v512_v48, %v411_v36  ;;  %v4272_v15 = vld [vmem:[%s5693_s3] sm:$0xff] }
 0x10b   :  { %2452 = vmatmul.msk.f32.gmra.mxu2 %vm270_vm0, %v3033_v5 }
 0x10c   :  { %879 = vmatmul.f32.gmra.mxu0 %v3062_v13 }
 0x10e   :  { %v613_v62 = vpop.f32.mrf.mxu2  ;;  %781 = vmatmul.f32.gmra.mxu3 %v3106_v22 }
 0x10f   :  { %v614_v16 = vadd.f32 %v613_v62, %v513_v53  ;;  %v515_v0 = vpop.f32.mrf.mxu1 }
 0x111   :  { %v3920_v41 = vadd.f32 %v714_v57, %v614_v16  ;;  %v414_v18 = vpop.f32.mrf.mxu0  ;;  %v717_v29 = vpop.f32.mrf.mxu3 }
 0x112   :  { %983 = vmatmul.f32.gmra.mxu1 %v3101_v21  ;;  %v516_v5 = vadd.f32 %v515_v0, %v414_v18 }
 0x113   :  { %2453 = vmatmul.msk.f32.gmra.mxu2 %vm270_vm0, %v3082_v17 }
 0x114   :  { %882 = vmatmul.f32.gmra.mxu0 %v3096_v20 }
 0x116   :  { %v616_v13 = vpop.f32.mrf.mxu2  ;;  %784 = vmatmul.f32.gmra.mxu3 %v3134_v27 }
 0x117   :  { %v617_v22 = vadd.f32 %v616_v13, %v516_v5  ;;  %v518_v49 = vpop.f32.mrf.mxu1 }
 0x119   :  { %v3929_v2 = vadd.f32 %v717_v29, %v617_v22  ;;  %v417_v48 = vpop.f32.mrf.mxu0  ;;  %v720_v36 = vpop.f32.mrf.mxu3 }
 0x11a   :  { %986 = vmatmul.f32.gmra.mxu1 %v3129_v26  ;;  %v519_v17 = vadd.f32 %v518_v49, %v417_v48 }
 0x11b   :  { %2454 = vmatmul.msk.f32.gmra.mxu2 %vm270_vm0, %v3113_v23 }
 0x11c   :  { %885 = vmatmul.f32.gmra.mxu0 %v3124_v25 }
 0x11e   :  { %v619_v21 = vpop.f32.mrf.mxu2  ;;  %787 = vmatmul.f32.gmra.mxu3 %v3168_v34 }
 0x11f   :  { %v620_v20 = vadd.f32 %v619_v21, %v519_v17  ;;  %v521_v57 = vpop.f32.mrf.mxu1 }
 0x121   :  { %v3936_v27 = vadd.f32 %v720_v36, %v620_v20  ;;  %v420_v53 = vpop.f32.mrf.mxu0  ;;  %v723_v62 = vpop.f32.mrf.mxu3 }
 0x122   :  { %989 = vmatmul.f32.gmra.mxu1 %v3163_v33  ;;  %v522_v23 = vadd.f32 %v521_v57, %v420_v53 }
 0x123   :  { %2455 = vmatmul.msk.f32.gmra.mxu2 %vm270_vm0, %v3141_v28 }
 0x124   :  { %888 = vmatmul.f32.gmra.mxu0 %v3158_v32 }
 0x126   :  { %v622_v26 = vpop.f32.mrf.mxu2  ;;  %790 = vmatmul.f32.gmra.mxu3 %v3196_v39 }
 0x127   :  { %v623_v25 = vadd.f32 %v622_v26, %v522_v23  ;;  %v524_v16 = vpop.f32.mrf.mxu1 }
 0x129   :  { %v3943_v34 = vadd.f32 %v723_v62, %v623_v25  ;;  %v423_v0 = vpop.f32.mrf.mxu0  ;;  %v726_v18 = vpop.f32.mrf.mxu3 }
 0x12a   :  { %992 = vmatmul.f32.gmra.mxu1 %v3191_v38  ;;  %v525_v28 = vadd.f32 %v524_v16, %v423_v0 }
 0x12b   :  { %2456 = vmatmul.msk.f32.gmra.mxu2 %vm270_vm0, %v3175_v35 }
 0x12c   :  { %891 = vmatmul.f32.gmra.mxu0 %v3186_v37 }
 0x12e   :  { %v625_v33 = vpop.f32.mrf.mxu2  ;;  %793 = vmatmul.f32.gmra.mxu3 %v3230_v46 }
 0x12f   :  { %v626_v32 = vadd.f32 %v625_v33, %v525_v28  ;;  %v527_v29 = vpop.f32.mrf.mxu1  ;;  %v5890_v28 = vld [vmem:[#allocation5_spill] sm:$0xff] }
 0x131   :  { %v3950_v39 = vadd.f32 %v726_v18, %v626_v32  ;;  %v426_v5 = vpop.f32.mrf.mxu0  ;;  %v729_v13 = vpop.f32.mrf.mxu3 }
 0x132   :  { %995 = vmatmul.f32.gmra.mxu1 %v3225_v45  ;;  %v528_v35 = vadd.f32 %v527_v29, %v426_v5 }
 0x133   :  { %2457 = vmatmul.msk.f32.gmra.mxu2 %vm270_vm0, %v3203_v40  ;;  %v3965_v40 = vld [vmem:[%s5693_s3 + $0x150] sm:$0xf] }
 0x134   :  { %894 = vmatmul.f32.gmra.mxu0 %v3220_v44  ;;  %v1259_v44 = vld [vmem:[%s5693_s3 + $0xa8] sm:$0xf]  ;;  %2501 = vmatpush.msk.msra.mxu3 %vm1299_vm1, %v3965_v40 }
 0x135   :  { %2519 = vmatpush.msk.msra.mxu2 %vm1299_vm1, %v1259_v44  ;;  %v5894_v44 = vld [vmem:[#allocation9_spill] sm:$0xff] }
 0x136   :  { %v628_v38 = vpop.f32.mrf.mxu2  ;;  %796 = vmatmul.f32.gmra.mxu3 %v3261_v52 }
 0x137   :  { %v629_v37 = vadd.f32 %v628_v38, %v528_v35  ;;  %v530_v22 = vpop.f32.mrf.mxu1  ;;  %v5891_v35 = vld [vmem:[#allocation4_spill] sm:$0xff]  ;;  %v5892_v38 = vld [vmem:[#allocation2_spill] sm:$0xff] }
 0x139   :  { %v3957_v46 = vadd.f32 %v729_v13, %v629_v37  ;;  %v429_v49 = vpop.f32.mrf.mxu0  ;;  %v732_v48 = vpop.f32.mrf.mxu3  ;;  %v1256_v37 = vld [vmem:[%s5693_s3 + $0x90] sm:$0xff] }
 0x13a   :  { %998 = vmatmul.f32.gmra.mxu1 %v3256_v51  ;;  %v531_v45 = vadd.f32 %v530_v22, %v429_v49  ;;  %v5893_v22 = vld [vmem:[#allocation3_spill] sm:$0xff] }
 0x13b   :  { %2458 = vmatmul.msk.f32.gmra.mxu2 %vm270_vm0, %v3237_v47 }
 0x13c   :  { %897 = vmatmul.f32.gmra.mxu0 %v3251_v50  ;;  %v3983_v50 = vld [vmem:[%s5693_s3 + $0x158] sm:$0xf] }
 0x13d   :  { %2507 = vmatpush.msk.msra.mxu0 %vm1299_vm1, %v3983_v50 }
 0x13e   :  { %v631_v51 = vpop.f32.mrf.mxu2  ;;  %799 = vmatmul.f32.gmra.mxu3 %v3295_v60  ;;  %v1258_v60 = vld [vmem:[%s5693_s3 + $0xa0] sm:$0xf] }
 0x13f   :  { %v632_v47 = vadd.f32 %v631_v51, %v531_v45  ;;  %v533_v52 = vpop.f32.mrf.mxu1  ;;  %2513 = vmatpush.msk.msra.mxu1 %vm1299_vm1, %v1258_v60  ;;  %v4206_v60 = vld [vmem:[%s5693_s3 + $0xf0] sm:$0xff] }
 0x141   :  { %v3975_v36 = vadd.f32 %v732_v48, %v632_v47  ;;  %v432_v17 = vpop.f32.mrf.mxu0  ;;  %v735_v21 = vpop.f32.mrf.mxu3  ;;  %1397 = vmatpush.msra.mxu1 %v1256_v37 }
 0x142   :  { %1001 = vmatmul.f32.gmra.mxu1 %v3290_v59  ;;  %v534_v20 = vadd.f32 %v533_v52, %v432_v17 }
 0x143   :  { %2459 = vmatmul.msk.f32.gmra.mxu2 %vm270_vm0, %v3268_v54 }
 0x144   :  { %900 = vmatmul.f32.gmra.mxu0 %v3285_v58 }
 0x146   :  { %v634_v59 = vpop.f32.mrf.mxu2  ;;  %802 = vmatmul.f32.gmra.mxu3 %v3326_v6 }
 0x147   :  { %v635_v54 = vadd.f32 %v634_v59, %v534_v20  ;;  %v536_v57 = vpop.f32.mrf.mxu1  ;;  %v5896_v20 = vld [vmem:[#allocation6_spill] sm:$0xff]  ;;  %v4046_v59 = vld [vmem:[%s5693_s3 + $0x130] sm:$0xff] }
 0x149   :  { %v3993_v53 = vadd.f32 %v735_v21, %v635_v54  ;;  %v435_v62 = vpop.f32.mrf.mxu0  ;;  %v738_v23 = vpop.f32.mrf.mxu3  ;;  %v5895_v21 = vld [vmem:[#allocation8_spill] sm:$0xff]  ;;  %v1255_v54 = vld [vmem:[%s5693_s3 + $0x88] sm:$0xff] }
 0x14a   :  { %1004 = vmatmul.f32.gmra.mxu1 %v3321_v4  ;;  %v537_v58 = vadd.f32 %v536_v57, %v435_v62  ;;  %v5897_v57 = vld [vmem:[#allocation7_spill] sm:$0xff] }
 0x14b   :  { %5889 = vst [vmem:[#allocation73_spill] sm:$0xff] %v3993_v53  ;;  %2460 = vmatmul.msk.f32.gmra.mxu2 %vm270_vm0, %v3302_v61  ;;  %v4010_v61 = vld [vmem:[%s5693_s3 + $0x140] sm:$0xff] }
 0x14c   :  { %903 = vmatmul.f32.gmra.mxu0 %v3316_v3  ;;  %v1257_v3 = vld [vmem:[%s5693_s3 + $0x98] sm:$0xff]  ;;  %1312 = vmatpush.msra.mxu3 %v4010_v61 }
 0x14d   :  { %1429 = vmatpush.msra.mxu2 %v1257_v3 }
 0x14e   :  { %v637_v26 = vpop.f32.mrf.mxu2  ;;  %805 = vmatmul.f32.gmra.mxu3 %v3354_v11  ;;  %v4018_v11 = vld [vmem:[%s5693_s3 + $0x148] sm:$0xff] }
 0x14f   :  { %v638_v25 = vadd.f32 %v637_v26, %v537_v58  ;;  %v539_v16 = vpop.f32.mrf.mxu1  ;;  %1344 = vmatpush.msra.mxu0 %v4018_v11  ;;  %1313 = vmatpush.msra.mxu3 %v4046_v59  ;;  %v5898_v58 = vld [vmem:[#allocation13_spill] sm:$0xff] }
 0x150   :  { %1430 = vmatpush.msra.mxu2 %v1255_v54 }
 0x151   :  { %v4000_v6 = vadd.f32 %v738_v23, %v638_v25  ;;  %v438_v0 = vpop.f32.mrf.mxu0  ;;  %v741_v18 = vpop.f32.mrf.mxu3 }
 0x152   :  { %1007 = vmatmul.f32.gmra.mxu1 %v3349_v10  ;;  %v540_v10 = vadd.f32 %v539_v16, %v438_v0  ;;  %v4057_v16 = vld [vmem:[%s5693_s3 + $0x138] sm:$0xff] }
 0x153   :  { %2461 = vmatmul.msk.f32.gmra.mxu2 %vm270_vm0, %v3333_v7  ;;  %1345 = vmatpush.msra.mxu0 %v4057_v16 }
 0x154   :  { %906 = vmatmul.f32.gmra.mxu0 %v3344_v9  ;;  %v4258_v9 = vld [vmem:[%s5693_s3 + $0x10] sm:$0xff] }
 0x156   :  { %v640_v7 = vpop.f32.mrf.mxu2  ;;  %808 = vmatmul.f32.gmra.mxu3 %v5890_v28 }
 0x157   :  { %v641_v33 = vadd.f32 %v640_v7, %v540_v10  ;;  %v542_v32 = vpop.f32.mrf.mxu1  ;;  %v5899_v10 = vld [vmem:[#allocation12_spill] sm:$0xff]  ;;  %v1254_v7 = vld [vmem:[%s5693_s3 + $0x80] sm:$0xff] }
 0x158   :  { %1398 = vmatpush.msra.mxu1 %v1254_v7  ;;  %v5910_v7 = vld [vmem:[#allocation19_spill] sm:$0xff] }
 0x159   :  { %v4024_v29 = vadd.f32 %v741_v18, %v641_v33  ;;  %v441_v5 = vpop.f32.mrf.mxu0  ;;  %v744_v13 = vpop.f32.mrf.mxu3  ;;  %v5900_v33 = vld [vmem:[#allocation10_spill] sm:$0xff] }
 0x15a   :  { %1010 = vmatmul.f32.gmra.mxu1 %v5891_v35  ;;  %v543_v49 = vadd.f32 %v542_v32, %v441_v5  ;;  %v5901_v32 = vld [vmem:[#allocation11_spill] sm:$0xff]  ;;  %v5902_v35 = vld [vmem:[#allocation17_spill] sm:$0xff]  ;;  %5952 = vst [vmem:[#allocation10_spill] sm:$0xff] %v4258_v9 }
 0x15b   :  { %2462 = vmatmul.msk.f32.gmra.mxu2 %vm270_vm0, %v5892_v38  ;;  %5954 = vst [vmem:[#allocation17_spill] sm:$0xff] %v4272_v15 }
 0x15c   :  { %909 = vmatmul.f32.gmra.mxu0 %v5893_v22 }
 0x15e   :  { %v643_v48 = vpop.f32.mrf.mxu2  ;;  %811 = vmatmul.f32.gmra.mxu3 %v5894_v44  ;;  %v5903_v44 = vld [vmem:[#allocation16_spill] sm:$0xff] }
 0x15f   :  { %v644_v45 = vadd.f32 %v643_v48, %v543_v49  ;;  %v545_v51 = vpop.f32.mrf.mxu1  ;;  %5955 = vst [vmem:[#allocation16_spill] sm:$0xff] %v4277_v63 }
 0x161   :  { %v4036_v47 = vadd.f32 %v744_v13, %v644_v45  ;;  %v444_v52 = vpop.f32.mrf.mxu0  ;;  %v747_v17 = vpop.f32.mrf.mxu3  ;;  %v4193_v45 = vld [vmem:[%s5693_s3 + $0x50] sm:$0xff] }
 0x162   :  { %1013 = vmatmul.f32.gmra.mxu1 %v5895_v21  ;;  %v546_v62 = vadd.f32 %v545_v51, %v444_v52  ;;  %v5904_v51 = vld [vmem:[#allocation14_spill] sm:$0xff]  ;;  %v5905_v52 = vld [vmem:[#allocation15_spill] sm:$0xff]  ;;  %5938 = vst [vmem:[#allocation3_spill] sm:$0xff] %v4193_v45 }
 0x163   :  { %2463 = vmatmul.msk.f32.gmra.mxu2 %vm270_vm0, %v5896_v20  ;;  %v5906_v20 = vld [vmem:[#allocation21_spill] sm:$0xff] }
 0x164   :  { %912 = vmatmul.f32.gmra.mxu0 %v5897_v57 }
 0x166   :  { %v646_v23 = vpop.f32.mrf.mxu2  ;;  %814 = vmatmul.f32.gmra.mxu3 %v5898_v58 }
 0x167   :  { %v647_v26 = vadd.f32 %v646_v23, %v546_v62  ;;  %v548_v25 = vpop.f32.mrf.mxu1  ;;  %v4084_v62 = vld [vmem:[%s5693_s3 + $0x120] sm:$0xff]  ;;  %v1253_v23 = vld [vmem:[%s5693_s3 + $0x78] sm:$0xff] }
 0x168   :  { %1314 = vmatpush.msra.mxu3 %v4084_v62  ;;  %1431 = vmatpush.msra.mxu2 %v1253_v23  ;;  %v5916_v23 = vld [vmem:[#allocation30_spill] sm:$0xff] }
 0x169   :  { %v4060_v0 = vadd.f32 %v747_v17, %v647_v26  ;;  %v447_v18 = vpop.f32.mrf.mxu0  ;;  %v750_v3 = vpop.f32.mrf.mxu3 }
 0x16a   :  { %1016 = vmatmul.f32.gmra.mxu1 %v5899_v10  ;;  %v549_v5 = vadd.f32 %v548_v25, %v447_v18  ;;  %v5908_v18 = vld [vmem:[#allocation20_spill] sm:$0xff]  ;;  %v5909_v10 = vld [vmem:[#allocation18_spill] sm:$0xff] }
 0x16b   :  { %2464 = vmatmul.msk.f32.gmra.mxu2 %vm270_vm0, %v5900_v33  ;;  %v4101_v33 = vld [vmem:[%s5693_s3 + $0x128] sm:$0xff] }
 0x16c   :  { %915 = vmatmul.f32.gmra.mxu0 %v5901_v32 }
 0x16d   :  { %1346 = vmatpush.msra.mxu0 %v4101_v33 }
 0x16e   :  { %v649_v13 = vpop.f32.mrf.mxu2  ;;  %817 = vmatmul.f32.gmra.mxu3 %v5902_v35 }
 0x16f   :  { %v650_v38 = vadd.f32 %v649_v13, %v549_v5  ;;  %v551_v37 = vpop.f32.mrf.mxu1  ;;  %v5911_v13 = vld [vmem:[#allocation25_spill] sm:$0xff] }
 0x171   :  { %v4072_v22 = vadd.f32 %v750_v3, %v650_v38  ;;  %v450_v49 = vpop.f32.mrf.mxu0  ;;  %v753_v48 = vpop.f32.mrf.mxu3 }
 0x172   :  { %1019 = vmatmul.f32.gmra.mxu1 %v5903_v44  ;;  %v552_v17 = vadd.f32 %v551_v37, %v450_v49  ;;  %v1252_v37 = vld [vmem:[%s5693_s3 + $0x70] sm:$0xff] }
 0x173   :  { %2465 = vmatmul.msk.f32.gmra.mxu2 %vm270_vm0, %v5904_v51  ;;  %1399 = vmatpush.msra.mxu1 %v1252_v37  ;;  %v1251_v37 = vld [vmem:[%s5693_s3 + $0x68] sm:$0xff] }
 0x174   :  { %918 = vmatmul.f32.gmra.mxu0 %v5905_v52  ;;  %v5913_v52 = vld [vmem:[#allocation24_spill] sm:$0xff]  ;;  %1432 = vmatpush.msra.mxu2 %v1251_v37 }
 0x176   :  { %v652_v21 = vpop.f32.mrf.mxu2  ;;  %820 = vmatmul.f32.gmra.mxu3 %v5906_v20  ;;  %v5915_v20 = vld [vmem:[#allocation23_spill] sm:$0xff] }
 0x177   :  { %v653_v54 = vadd.f32 %v652_v21, %v552_v17  ;;  %v554_v57 = vpop.f32.mrf.mxu1  ;;  %v5914_v21 = vld [vmem:[#allocation22_spill] sm:$0xff]  ;;  %v5929_v17 = vld [vmem:[#allocation43_spill] sm:$0xff] }
 0x179   :  { %v4090_v58 = vadd.f32 %v753_v48, %v653_v54  ;;  %v453_v26 = vpop.f32.mrf.mxu0  ;;  %v756_v25 = vpop.f32.mrf.mxu3 }
 0x17a   :  { %1022 = vmatmul.f32.gmra.mxu1 %v5908_v18  ;;  %v555_v32 = vadd.f32 %v554_v57, %v453_v26 }
 0x17b   :  { %5907 = vst [vmem:[#allocation5_spill] sm:$0xff] %v4090_v58  ;;  %2466 = vmatmul.msk.f32.gmra.mxu2 %vm270_vm0, %v5909_v10  ;;  %v4600_v58 = vld [vmem:[%s5693_s3 + $0x210] sm:$0xff] }
 0x17c   :  { %921 = vmatmul.f32.gmra.mxu0 %v5910_v7 }
 0x17e   :  { %v655_v5 = vpop.f32.mrf.mxu2  ;;  %823 = vmatmul.f32.gmra.mxu3 %v5911_v13  ;;  %v4125_v13 = vld [vmem:[%s5693_s3 + $0x110] sm:$0xff] }
 0x17f   :  { %v656_v35 = vadd.f32 %v655_v5, %v555_v32  ;;  %v978_v38 = vpop.f32.mrf.mxu1  ;;  %v5917_v32 = vld [vmem:[#allocation28_spill] sm:$0xff]  ;;  %v5918_v5 = vld [vmem:[#allocation26_spill] sm:$0xff]  ;;  %1315 = vmatpush.msra.mxu3 %v4125_v13 }
 0x181   :  { %v4108_v49 = vadd.f32 %v756_v25, %v656_v35  ;;  %v776_v48 = vpop.f32.mrf.mxu3  ;;  %v877_v44 = vpop.f32.mrf.mxu0  ;;  %v5919_v35 = vld [vmem:[#allocation27_spill] sm:$0xff] }
 0x182   :  { %v878_v51 = vadd.f32 %v877_v44, %v776_v48  ;;  %1025 = vmatmul.f32.gmra.mxu1 %v5913_v52  ;;  %v5920_v44 = vld [vmem:[#allocation35_spill] sm:$0xff] }
 0x183   :  { %5912 = vst [vmem:[#allocation4_spill] sm:$0xff] %v4108_v49  ;;  %2467 = vmatmul.msk.f32.gmra.mxu2 %vm270_vm0, %v5914_v21  ;;  %v4138_v21 = vld [vmem:[%s5693_s3 + $0x118] sm:$0xff] }
 0x184   :  { %924 = vmatmul.f32.gmra.mxu0 %v5915_v20  ;;  %v979_v54 = vadd.f32 %v978_v38, %v878_v51 }
 0x185   :  { %1347 = vmatpush.msra.mxu0 %v4138_v21 }
 0x186   :  { %v1079_v57 = vpop.f32.mrf.mxu2  ;;  %826 = vmatmul.f32.gmra.mxu3 %v5916_v23  ;;  %v5921_v23 = vld [vmem:[#allocation33_spill] sm:$0xff] }
 0x187   :  { %v4117_v26 = vadd.f32 %v1079_v57, %v979_v54  ;;  %v981_v25 = vpop.f32.mrf.mxu1 }
 0x189   :  { %v779_v18 = vpop.f32.mrf.mxu3  ;;  %v880_v10 = vpop.f32.mrf.mxu0 }
 0x18a   :  { %v881_v7 = vadd.f32 %v880_v10, %v779_v18  ;;  %1028 = vmatmul.f32.gmra.mxu1 %v5917_v32  ;;  %v1250_v18 = vld [vmem:[%s5693_s3 + $0x60] sm:$0xff]  ;;  %v5923_v10 = vld [vmem:[#allocation32_spill] sm:$0xff] }
 0x18b   :  { %2468 = vmatmul.msk.f32.gmra.mxu2 %vm270_vm0, %v5918_v5  ;;  %1400 = vmatpush.msra.mxu1 %v1250_v18  ;;  %v5924_v5 = vld [vmem:[#allocation40_spill] sm:$0xff] }
 0x18c   :  { %927 = vmatmul.f32.gmra.mxu0 %v5919_v35  ;;  %v982_v38 = vadd.f32 %v981_v25, %v881_v7  ;;  %v5922_v25 = vld [vmem:[#allocation31_spill] sm:$0xff] }
 0x18d   :  { %1401 = vmatpush.msra.mxu1 %v4193_v45 }
 0x18e   :  { %v1082_v48 = vpop.f32.mrf.mxu2  ;;  %829 = vmatmul.f32.gmra.mxu3 %v5920_v44 }
 0x18f   :  { %v4133_v51 = vadd.f32 %v1082_v48, %v982_v38  ;;  %v984_v52 = vpop.f32.mrf.mxu1 }
 0x191   :  { %v782_v20 = vpop.f32.mrf.mxu3  ;;  %v883_v54 = vpop.f32.mrf.mxu0 }
 0x192   :  { %v884_v57 = vadd.f32 %v883_v54, %v782_v20  ;;  %1031 = vmatmul.f32.gmra.mxu1 %v5921_v23  ;;  %v5925_v20 = vld [vmem:[#allocation38_spill] sm:$0xff]  ;;  %v5926_v54 = vld [vmem:[#allocation36_spill] sm:$0xff]  ;;  %v5927_v23 = vld [vmem:[#allocation37_spill] sm:$0xff] }
 0x193   :  { %2469 = vmatmul.msk.f32.gmra.mxu2 %vm270_vm0, %v5922_v25 }
 0x194   :  { %930 = vmatmul.f32.gmra.mxu0 %v5923_v10  ;;  %v985_v7 = vadd.f32 %v984_v52, %v884_v57  ;;  %v5928_v52 = vld [vmem:[#allocation44_spill] sm:$0xff] }
 0x196   :  { %v1085_v32 = vpop.f32.mrf.mxu2  ;;  %832 = vmatmul.f32.gmra.mxu3 %v5924_v5 }
 0x197   :  { %v4149_v35 = vadd.f32 %v1085_v32, %v985_v7  ;;  %v987_v38 = vpop.f32.mrf.mxu1 }
 0x199   :  { %v785_v37 = vpop.f32.mrf.mxu3  ;;  %v886_v48 = vpop.f32.mrf.mxu0 }
 0x19a   :  { %v887_v44 = vadd.f32 %v886_v48, %v785_v37  ;;  %1034 = vmatmul.f32.gmra.mxu1 %v5925_v20  ;;  %v5930_v37 = vld [vmem:[#allocation41_spill] sm:$0xff]  ;;  %v5931_v48 = vld [vmem:[#allocation42_spill] sm:$0xff] }
 0x19b   :  { %2470 = vmatmul.msk.f32.gmra.mxu2 %vm270_vm0, %v5926_v54 }
 0x19c   :  { %933 = vmatmul.f32.gmra.mxu0 %v5927_v23  ;;  %v988_v25 = vadd.f32 %v987_v38, %v887_v44  ;;  %v5932_v23 = vld [vmem:[#allocation48_spill] sm:$0xff] }
 0x19e   :  { %v1088_v10 = vpop.f32.mrf.mxu2  ;;  %835 = vmatmul.f32.gmra.mxu3 %v5928_v52 }
 0x19f   :  { %v4156_v57 = vadd.f32 %v1088_v10, %v988_v25  ;;  %v990_v18 = vpop.f32.mrf.mxu1  ;;  %v4168_v25 = vld [vmem:[%s5693_s3 + $0x100] sm:$0xff]  ;;  %v4178_v10 = vld [vmem:[%s5693_s3 + $0x108] sm:$0xff] }
 0x1a0   :  { %1316 = vmatpush.msra.mxu3 %v4168_v25  ;;  %1348 = vmatpush.msra.mxu0 %v4178_v10 }
 0x1a1   :  { %v788_v7 = vpop.f32.mrf.mxu3  ;;  %v889_v32 = vpop.f32.mrf.mxu0 }
 0x1a2   :  { %v890_v5 = vadd.f32 %v889_v32, %v788_v7  ;;  %1037 = vmatmul.f32.gmra.mxu1 %v5929_v17  ;;  %v4173_v17 = vld [vmem:[%s5693_s3 + $0x58] sm:$0xff]  ;;  %v5934_v32 = vld [vmem:[#allocation47_spill] sm:$0xff]  ;;  %1317 = vmatpush.msra.mxu3 %v4206_v60 }
 0x1a3   :  { %2471 = vmatmul.msk.f32.gmra.mxu2 %vm270_vm0, %v5930_v37  ;;  %5933 = vst [vmem:[#allocation2_spill] sm:$0xff] %v4173_v17  ;;  %v5936_v37 = vld [vmem:[#allocation46_spill] sm:$0xff] }
 0x1a4   :  { %936 = vmatmul.f32.gmra.mxu0 %v5931_v48  ;;  %v991_v20 = vadd.f32 %v990_v18, %v890_v5  ;;  %1433 = vmatpush.msra.mxu2 %v4173_v17  ;;  %v5935_v5 = vld [vmem:[#allocation45_spill] sm:$0xff]  ;;  %6009 = vst [vmem:[#allocation47_spill] sm:$0xff] %v4600_v58 }
 0x1a6   :  { %v1091_v54 = vpop.f32.mrf.mxu2  ;;  %838 = vmatmul.f32.gmra.mxu3 %v5932_v23 }
 0x1a7   :  { %v4163_v38 = vadd.f32 %v1091_v54, %v991_v20  ;;  %v993_v44 = vpop.f32.mrf.mxu1  ;;  %v5937_v54 = vld [vmem:[#allocation52_spill] sm:$0xff] }
 0x1a9   :  { %v791_v52 = vpop.f32.mrf.mxu3  ;;  %v892_v18 = vpop.f32.mrf.mxu0 }
 0x1aa   :  { %v893_v7 = vadd.f32 %v892_v18, %v791_v52  ;;  %1040 = vmatmul.f32.gmra.mxu1 %v5934_v32 }
 0x1ab   :  { %2472 = vmatmul.msk.f32.gmra.mxu2 %vm270_vm0, %v5935_v5  ;;  %v5939_v5 = vld [vmem:[#allocation51_spill] sm:$0xff] }
 0x1ac   :  { %939 = vmatmul.f32.gmra.mxu0 %v5936_v37  ;;  %v994_v48 = vadd.f32 %v993_v44, %v893_v7  ;;  %v5940_v37 = vld [vmem:[#allocation49_spill] sm:$0xff]  ;;  %v5941_v44 = vld [vmem:[#allocation50_spill] sm:$0xff] }
 0x1ae   :  { %v1094_v20 = vpop.f32.mrf.mxu2  ;;  %841 = vmatmul.f32.gmra.mxu3 %v5937_v54 }
 0x1af   :  { %v4188_v23 = vadd.f32 %v1094_v20, %v994_v48  ;;  %v996_v3 = vpop.f32.mrf.mxu1  ;;  %v5942_v20 = vld [vmem:[#allocation56_spill] sm:$0xff] }
 0x1b1   :  { %v794_v52 = vpop.f32.mrf.mxu3  ;;  %v895_v18 = vpop.f32.mrf.mxu0 }
 0x1b2   :  { %v896_v32 = vadd.f32 %v895_v18, %v794_v52  ;;  %1043 = vmatmul.f32.gmra.mxu1 %v5939_v5  ;;  %v4212_v5 = vld [vmem:[%s5693_s3 + $0x48] sm:$0xff] }
 0x1b3   :  { %2473 = vmatmul.msk.f32.gmra.mxu2 %vm270_vm0, %v5940_v37  ;;  %5943 = vst [vmem:[#allocation9_spill] sm:$0xff] %v4212_v5  ;;  %v5945_v37 = vld [vmem:[#allocation55_spill] sm:$0xff] }
 0x1b4   :  { %942 = vmatmul.f32.gmra.mxu0 %v5941_v44  ;;  %v997_v7 = vadd.f32 %v996_v3, %v896_v32  ;;  %v4217_v3 = vld [vmem:[%s5693_s3 + $0x40] sm:$0xff]  ;;  %1434 = vmatpush.msra.mxu2 %v4212_v5  ;;  %v5946_v44 = vld [vmem:[#allocation53_spill] sm:$0xff] }
 0x1b5   :  { %5944 = vst [vmem:[#allocation8_spill] sm:$0xff] %v4217_v3  ;;  %1402 = vmatpush.msra.mxu1 %v4217_v3 }
 0x1b6   :  { %v1097_v48 = vpop.f32.mrf.mxu2  ;;  %844 = vmatmul.f32.gmra.mxu3 %v5942_v20  ;;  %v5949_v20 = vld [vmem:[#allocation54_spill] sm:$0xff] }
 0x1b7   :  { %v4201_v54 = vadd.f32 %v1097_v48, %v997_v7  ;;  %v999_v28 = vpop.f32.mrf.mxu1  ;;  %v4227_v7 = vld [vmem:[%s5693_s3 + $0x30] sm:$0xff]  ;;  %v4232_v48 = vld [vmem:[%s5693_s3 + $0x38] sm:$0xff] }
 0x1b8   :  { %5947 = vst [vmem:[#allocation6_spill] sm:$0xff] %v4227_v7  ;;  %1435 = vmatpush.msra.mxu2 %v4232_v48  ;;  %1403 = vmatpush.msra.mxu1 %v4227_v7 }
 0x1b9   :  { %v797_v52 = vpop.f32.mrf.mxu3  ;;  %v898_v18 = vpop.f32.mrf.mxu0  ;;  %5948 = vst [vmem:[#allocation7_spill] sm:$0xff] %v4232_v48 }
 0x1ba   :  { %v899_v32 = vadd.f32 %v898_v18, %v797_v52  ;;  %1046 = vmatmul.f32.gmra.mxu1 %v5945_v37  ;;  %v4240_v18 = vld [vmem:[%s5693_s3 + $0x20] sm:$0xff]  ;;  %v4245_v37 = vld [vmem:[%s5693_s3 + $0x28] sm:$0xff] }
 0x1bb   :  { %2474 = vmatmul.msk.f32.gmra.mxu2 %vm270_vm0, %v5946_v44  ;;  %5950 = vst [vmem:[#allocation13_spill] sm:$0xff] %v4240_v18  ;;  %1404 = vmatpush.msra.mxu1 %v4240_v18  ;;  %v5962_v18 = vld [vmem:[#allocation65_spill] sm:$0xff] }
 0x1bc   :  { %945 = vmatmul.f32.gmra.mxu0 %v5949_v20  ;;  %v1000_v52 = vadd.f32 %v999_v28, %v899_v32  ;;  %5951 = vst [vmem:[#allocation12_spill] sm:$0xff] %v4245_v37  ;;  %1436 = vmatpush.msra.mxu2 %v4245_v37  ;;  %v4252_v20 = vld [vmem:[%s5693_s3 + $0xf8] sm:$0xff]  ;;  %v5961_v37 = vld [vmem:[#allocation58_spill] sm:$0xff] }
 0x1bd   :  { %1349 = vmatpush.msra.mxu0 %v4252_v20  ;;  %1405 = vmatpush.msra.mxu1 %v4258_v9 }
 0x1be   :  { %v1100_v44 = vpop.f32.mrf.mxu2  ;;  %847 = vmatmul.f32.gmra.mxu3 %v3807_v24  ;;  %v4263_v24 = vld [vmem:[%s5693_s3 + $0x18] sm:$0xff] }
 0x1bf   :  { %v1101_v28 = vadd.f32 %v1100_v44, %v1000_v52  ;;  %v1002_v32 = vpop.f32.mrf.mxu1  ;;  %5953 = vst [vmem:[#allocation11_spill] sm:$0xff] %v4263_v24  ;;  %1437 = vmatpush.msra.mxu2 %v4263_v24  ;;  %v5960_v24 = vld [vmem:[#allocation57_spill] sm:$0xff]  ;;  %1406 = vmatpush.msra.mxu1 %v4272_v15 }
 0x1c0   :  { %v5967_v15 = vld [vmem:[#allocation61_spill] sm:$0xff] }
 0x1c1   :  { %v1165_v52 = vmax.f32 %v4117_v26, %v1101_v28  ;;  %v800_v44 = vpop.f32.mrf.mxu3  ;;  %v901_v4 = vpop.f32.mrf.mxu0  ;;  %1438 = vmatpush.msra.mxu2 %v4277_v63  ;;  %v5957_v26 = vld [vmem:[#allocation29_spill] sm:$0xff]  ;;  %v5958_v28 = vld [vmem:[#allocation60_spill] sm:$0xff] }
 0x1c2   :  { %v902_v31 = vadd.f32 %v901_v4, %v800_v44  ;;  %1049 = vmatmul.f32.gmra.mxu1 %v5956_v1  ;;  %v5959_v49 = vmax.f32 %v5957_v26, %v5958_v28  ;;  %v5963_v26 = vld [vmem:[#allocation63_spill] sm:$0xff] }
 0x1c3   :  { %2475 = vmatmul.msk.f32.gmra.mxu2 %vm270_vm0, %v5960_v24 }
 0x1c4   :  { %v1178_v53 = vmax.f32 %v5959_v49, %v1165_v52  ;;  %948 = vmatmul.f32.gmra.mxu0 %v5961_v37  ;;  %v1003_v9 = vadd.f32 %v1002_v32, %v902_v31  ;;  %v5964_v49 = vld [vmem:[#allocation34_spill] sm:$0xff]  ;;  %v5965_v52 = vld [vmem:[#allocation64_spill] sm:$0xff] }
 0x1c5   :  { %v5966_v24 = vmax.f32 %v5964_v49, %v5965_v52  ;;  %v5968_v31 = vld [vmem:[#allocation62_spill] sm:$0xff] }
 0x1c6   :  { %v1103_v48 = vpop.f32.mrf.mxu2  ;;  %850 = vmatmul.f32.gmra.mxu3 %v5962_v18  ;;  %v5974_v52 = vld [vmem:[#allocation66_spill] sm:$0xff] }
 0x1c7   :  { %v1104_v4 = vadd.f32 %v1103_v48, %v1003_v9  ;;  %v1005_v44 = vpop.f32.mrf.mxu1  ;;  %v5969_v9 = vld [vmem:[#allocation70_spill] sm:$0xff] }
 0x1c9   :  { %v1167_v1 = vmax.f32 %v4133_v51, %v1104_v4  ;;  %v803_v63 = vpop.f32.mrf.mxu3  ;;  %v904_v5 = vpop.f32.mrf.mxu0 }
 0x1ca   :  { %v905_v7 = vadd.f32 %v904_v5, %v803_v63  ;;  %1052 = vmatmul.f32.gmra.mxu1 %v5963_v26  ;;  %v4301_v63 = vld [vmem:[%s5693_s3 + $0xe0] sm:$0xff] }
 0x1cb   :  { %v1179_v28 = vmax.f32 %v5966_v24, %v1167_v1  ;;  %2476 = vmatmul.msk.f32.gmra.mxu2 %vm270_vm0, %v5967_v15  ;;  %1318 = vmatpush.msra.mxu3 %v4301_v63  ;;  %v5970_v1 = vld [vmem:[#allocation68_spill] sm:$0xff]  ;;  %v5975_v24 = vld [vmem:[#allocation67_spill] sm:$0xff] }
 0x1cc   :  { %951 = vmatmul.f32.gmra.mxu0 %v5968_v31  ;;  %v1006_v37 = vadd.f32 %v1005_v44, %v905_v7  ;;  %v5971_v7 = vld [vmem:[#allocation39_spill] sm:$0xff]  ;;  %v5972_v44 = vld [vmem:[#allocation69_spill] sm:$0xff] }
 0x1cd   :  { %v5973_v26 = vmax.f32 %v5971_v7, %v5972_v44  ;;  %v4334_v7 = vld [vmem:[%s5693_s3 + $0xd0] sm:$0xff] }
 0x1ce   :  { %v1106_v18 = vpop.f32.mrf.mxu2  ;;  %853 = vmatmul.f32.gmra.mxu3 %v5969_v9 }
 0x1cf   :  { %v1107_v48 = vadd.f32 %v1106_v18, %v1006_v37  ;;  %v1008_v51 = vpop.f32.mrf.mxu1  ;;  %v4315_v37 = vld [vmem:[%s5693_s3 + $0xe8] sm:$0xff]  ;;  %1319 = vmatpush.msra.mxu3 %v4334_v7 }
 0x1d0   :  { %1350 = vmatpush.msra.mxu0 %v4315_v37 }
 0x1d1   :  { %v1169_v5 = vmax.f32 %v4149_v35, %v1107_v48  ;;  %v806_v32 = vpop.f32.mrf.mxu3  ;;  %v907_v4 = vpop.f32.mrf.mxu0  ;;  %v4322_v48 = vld [vmem:[%s5694_s2] ss:$0 sm:$0xff] }
 0x1d2   :  { %v908_v15 = vadd.f32 %v907_v4, %v806_v32  ;;  %1055 = vmatmul.f32.gmra.mxu1 %v5970_v1  ;;  %v5977_v1 = vld [vmem:[#allocation71_spill] sm:$0xff]  ;;  %v1188_v44 = vadd.f32 %v4322_v48, %v1178_v53  ;;  %v4344_v53 = vld [vmem:[%s5693_s3 + $0xd8] sm:$0xff] }
 0x1d3   :  { %v1180_v49 = vmax.f32 %v5973_v26, %v1169_v5  ;;  %2477 = vmatmul.msk.f32.gmra.mxu2 %vm270_vm0, %v5974_v52  ;;  %1351 = vmatpush.msra.mxu0 %v4344_v53 }
 0x1d4   :  { %954 = vmatmul.f32.gmra.mxu0 %v5975_v24  ;;  %v1009_v31 = vadd.f32 %v1008_v51, %v908_v15  ;;  %v5976_v15 = vmax.f32 %v3670_v43, %v3889_v19  ;;  %v1195_v43 = vmax.f32 %v1188_v44, 0.0 }
 0x1d6   :  { %v1109_v35 = vpop.f32.mrf.mxu2  ;;  %856 = vmatmul.f32.gmra.mxu3 %v3894_v14 }
 0x1d7   :  { %v1110_v18 = vadd.f32 %v1109_v35, %v1009_v31  ;;  %v1011_v9 = vpop.f32.mrf.mxu1 }
 0x1d9   :  { %v1171_v5 = vmax.f32 %v4156_v57, %v1110_v18  ;;  %v809_v51 = vpop.f32.mrf.mxu3  ;;  %v910_v32 = vpop.f32.mrf.mxu0  ;;  %v5978_v57 = vld [vmem:[#allocation72_spill] sm:$0xff] }
 0x1da   :  { %v911_v4 = vadd.f32 %v910_v32, %v809_v51  ;;  %1058 = vmatmul.f32.gmra.mxu1 %v3887_v12 }
 0x1db   :  { %v1181_v14 = vmax.f32 %v5976_v15, %v1171_v5  ;;  %2478 = vmatmul.msk.f32.gmra.mxu2 %vm270_vm0, %v5977_v1 }
 0x1dc   :  { %957 = vmatmul.f32.gmra.mxu0 %v5978_v57  ;;  %v1012_v26 = vadd.f32 %v1011_v9, %v911_v4  ;;  %v5979_v9 = vmax.f32 %v3703_v55, %v3902_v8  ;;  %v5981_v55 = vmax.f32 %v3736_v56, %v3911_v30 }
 0x1de   :  { %v1112_v12 = vpop.f32.mrf.mxu2 }
 0x1df   :  { %v1113_v52 = vadd.f32 %v1112_v12, %v1012_v26  ;;  %v1014_v24 = vpop.f32.mrf.mxu1 }
 0x1e1   :  { %v1173_v19 = vmax.f32 %v4163_v38, %v1113_v52  ;;  %v812_v31 = vpop.f32.mrf.mxu3  ;;  %v913_v35 = vpop.f32.mrf.mxu0  ;;  %v1189_v38 = vadd.f32 %v4322_v48, %v1179_v28  ;;  %v1190_v28 = vadd.f32 %v4322_v48, %v1180_v49  ;;  %v5984_v49 = vmax.f32 %v3769_v42, %v3920_v41 }
 0x1e2   :  { %v914_v18 = vadd.f32 %v913_v35, %v812_v31  ;;  %2514 = vmatmul.msk.f32.vlgmr.msra.gmra.mxu1 %vm1283_vm2, %v1195_v43 }
 0x1e3   :  { %v1182_v5 = vmax.f32 %v5979_v9, %v1173_v19  ;;  %2520 = vmatmul.msk.f32.vlgmr.msra.gmra.mxu2 %vm1283_vm2, %v1195_v43  ;;  %v4352_v1 = vmax.f32 %v1189_v38, 0.0  ;;  %v4370_v19 = vld [vmem:[%s5693_s3 + $0xc0] sm:$0xff]  ;;  %v4372_v31 = vmax.f32 %v1190_v28, 0.0  ;;  %v1191_v9 = vadd.f32 %v4322_v48, %v1181_v14 }
 0x1e4   :  { %v1015_v51 = vadd.f32 %v1014_v24, %v914_v18  ;;  %1320 = vmatpush.msra.mxu3 %v4370_v19 }
 0x1e5   :  { %5980 = vst [vmem:[#allocation14_spill] sm:$0xff] %v4352_v1  ;;  %v1192_v14 = vadd.f32 %v4322_v48, %v1182_v5 }
 0x1e6   :  { %v1115_v32 = vpop.f32.mrf.mxu2  ;;  %5983 = vst [vmem:[#allocation21_spill] sm:$0xff] %v4372_v31 }
 0x1e7   :  { %v1116_v4 = vadd.f32 %v1115_v32, %v1015_v51  ;;  %v1017_v15 = vpop.f32.mrf.mxu1  ;;  %v4397_v51 = vld [vmem:[%s5693_s3 + $0xc8] sm:$0xff]  ;;  %v4399_v32 = vmax.f32 %v1191_v9, 0.0 }
 0x1e8   :  { %1352 = vmatpush.msra.mxu0 %v4397_v51  ;;  %v4467_v9 = vld [vmem:[%s5693_s3 + $0x2a8] sm:$0xff] }
 0x1e9   :  { %v1175_v44 = vmax.f32 %v4188_v23, %v1116_v4  ;;  %v815_v57 = vpop.f32.mrf.mxu3  ;;  %v916_v26 = vpop.f32.mrf.mxu0  ;;  %5986 = vst [vmem:[#allocation18_spill] sm:$0xff] %v4399_v32 }
 0x1ea   :  { %v917_v12 = vadd.f32 %v916_v26, %v815_v57  ;;  %2515 = vmatmul.msk.f32.gmra.mxu1 %vm1283_vm2, %v4352_v1  ;;  %5991 = vst [vmem:[#allocation23_spill] sm:$0xff] %v4467_v9 }
 0x1eb   :  { %v4360_v8 = vmax.f32 %v5981_v55, %v1175_v44  ;;  %2521 = vmatmul.msk.f32.gmra.mxu2 %vm1283_vm2, %v4352_v1  ;;  %v4415_v44 = vmax.f32 %v1192_v14, 0.0 }
 0x1ec   :  { %v1018_v52 = vadd.f32 %v1017_v15, %v917_v12  ;;  %v4426_v12 = vld [vmem:[%s5693_s3 + $0xb0] sm:$0xff] }
 0x1ed   :  { %5982 = vst [vmem:[#allocation15_spill] sm:$0xff] %v4360_v8  ;;  %1321 = vmatpush.msra.mxu3 %v4426_v12 }
 0x1ee   :  { %v1118_v24 = vpop.f32.mrf.mxu2  ;;  %5987 = vst [vmem:[#allocation19_spill] sm:$0xff] %v4415_v44 }
 0x1ef   :  { %v1119_v43 = vadd.f32 %v1118_v24, %v1018_v52  ;;  %v4365_v23 = vpop.f32.mrf.mxu1  ;;  %v4442_v24 = vld [vmem:[%s5693_s3 + $0xb8] sm:$0xff] }
 0x1f0   :  { %1353 = vmatpush.msra.mxu0 %v4442_v24 }
 0x1f1   :  { %v1177_v56 = vmax.f32 %v4201_v54, %v1119_v43  ;;  %v4376_v30 = vpop.f32.mrf.mxu3  ;;  %v4378_v35 = vpop.f32.mrf.mxu0  ;;  %v4447_v43 = vld [vmem:[%s5693_s3 + $0x2b0] sm:$0xf] }
 0x1f2   :  { %2516 = vmatmul.msk.f32.gmra.mxu1 %vm1283_vm2, %v4372_v31  ;;  %5988 = vst [vmem:[#allocation25_spill] sm:$0xff] %v4447_v43 }
 0x1f3   :  { %v4385_v18 = vmax.f32 %v5984_v49, %v1177_v56  ;;  %2522 = vmatmul.msk.f32.gmra.mxu2 %vm1283_vm2, %v4372_v31  ;;  %v4452_v56 = vld [vmem:[%s5693_s3 + $0x2b8] sm:$0xf]  ;;  %2581 = vmatpush.msk.msrb.mxu1 %vm1299_vm1, %v4447_v43  ;;  %v4462_v49 = vld [vmem:[%s5693_s3 + $0x2a0] sm:$0xff] }
 0x1f4   :  { %5989 = vst [vmem:[#allocation24_spill] sm:$0xff] %v4452_v56  ;;  %2587 = vmatpush.msk.msrb.mxu2 %vm1299_vm1, %v4452_v56  ;;  %v4478_v56 = vld [vmem:[%s5693_s3 + $0x290] sm:$0xff]  ;;  %v4483_v43 = vld [vmem:[%s5693_s3 + $0x298] sm:$0xff] }
 0x1f5   :  { %5985 = vst [vmem:[#allocation20_spill] sm:$0xff] %v4385_v18  ;;  %1599 = vmatpush.msrb.mxu1 %v4462_v49 }
 0x1f6   :  { %v4390_v38 = vpop.f32.mrf.mxu2  ;;  %5990 = vst [vmem:[#allocation22_spill] sm:$0xff] %v4462_v49  ;;  %1631 = vmatpush.msrb.mxu2 %v4467_v9  ;;  %v4494_v9 = vld [vmem:[%s5693_s3 + $0x280] sm:$0xff] }
 0x1f7   :  { %v4392_v54 = vpop.f32.mrf.mxu1  ;;  %5992 = vst [vmem:[#allocation30_spill] sm:$0xff] %v4478_v56  ;;  %1600 = vmatpush.msrb.mxu1 %v4478_v56  ;;  %v4511_v56 = vld [vmem:[%s5693_s3 + $0x278] sm:$0xff] }
 0x1f8   :  { %5993 = vst [vmem:[#allocation28_spill] sm:$0xff] %v4483_v43  ;;  %1632 = vmatpush.msrb.mxu2 %v4483_v43  ;;  %v4506_v43 = vld [vmem:[%s5693_s3 + $0x270] sm:$0xff] }
 0x1f9   :  { %v4402_v42 = vpop.f32.mrf.mxu3  ;;  %v4404_v41 = vpop.f32.mrf.mxu0  ;;  %5994 = vst [vmem:[#allocation26_spill] sm:$0xff] %v4494_v9  ;;  %1601 = vmatpush.msrb.mxu1 %v4494_v9  ;;  %v4518_v9 = vld [vmem:[%s5693_s3 + $0x260] sm:$0xff] }
 0x1fa   :  { %2517 = vmatmul.msk.f32.gmra.mxu1 %vm1283_vm2, %v4399_v32  ;;  %5996 = vst [vmem:[#allocation35_spill] sm:$0xff] %v4506_v43 }
 0x1fb   :  { %2523 = vmatmul.msk.f32.gmra.mxu2 %vm1283_vm2, %v4399_v32  ;;  %5997 = vst [vmem:[#allocation33_spill] sm:$0xff] %v4511_v56  ;;  %1602 = vmatpush.msrb.mxu1 %v4506_v43  ;;  %v4539_v43 = vld [vmem:[%s5693_s3 + $0x258] sm:$0xff]  ;;  %v4555_v32 = vld [vmem:[%s5693_s3 + $0x248] sm:$0xff] }
 0x1fc   :  { %5998 = vst [vmem:[#allocation31_spill] sm:$0xff] %v4518_v9 }
 0x1fd   :  { %1603 = vmatpush.msrb.mxu1 %v4518_v9  ;;  %6001 = vst [vmem:[#allocation38_spill] sm:$0xff] %v4539_v43 }
 0x1fe   :  { %v4411_v4 = vpop.f32.mrf.mxu2  ;;  %6003 = vst [vmem:[#allocation37_spill] sm:$0xff] %v4555_v32 }
 0x1ff   :  { %v4413_v15 = vpop.f32.mrf.mxu1 }
 0x201   :  { %v4417_v57 = vpop.f32.mrf.mxu3  ;;  %v4419_v26 = vpop.f32.mrf.mxu0 }
 0x202   :  { %2518 = vmatmul.msk.f32.gmra.mxu1 %vm1283_vm2, %v4415_v44 }
 0x203   :  { %2524 = vmatmul.msk.f32.gmra.mxu2 %vm1283_vm2, %v4415_v44  ;;  %v4499_v44 = vld [vmem:[%s5693_s3 + $0x288] sm:$0xff] }
 0x204   :  { %5995 = vst [vmem:[#allocation27_spill] sm:$0xff] %v4499_v44  ;;  %1633 = vmatpush.msrb.mxu2 %v4499_v44  ;;  %v4523_v44 = vld [vmem:[%s5693_s3 + $0x268] sm:$0xff] }
 0x205   :  { %5999 = vst [vmem:[#allocation32_spill] sm:$0xff] %v4523_v44 }
 0x206   :  { %v4431_v5 = vpop.f32.mrf.mxu2  ;;  %1634 = vmatpush.msrb.mxu2 %v4511_v56  ;;  %v4534_v56 = vld [vmem:[%s5693_s3 + $0x250] sm:$0xff] }
 0x207   :  { %v4433_v55 = vpop.f32.mrf.mxu1  ;;  %6000 = vst [vmem:[#allocation40_spill] sm:$0xff] %v4534_v56  ;;  %1604 = vmatpush.msrb.mxu1 %v4534_v56  ;;  %v4567_v56 = vld [vmem:[%s5693_s3 + $0x238] sm:$0xff] }
 0x208   :  { %1635 = vmatpush.msrb.mxu2 %v4523_v44  ;;  %v4550_v44 = vld [vmem:[%s5693_s3 + $0x240] sm:$0xff]  ;;  %6005 = vst [vmem:[#allocation43_spill] sm:$0xff] %v4567_v56 }
 0x209   :  { %v4435_v28 = vpop.f32.mrf.mxu3  ;;  %v4437_v52 = vpop.f32.mrf.mxu0  ;;  %6002 = vst [vmem:[#allocation36_spill] sm:$0xff] %v4550_v44  ;;  %1605 = vmatpush.msrb.mxu1 %v4550_v44  ;;  %v4574_v44 = vld [vmem:[%s5693_s3 + $0x220] sm:$0xff] }
 0x20a   :  { %1636 = vmatpush.msrb.mxu2 %v4539_v43  ;;  %v4562_v43 = vld [vmem:[%s5693_s3 + $0x230] sm:$0xff]  ;;  %6006 = vst [vmem:[#allocation41_spill] sm:$0xff] %v4574_v44 }
 0x20b   :  { %6004 = vst [vmem:[#allocation44_spill] sm:$0xff] %v4562_v43  ;;  %1606 = vmatpush.msrb.mxu1 %v4562_v43  ;;  %v4595_v43 = vld [vmem:[%s5693_s3 + $0x1f0] sm:$0xff] }
 0x20c   :  { %1637 = vmatpush.msrb.mxu2 %v4555_v32  ;;  %v4579_v32 = vld [vmem:[%s5693_s3 + $0x228] sm:$0xff] }
 0x20d   :  { %6007 = vst [vmem:[#allocation42_spill] sm:$0xff] %v4579_v32  ;;  %1607 = vmatpush.msrb.mxu1 %v4574_v44 }
 0x20e   :  { %v4469_v14 = vpop.f32.mrf.mxu2  ;;  %1638 = vmatpush.msrb.mxu2 %v4567_v56  ;;  %v4590_v56 = vld [vmem:[%s5693_s3 + $0x200] sm:$0xf] }
 0x20f   :  { %v4473_v18 = vpop.f32.mrf.mxu1  ;;  %2547 = vmatpush.msk.msrb.mxu3 %vm1299_vm1, %v4590_v56  ;;  %1608 = vmatpush.msrb.mxu1 %v4600_v58 }
 0x210   :  { %1639 = vmatpush.msrb.mxu2 %v4579_v32 }
 0x211   :  { %v4487_v8 = vpop.f32.mrf.mxu3  ;;  %v4489_v49 = vpop.f32.mrf.mxu0  ;;  %2627 = vmatpush.msk.msra.mxu1 %vm1299_vm1, %v3965_v40  ;;  %1493 = vmatpush.msrb.mxu3 %v4595_v43  ;;  %v4631_v40 = vld [vmem:[%s5693_s3 + $0x208] sm:$0xf] }
 0x212   :  { %2553 = vmatpush.msk.msrb.mxu0 %vm1299_vm1, %v4631_v40 }
 0x213   :  { %1779 = vmatpush.msra.mxu1 %v4010_v61  ;;  %v4641_v61 = vld [vmem:[%s5693_s3 + $0x1f8] sm:$0xff] }
 0x214   :  { %1525 = vmatpush.msrb.mxu0 %v4641_v61 }
 0x215   :  { %1780 = vmatpush.msra.mxu1 %v4046_v59 }
 0x216   :  { %v4525_v17 = vpop.f32.mrf.mxu2 }
 0x217   :  { %v4529_v3 = vpop.f32.mrf.mxu1  ;;  %1781 = vmatpush.msra.mxu1 %v4084_v62 }
 0x219   :  { %v4543_v45 = vpop.f32.mrf.mxu3  ;;  %v4545_v9 = vpop.f32.mrf.mxu0  ;;  %1782 = vmatpush.msra.mxu1 %v4125_v13  ;;  %v923_v13 = vadd.f32 %v4404_v41, %v4402_v42 }
 0x21b   :  { %1783 = vmatpush.msra.mxu1 %v4168_v25 }
 0x21d   :  { %1784 = vmatpush.msra.mxu1 %v4206_v60  ;;  %v4677_v60 = vld [vmem:[%s5693_s3 + $0x1d8] sm:$0xff] }
 0x21e   :  { %v4581_v31 = vpop.f32.mrf.mxu2 }
 0x21f   :  { %v4585_v1 = vpop.f32.mrf.mxu1  ;;  %1785 = vmatpush.msra.mxu1 %v4301_v63  ;;  %v6013_v63 = vmax.f32 %v3929_v2, %v4000_v6  ;;  %v4709_v2 = vld [vmem:[%s5693_s3 + $0x1b8] sm:$0xff] }
 0x220   :  { %6008 = vst [vmem:[#allocation48_spill] sm:$0xff] %v4585_v1  ;;  %v4608_v1 = vld [vmem:[%s5693_s3 + $0x218] sm:$0xff] }
 0x221   :  { %v4610_v32 = vpop.f32.mrf.mxu3  ;;  %v4612_v44 = vpop.f32.mrf.mxu0  ;;  %1640 = vmatpush.msrb.mxu2 %v4608_v1  ;;  %1786 = vmatpush.msra.mxu1 %v4334_v7 }
 0x222   :  { %6010 = vst [vmem:[#allocation45_spill] sm:$0xff] %v4610_v32 }
 0x223   :  { %6011 = vst [vmem:[#allocation46_spill] sm:$0xff] %v4612_v44  ;;  %2633 = vmatpush.msk.msra.mxu2 %vm1299_vm1, %v3983_v50  ;;  %v920_v44 = vadd.f32 %v4378_v35, %v4376_v30  ;;  %v4636_v50 = vld [vmem:[%s5693_s3 + $0x1e0] sm:$0xff]  ;;  %1787 = vmatpush.msra.mxu1 %v4370_v19 }
 0x224   :  { %1494 = vmatpush.msrb.mxu3 %v4636_v50 }
 0x225   :  { %1811 = vmatpush.msra.mxu2 %v4018_v11  ;;  %v4650_v11 = vld [vmem:[%s5693_s3 + $0x1d0] sm:$0xff]  ;;  %v1021_v62 = vadd.f32 %v4365_v23, %v920_v44  ;;  %v4667_v23 = vld [vmem:[%s5693_s3 + $0x1e8] sm:$0xff]  ;;  %1788 = vmatpush.msra.mxu1 %v4426_v12 }
 0x226   :  { %v4623_v58 = vpop.f32.mrf.mxu2  ;;  %1495 = vmatpush.msrb.mxu3 %v4650_v11  ;;  %1526 = vmatpush.msrb.mxu0 %v4667_v23  ;;  %v4726_v12 = vld [vmem:[%s5693_s3 + $0x190] sm:$0xff] }
 0x227   :  { %6012 = vst [vmem:[#allocation52_spill] sm:$0xff] %v4623_v58  ;;  %1812 = vmatpush.msra.mxu2 %v4057_v16  ;;  %v1041_v32 = vpop.f32.mrf.mxu1 }
 0x228   :  { %1527 = vmatpush.msrb.mxu0 %v4677_v60 }
 0x229   :  { %v839_v59 = vpop.f32.mrf.mxu3  ;;  %v940_v16 = vpop.f32.mrf.mxu0  ;;  %1813 = vmatpush.msra.mxu2 %v4101_v33  ;;  %v1122_v33 = vadd.f32 %v4390_v38, %v1021_v62 }
 0x22a   :  { %v941_v30 = vadd.f32 %v940_v16, %v839_v59 }
 0x22b   :  { %1814 = vmatpush.msra.mxu2 %v4138_v21  ;;  %v4672_v21 = vld [vmem:[%s5693_s3 + $0x1c0] sm:$0xff] }
 0x22c   :  { %v1042_v35 = vadd.f32 %v1041_v32, %v941_v30  ;;  %1496 = vmatpush.msrb.mxu3 %v4672_v21 }
 0x22d   :  { %1815 = vmatpush.msra.mxu2 %v4178_v10 }
 0x22e   :  { %v1142_v58 = vpop.f32.mrf.mxu2 }
 0x22f   :  { %v1143_v59 = vadd.f32 %v1142_v58, %v1042_v35  ;;  %v1044_v16 = vpop.f32.mrf.mxu1  ;;  %1816 = vmatpush.msra.mxu2 %v4252_v20  ;;  %v4686_v58 = vld [vmem:[%s5693_s3 + $0x1b0] sm:$0xff]  ;;  %v1024_v20 = vadd.f32 %v4392_v54, %v923_v13  ;;  %v6014_v13 = vmax.f32 %v3936_v27, %v4024_v29  ;;  %v4772_v29 = vld [vmem:[%s5693_s3 + $0x178] sm:$0xff] }
 0x230   :  { %1497 = vmatpush.msrb.mxu3 %v4686_v58  ;;  %v4766_v27 = vld [vmem:[%s5693_s3 + $0x170] sm:$0xff] }
 0x231   :  { %v1203_v25 = vmax.f32 %v1122_v33, %v1143_v59  ;;  %v842_v10 = vpop.f32.mrf.mxu3  ;;  %v943_v38 = vpop.f32.mrf.mxu0  ;;  %1817 = vmatpush.msra.mxu2 %v4315_v37  ;;  %v4701_v37 = vld [vmem:[%s5693_s3 + $0x1c8] sm:$0xff]  ;;  %v1125_v6 = vadd.f32 %v4411_v4, %v1024_v20  ;;  %v929_v20 = vadd.f32 %v4437_v52, %v4435_v28 }
 0x232   :  { %v944_v32 = vadd.f32 %v943_v38, %v842_v10  ;;  %1528 = vmatpush.msrb.mxu0 %v4701_v37  ;;  %v4731_v4 = vld [vmem:[%s5693_s3 + $0x1a8] sm:$0xff] }
 0x233   :  { %v1216_v42 = vmax.f32 %v6013_v63, %v1203_v25  ;;  %1818 = vmatpush.msra.mxu2 %v4344_v53  ;;  %v926_v53 = vadd.f32 %v4419_v26, %v4417_v57  ;;  %v4753_v25 = vld [vmem:[%s5693_s3 + $0x180] sm:$0xff]  ;;  %v4759_v10 = vld [vmem:[%s5693_s3 + $0x188] sm:$0xff] }
 0x234   :  { %v1045_v41 = vadd.f32 %v1044_v16, %v944_v32  ;;  %1529 = vmatpush.msrb.mxu0 %v4709_v2 }
 0x235   :  { %v1223_v7 = vadd.f32 %v4322_v48, %v1216_v42  ;;  %1819 = vmatpush.msra.mxu2 %v4397_v51  ;;  %v4720_v51 = vld [vmem:[%s5693_s3 + $0x1a0] sm:$0xff]  ;;  %v1027_v33 = vadd.f32 %v4413_v15, %v926_v53  ;;  %v1030_v53 = vadd.f32 %v4433_v55, %v929_v20 }
 0x236   :  { %v1145_v54 = vpop.f32.mrf.mxu2  ;;  %1498 = vmatpush.msrb.mxu3 %v4720_v51  ;;  %1530 = vmatpush.msrb.mxu0 %v4731_v4  ;;  %v4813_v55 = vld [vmem:[%s5693_s3 + $0x360] sm:$0xf] }
 0x237   :  { %v4715_v19 = vmax.f32 %v1223_v7, 0.0  ;;  %v1146_v44 = vadd.f32 %v1145_v54, %v1045_v41  ;;  %v1047_v30 = vpop.f32.mrf.mxu1  ;;  %1820 = vmatpush.msra.mxu2 %v4442_v24  ;;  %v4744_v24 = vld [vmem:[%s5693_s3 + $0x198] sm:$0xff]  ;;  %v1128_v32 = vadd.f32 %v4431_v5, %v1027_v33  ;;  %v4783_v7 = vld [vmem:[%s5693_s3 + $0x160] sm:$0xff]  ;;  %v4789_v5 = vld [vmem:[%s5693_s3 + $0x168] sm:$0xff] }
 0x238   :  { %1499 = vmatpush.msrb.mxu3 %v4726_v12  ;;  %1531 = vmatpush.msrb.mxu0 %v4744_v24 }
 0x239   :  { %v1205_v57 = vmax.f32 %v1125_v6, %v1146_v44  ;;  %2502 = vmatmul.msk.f32.vlgmr.msra.gmra.mxu3 %vm1283_vm2, %v4715_v19  ;;  %2508 = vmatmul.msk.f32.vlgmr.msra.gmra.mxu0 %vm1283_vm2, %v4715_v19  ;;  %v845_v26 = vpop.f32.mrf.mxu3  ;;  %v946_v62 = vpop.f32.mrf.mxu0  ;;  %v6015_v44 = vmax.f32 %v3943_v34, %v4036_v47  ;;  %v4818_v34 = vld [vmem:[%s5693_s3 + $0x350] sm:$0xff] }
 0x23a   :  { %v947_v35 = vadd.f32 %v946_v62, %v845_v26  ;;  %1500 = vmatpush.msrb.mxu3 %v4753_v25  ;;  %1532 = vmatpush.msrb.mxu0 %v4759_v10  ;;  %v932_v62 = vadd.f32 %v4489_v49, %v4487_v8  ;;  %v4845_v49 = vld [vmem:[%s5693_s3 + $0x340] sm:$0xff] }
 0x23b   :  { %v1217_v59 = vmax.f32 %v6014_v13, %v1205_v57 }
 0x23c   :  { %v1048_v16 = vadd.f32 %v1047_v30, %v947_v35  ;;  %1501 = vmatpush.msrb.mxu3 %v4766_v27  ;;  %1533 = vmatpush.msrb.mxu0 %v4772_v29 }
 0x23d   :  { %v1224_v38 = vadd.f32 %v4322_v48, %v1217_v59 }
 0x23e   :  { %v1148_v15 = vpop.f32.mrf.mxu2  ;;  %1502 = vmatpush.msrb.mxu3 %v4783_v7  ;;  %1534 = vmatpush.msrb.mxu0 %v4789_v5 }
 0x23f   :  { %v4777_v63 = vmax.f32 %v1224_v38, 0.0  ;;  %v1149_v42 = vadd.f32 %v1148_v15, %v1048_v16  ;;  %v1050_v41 = vpop.f32.mrf.mxu1  ;;  %v1033_v16 = vadd.f32 %v4473_v18, %v932_v62  ;;  %v6016_v38 = vmax.f32 %v3950_v39, %v4060_v0  ;;  %v4874_v18 = vld [vmem:[%s5693_s3 + $0x348] sm:$0xff] }
 0x240   :  { %2615 = vmatpush.msk.msra.mxu3 %vm1299_vm1, %v4813_v55  ;;  %v935_v0 = vadd.f32 %v4545_v9, %v4543_v45  ;;  %v5022_v62 = vld [vmem:[%s5693_s3 + $0x2c8] sm:$0xff] }
 0x241   :  { %v1207_v54 = vmax.f32 %v1128_v32, %v1149_v42  ;;  %2503 = vmatmul.msk.f32.gmra.mxu3 %vm1283_vm2, %v4777_v63  ;;  %2509 = vmatmul.msk.f32.gmra.mxu0 %vm1283_vm2, %v4777_v63  ;;  %v848_v28 = vpop.f32.mrf.mxu3  ;;  %v949_v52 = vpop.f32.mrf.mxu0  ;;  %v1134_v39 = vadd.f32 %v4525_v17, %v1033_v16  ;;  %v2745_v16 = vld [vmem:[%s5693_s3 + $0x70] sm:$0xff] }
 0x242   :  { %2582 = vmatmul.msk.f32.vlgmr.msrb.gmra.mxu1 %vm1283_vm2, %v4777_v63  ;;  %2588 = vmatmul.msk.f32.vlgmr.msrb.gmra.mxu2 %vm1283_vm2, %v4777_v63  ;;  %v950_v6 = vadd.f32 %v949_v52, %v848_v28  ;;  %v6017_v28 = vmax.f32 %v3957_v46, %v4072_v22  ;;  %v4926_v46 = vld [vmem:[%s5693_s3 + $0x300] sm:$0xff] }
 0x243   :  { %v1218_v30 = vmax.f32 %v6015_v44, %v1207_v54  ;;  %2651 = vmatpush.msk.msrb.mxu1 %vm1299_vm1, %v4590_v56  ;;  %2657 = vmatpush.msk.msrb.mxu2 %vm1299_vm1, %v4631_v40  ;;  %v4825_v56 = vld [vmem:[%s5693_s3 + $0x368] sm:$0xf]  ;;  %v1131_v40 = vadd.f32 %v4469_v14, %v1030_v53  ;;  %v1036_v54 = vadd.f32 %v4529_v3, %v935_v0  ;;  %v6030_v0 = vld [vmem:[#allocation13_spill] sm:$0xff] }
 0x244   :  { %v1051_v57 = vadd.f32 %v1050_v41, %v950_v6  ;;  %2621 = vmatpush.msk.msra.mxu0 %vm1299_vm1, %v4825_v56  ;;  %1705 = vmatpush.msra.mxu3 %v4818_v34  ;;  %v4887_v41 = vld [vmem:[%s5693_s3 + $0x320] sm:$0xff]  ;;  %v4921_v3 = vld [vmem:[%s5693_s3 + $0x328] sm:$0xff] }
 0x245   :  { %v1225_v26 = vadd.f32 %v4322_v48, %v1218_v30  ;;  %1907 = vmatpush.msrb.mxu1 %v4595_v43  ;;  %1939 = vmatpush.msrb.mxu2 %v4641_v61  ;;  %v4859_v61 = vld [vmem:[%s5693_s3 + $0x330] sm:$0xff]  ;;  %v1137_v22 = vadd.f32 %v4581_v31, %v1036_v54  ;;  %v4948_v31 = vld [vmem:[%s5693_s3 + $0x318] sm:$0xff] }
 0x246   :  { %v1151_v47 = vpop.f32.mrf.mxu2  ;;  %1706 = vmatpush.msra.mxu3 %v4845_v49 }
 0x247   :  { %v4831_v35 = vmax.f32 %v1225_v26, 0.0  ;;  %v1152_v33 = vadd.f32 %v1151_v47, %v1051_v57  ;;  %v1053_v13 = vpop.f32.mrf.mxu1  ;;  %1908 = vmatpush.msrb.mxu1 %v4636_v50  ;;  %v4854_v50 = vld [vmem:[%s5693_s3 + $0x358] sm:$0xff]  ;;  %1940 = vmatpush.msrb.mxu2 %v4667_v23 }
 0x248   :  { %1737 = vmatpush.msra.mxu0 %v4854_v50  ;;  %1707 = vmatpush.msra.mxu3 %v4859_v61 }
 0x249   :  { %v1209_v59 = vmax.f32 %v1131_v40, %v1152_v33  ;;  %2504 = vmatmul.msk.f32.gmra.mxu3 %vm1283_vm2, %v4831_v35  ;;  %2510 = vmatmul.msk.f32.gmra.mxu0 %vm1283_vm2, %v4831_v35  ;;  %v851_v8 = vpop.f32.mrf.mxu3  ;;  %v952_v43 = vpop.f32.mrf.mxu0  ;;  %v4972_v40 = vld [vmem:[%s5693_s3 + $0x2e0] sm:$0xff] }
 0x24a   :  { %2583 = vmatmul.msk.f32.gmra.mxu1 %vm1283_vm2, %v4831_v35  ;;  %2589 = vmatmul.msk.f32.gmra.mxu2 %vm1283_vm2, %v4831_v35  ;;  %v953_v14 = vadd.f32 %v952_v43, %v851_v8  ;;  %v2740_v33 = vld [vmem:[%s5693_s3 + $0xa0] sm:$0xf]  ;;  %v2742_v8 = vld [vmem:[%s5693_s3 + $0xa8] sm:$0xf] }
 0x24b   :  { %v1219_v15 = vmax.f32 %v6016_v38, %v1209_v59  ;;  %1909 = vmatpush.msrb.mxu1 %v4650_v11  ;;  %1941 = vmatpush.msrb.mxu2 %v4677_v60  ;;  %v4902_v60 = vld [vmem:[%s5693_s3 + $0x338] sm:$0xff]  ;;  %v2741_v59 = vld [vmem:[%s5693_s3 + $0x90] sm:$0xff]  ;;  %v2743_v43 = vld [vmem:[%s5693_s3 + $0x80] sm:$0xff] }
 0x24c   :  { %v1054_v32 = vadd.f32 %v1053_v13, %v953_v14  ;;  %1738 = vmatpush.msra.mxu0 %v4874_v18  ;;  %1708 = vmatpush.msra.mxu3 %v4887_v41  ;;  %v6021_v13 = vld [vmem:[#allocation21_spill] sm:$0xff]  ;;  %v2749_v38 = vld [vmem:[%s5693_s3 + $0x68] sm:$0xff] }
 0x24d   :  { %v1226_v20 = vadd.f32 %v4322_v48, %v1219_v15  ;;  %1910 = vmatpush.msrb.mxu1 %v4672_v21  ;;  %1942 = vmatpush.msrb.mxu2 %v4701_v37  ;;  %v4907_v37 = vld [vmem:[%s5693_s3 + $0x310] sm:$0xff]  ;;  %v2744_v14 = vld [vmem:[%s5693_s3 + $0x98] sm:$0xff] }
 0x24e   :  { %v1154_v42 = vpop.f32.mrf.mxu2  ;;  %1739 = vmatpush.msra.mxu0 %v4902_v60  ;;  %1709 = vmatpush.msra.mxu3 %v4907_v37  ;;  %v6024_v15 = vld [vmem:[#allocation8_spill] sm:$0xff] }
 0x24f   :  { %v4881_v11 = vmax.f32 %v1226_v20, 0.0  ;;  %v1155_v23 = vadd.f32 %v1154_v42, %v1054_v32  ;;  %v1056_v6 = vpop.f32.mrf.mxu1  ;;  %1911 = vmatpush.msrb.mxu1 %v4686_v58  ;;  %1943 = vmatpush.msrb.mxu2 %v4709_v2  ;;  %v6025_v32 = vld [vmem:[#allocation2_spill] sm:$0xff]  ;;  %v6027_v20 = vld [vmem:[#allocation15_spill] sm:$0xff] }
 0x250   :  { %1740 = vmatpush.msra.mxu0 %v4921_v3  ;;  %1710 = vmatpush.msra.mxu3 %v4926_v46  ;;  %v1193_v42 = vadd.f32 %v4322_v48, %v6027_v20  ;;  %v6060_v20 = vld [vmem:[#allocation46_spill] sm:$0xff] }
 0x251   :  { %v1211_v21 = vmax.f32 %v1134_v39, %v1155_v23  ;;  %2505 = vmatmul.msk.f32.gmra.mxu3 %vm1283_vm2, %v4881_v11  ;;  %2511 = vmatmul.msk.f32.gmra.mxu0 %vm1283_vm2, %v4881_v11  ;;  %v854_v45 = vpop.f32.mrf.mxu3  ;;  %v955_v17 = vpop.f32.mrf.mxu0  ;;  %v6029_v39 = vld [vmem:[#allocation9_spill] sm:$0xff]  ;;  %v6031_v23 = vld [vmem:[#allocation7_spill] sm:$0xff] }
 0x252   :  { %2584 = vmatmul.msk.f32.gmra.mxu1 %vm1283_vm2, %v4881_v11  ;;  %2590 = vmatmul.msk.f32.gmra.mxu2 %vm1283_vm2, %v4881_v11  ;;  %v956_v9 = vadd.f32 %v955_v17, %v854_v45  ;;  %v6033_v45 = vld [vmem:[#allocation12_spill] sm:$0xff]  ;;  %v6034_v17 = vld [vmem:[#allocation17_spill] sm:$0xff] }
 0x253   :  { %v1220_v52 = vmax.f32 %v6017_v28, %v1211_v21  ;;  %1912 = vmatpush.msrb.mxu1 %v4720_v51  ;;  %1944 = vmatpush.msrb.mxu2 %v4731_v4  ;;  %v4953_v51 = vld [vmem:[%s5693_s3 + $0x2f0] sm:$0xff]  ;;  %v6018_v4 = vld [vmem:[#allocation5_spill] sm:$0xff]  ;;  %v6032_v21 = vld [vmem:[#allocation10_spill] sm:$0xff] }
 0x254   :  { %v1057_v53 = vadd.f32 %v1056_v6, %v956_v9  ;;  %1741 = vmatpush.msra.mxu0 %v4948_v31  ;;  %1711 = vmatpush.msra.mxu3 %v4953_v51  ;;  %v6035_v9 = vld [vmem:[#allocation11_spill] sm:$0xff]  ;;  %v6037_v28 = vld [vmem:[#allocation25_spill] sm:$0xff]  ;;  %v6039_v6 = vld [vmem:[#allocation22_spill] sm:$0xff] }
 0x255   :  { %v1227_v44 = vadd.f32 %v4322_v48, %v1220_v52  ;;  %1913 = vmatpush.msrb.mxu1 %v4726_v12  ;;  %1945 = vmatpush.msrb.mxu2 %v4744_v24  ;;  %v4958_v12 = vld [vmem:[%s5693_s3 + $0x308] sm:$0xff]  ;;  %v6019_v24 = vmax.f32 %v3975_v36, %v6018_v4  ;;  %v6038_v52 = vld [vmem:[#allocation24_spill] sm:$0xff] }
 0x256   :  { %v1157_v30 = vpop.f32.mrf.mxu2  ;;  %1742 = vmatpush.msra.mxu0 %v4958_v12  ;;  %1712 = vmatpush.msra.mxu3 %v4972_v40 }
 0x257   :  { %v4931_v58 = vmax.f32 %v1227_v44, 0.0  ;;  %v1158_v2 = vadd.f32 %v1157_v30, %v1057_v53  ;;  %1914 = vmatpush.msrb.mxu1 %v4753_v25  ;;  %1946 = vmatpush.msrb.mxu2 %v4759_v10  ;;  %v6020_v25 = vld [vmem:[#allocation14_spill] sm:$0xff]  ;;  %v4988_v10 = vld [vmem:[%s5693_s3 + $0x2f8] sm:$0xff]  ;;  %v6040_v53 = vld [vmem:[#allocation23_spill] sm:$0xff] }
 0x258   :  { %1743 = vmatpush.msra.mxu0 %v4988_v10  ;;  %v6041_v30 = vld [vmem:[#allocation30_spill] sm:$0xff] }
 0x259   :  { %v1213_v57 = vmax.f32 %v1137_v22, %v1158_v2  ;;  %2506 = vmatmul.msk.f32.gmra.mxu3 %vm1283_vm2, %v4931_v58  ;;  %2512 = vmatmul.msk.f32.gmra.mxu0 %vm1283_vm2, %v4931_v58  ;;  %v6044_v22 = vld [vmem:[#allocation27_spill] sm:$0xff] }
 0x25a   :  { %2585 = vmatmul.msk.f32.gmra.mxu1 %vm1283_vm2, %v4931_v58  ;;  %2591 = vmatmul.msk.f32.gmra.mxu2 %vm1283_vm2, %v4931_v58 }
 0x25b   :  { %v1221_v26 = vmax.f32 %v6019_v24, %v1213_v57  ;;  %1915 = vmatpush.msrb.mxu1 %v4766_v27  ;;  %1947 = vmatpush.msrb.mxu2 %v4772_v29  ;;  %v4997_v27 = vld [vmem:[%s5693_s3 + $0x2d0] sm:$0xff]  ;;  %v5002_v29 = vld [vmem:[%s5693_s3 + $0x2e8] sm:$0xff] }
 0x25c   :  { %1713 = vmatpush.msra.mxu3 %v4997_v27  ;;  %1744 = vmatpush.msra.mxu0 %v5002_v29  ;;  %v6045_v57 = vld [vmem:[#allocation35_spill] sm:$0xff]  ;;  %v6049_v24 = vld [vmem:[#allocation40_spill] sm:$0xff] }
 0x25d   :  { %v1228_v47 = vadd.f32 %v4322_v48, %v1221_v26  ;;  %1916 = vmatpush.msrb.mxu1 %v4783_v7  ;;  %1948 = vmatpush.msrb.mxu2 %v4789_v5  ;;  %v5010_v7 = vld [vmem:[%s5693_s3 + $0x2c0] sm:$0xff]  ;;  %v5015_v5 = vld [vmem:[%s5693_s3 + $0x2d8] sm:$0xff] }
 0x25e   :  { %1714 = vmatpush.msra.mxu3 %v5010_v7  ;;  %1745 = vmatpush.msra.mxu0 %v5015_v5  ;;  %v5139_v54 = vpop.f32.mrf.mxu2  ;;  %v6050_v26 = vld [vmem:[#allocation38_spill] sm:$0xff] }
 0x25f   :  { %v4976_v36 = vmax.f32 %v1228_v47, 0.0  ;;  %v6051_v47 = vld [vmem:[#allocation36_spill] sm:$0xff] }
 0x260   :  { %1746 = vmatpush.msra.mxu0 %v5022_v62 }
 0x261   :  { %2548 = vmatmul.msk.f32.vlgmr.msrb.gmra.mxu3 %vm1283_vm2, %v6020_v25  ;;  %2554 = vmatmul.msk.f32.vlgmr.msrb.gmra.mxu0 %vm1283_vm2, %v6020_v25 }
 0x262   :  { %2586 = vmatmul.msk.f32.gmra.mxu1 %vm1283_vm2, %v4976_v36  ;;  %2592 = vmatmul.msk.f32.gmra.mxu2 %vm1283_vm2, %v4976_v36 }
 0x263   :  { %2639 = vmatpush.msk.msrb.mxu3 %vm1299_vm1, %v2740_v33  ;;  %2645 = vmatpush.msk.msrb.mxu0 %vm1299_vm1, %v2742_v8  ;;  %v6057_v33 = vld [vmem:[#allocation42_spill] sm:$0xff] }
 0x265   :  { %1843 = vmatpush.msrb.mxu3 %v2741_v59  ;;  %1875 = vmatpush.msrb.mxu0 %v2744_v14  ;;  %v6058_v59 = vld [vmem:[#allocation47_spill] sm:$0xff]  ;;  %v958_v14 = vpop.f32.mrf.mxu0 }
 0x266   :  { %v5161_v2 = vpop.f32.mrf.mxu2 }
 0x267   :  { %1844 = vmatpush.msrb.mxu3 %v2743_v43 }
 0x269   :  { %2549 = vmatmul.msk.f32.gmra.mxu3 %vm1283_vm2, %v6021_v13  ;;  %2555 = vmatmul.msk.f32.gmra.mxu0 %vm1283_vm2, %v6021_v13 }
 0x26a   :  { %2628 = vmatmul.msk.f32.vlgmr.msra.gmra.mxu1 %vm1283_vm2, %v6020_v25  ;;  %2634 = vmatmul.msk.f32.vlgmr.msra.gmra.mxu2 %vm1283_vm2, %v6020_v25 }
 0x26b   :  { %2675 = vmatpush.msk.msra.mxu1 %vm1299_vm1, %v4813_v55  ;;  %2681 = vmatpush.msk.msra.mxu2 %vm1299_vm1, %v4825_v56  ;;  %v2746_v55 = vld [vmem:[%s5693_s3 + $0x88] sm:$0xff]  ;;  %v6022_v56 = vld [vmem:[#allocation18_spill] sm:$0xff] }
 0x26c   :  { %1845 = vmatpush.msrb.mxu3 %v2745_v16  ;;  %1876 = vmatpush.msrb.mxu0 %v2746_v55  ;;  %v857_v16 = vpop.f32.mrf.mxu3 }
 0x26d   :  { %2058 = vmatpush.msra.mxu1 %v4818_v34  ;;  %2090 = vmatpush.msra.mxu2 %v4854_v50  ;;  %v2747_v34 = vld [vmem:[%s5693_s3 + $0x60] sm:$0xff]  ;;  %v6023_v50 = vld [vmem:[#allocation3_spill] sm:$0xff] }
 0x26e   :  { %1846 = vmatpush.msrb.mxu3 %v2747_v34  ;;  %v5181_v25 = vpop.f32.mrf.mxu2 }
 0x26f   :  { %2059 = vmatpush.msra.mxu1 %v4845_v49  ;;  %v2748_v49 = vld [vmem:[%s5693_s3 + $0x78] sm:$0xff]  ;;  %2091 = vmatpush.msra.mxu2 %v4874_v18  ;;  %v6028_v18 = vld [vmem:[#allocation6_spill] sm:$0xff] }
 0x270   :  { %1877 = vmatpush.msrb.mxu0 %v2748_v49  ;;  %1847 = vmatpush.msrb.mxu3 %v6023_v50 }
 0x271   :  { %2550 = vmatmul.msk.f32.gmra.mxu3 %vm1283_vm2, %v6022_v56  ;;  %2556 = vmatmul.msk.f32.gmra.mxu0 %vm1283_vm2, %v6022_v56 }
 0x272   :  { %2629 = vmatmul.msk.f32.gmra.mxu1 %vm1283_vm2, %v6021_v13  ;;  %2635 = vmatmul.msk.f32.gmra.mxu2 %vm1283_vm2, %v6021_v13 }
 0x273   :  { %2060 = vmatpush.msra.mxu1 %v4859_v61  ;;  %1878 = vmatpush.msrb.mxu0 %v2749_v38  ;;  %v6026_v61 = vld [vmem:[#allocation19_spill] sm:$0xff] }
 0x274   :  { %2092 = vmatpush.msra.mxu2 %v4902_v60  ;;  %1848 = vmatpush.msrb.mxu3 %v6024_v15  ;;  %v5125_v60 = vpop.f32.mrf.mxu1  ;;  %v959_v15 = vadd.f32 %v958_v14, %v857_v16 }
 0x275   :  { %2061 = vmatpush.msra.mxu1 %v4887_v41  ;;  %1879 = vmatpush.msrb.mxu0 %v6025_v32  ;;  %v5107_v41 = vmax.f32 %v1193_v42, 0.0  ;;  %v6059_v32 = vld [vmem:[#allocation45_spill] sm:$0xff] }
 0x276   :  { %2093 = vmatpush.msra.mxu2 %v4921_v3  ;;  %1849 = vmatpush.msrb.mxu3 %v6028_v18  ;;  %v6042_v3 = vld [vmem:[#allocation28_spill] sm:$0xff]  ;;  %v5203_v43 = vpop.f32.mrf.mxu2  ;;  %v1060_v42 = vadd.f32 %v5125_v60, %v959_v15 }
 0x277   :  { %2062 = vmatpush.msra.mxu1 %v4907_v37  ;;  %1880 = vmatpush.msrb.mxu0 %v6029_v39  ;;  %v6036_v37 = vld [vmem:[#allocation16_spill] sm:$0xff] }
 0x278   :  { %2094 = vmatpush.msra.mxu2 %v4948_v31  ;;  %1850 = vmatpush.msrb.mxu3 %v6030_v0  ;;  %v6046_v31 = vld [vmem:[#allocation33_spill] sm:$0xff]  ;;  %v6061_v0 = vld [vmem:[#allocation48_spill] sm:$0xff] }
 0x279   :  { %2551 = vmatmul.msk.f32.gmra.mxu3 %vm1283_vm2, %v6026_v61  ;;  %2557 = vmatmul.msk.f32.gmra.mxu0 %vm1283_vm2, %v6026_v61 }
 0x27a   :  { %2630 = vmatmul.msk.f32.gmra.mxu1 %vm1283_vm2, %v6022_v56  ;;  %2636 = vmatmul.msk.f32.gmra.mxu2 %vm1283_vm2, %v6022_v56 }
 0x27b   :  { %2063 = vmatpush.msra.mxu1 %v4926_v46  ;;  %1881 = vmatpush.msrb.mxu0 %v6031_v23  ;;  %v6043_v46 = vld [vmem:[#allocation26_spill] sm:$0xff] }
 0x27c   :  { %2095 = vmatpush.msra.mxu2 %v4958_v12  ;;  %1851 = vmatpush.msrb.mxu3 %v6032_v21  ;;  %v5147_v44 = vpop.f32.mrf.mxu1  ;;  %v6048_v12 = vld [vmem:[#allocation32_spill] sm:$0xff] }
 0x27d   :  { %2064 = vmatpush.msra.mxu1 %v4953_v51  ;;  %1882 = vmatpush.msrb.mxu0 %v6033_v45  ;;  %v6047_v51 = vld [vmem:[#allocation31_spill] sm:$0xff]  ;;  %v1161_v45 = vadd.f32 %v5139_v54, %v1060_v42  ;;  %v6063_v54 = vld [vmem:[#allocation73_spill] sm:$0xff] }
 0x27e   :  { %2096 = vmatpush.msra.mxu2 %v4988_v10  ;;  %1852 = vmatpush.msrb.mxu3 %v6034_v17  ;;  %v6053_v10 = vld [vmem:[#allocation44_spill] sm:$0xff] }
 0x27f   :  { %2065 = vmatpush.msra.mxu1 %v4972_v40  ;;  %1883 = vmatpush.msrb.mxu0 %v6035_v9  ;;  %v6052_v40 = vld [vmem:[#allocation37_spill] sm:$0xff] }
 0x280   :  { %2097 = vmatpush.msra.mxu2 %v5002_v29  ;;  %v6055_v29 = vld [vmem:[#allocation20_spill] sm:$0xff] }
 0x281   :  { %2552 = vmatmul.msk.f32.gmra.mxu3 %vm1283_vm2, %v5107_v41  ;;  %2558 = vmatmul.msk.f32.gmra.mxu0 %vm1283_vm2, %v5107_v41 }
 0x282   :  { %2631 = vmatmul.msk.f32.gmra.mxu1 %vm1283_vm2, %v6026_v61  ;;  %2637 = vmatmul.msk.f32.gmra.mxu2 %vm1283_vm2, %v6026_v61 }
 0x283   :  { %2066 = vmatpush.msra.mxu1 %v4997_v27  ;;  %1884 = vmatpush.msrb.mxu0 %v6036_v37  ;;  %v6054_v27 = vld [vmem:[#allocation43_spill] sm:$0xff] }
 0x284   :  { %2098 = vmatpush.msra.mxu2 %v5015_v5  ;;  %v5167_v4 = vpop.f32.mrf.mxu1 }
 0x285   :  { %2067 = vmatpush.msra.mxu1 %v5010_v7  ;;  %v1194_v7 = vadd.f32 %v4322_v48, %v6055_v29 }
 0x286   :  { %2099 = vmatpush.msra.mxu2 %v5022_v62  ;;  %v6056_v62 = vld [vmem:[#allocation41_spill] sm:$0xff] }
 0x287   :  { %v5201_v8 = vmax.f32 %v1194_v7, 0.0 }
 0x289   :  { %2616 = vmatmul.msk.f32.vlgmr.msra.gmra.mxu3 %vm1283_vm2, %v6021_v13  ;;  %2622 = vmatmul.msk.f32.vlgmr.msra.gmra.mxu0 %vm1283_vm2, %v6021_v13 }
 0x28a   :  { %2632 = vmatmul.msk.f32.gmra.mxu1 %vm1283_vm2, %v5107_v41  ;;  %2638 = vmatmul.msk.f32.gmra.mxu2 %vm1283_vm2, %v5107_v41 }
 0x28b   :  { %2663 = vmatpush.msk.msra.mxu3 %vm1299_vm1, %v6037_v28  ;;  %2669 = vmatpush.msk.msra.mxu0 %vm1299_vm1, %v6038_v52 }
 0x28c   :  { %v5195_v5 = vpop.f32.mrf.mxu1 }
 0x28d   :  { %1981 = vmatpush.msra.mxu3 %v6039_v6  ;;  %2013 = vmatpush.msra.mxu0 %v6040_v53  ;;  %v6064_v6 = vld [vmem:[#allocation4_spill] sm:$0xff] }
 0x28e   :  { %v6065_v53 = vmax.f32 %v6063_v54, %v6064_v6 }
 0x28f   :  { %1982 = vmatpush.msra.mxu3 %v6041_v30  ;;  %2014 = vmatpush.msra.mxu0 %v6042_v3  ;;  %v2750_v3 = vld [vmem:[%s5694_s2] ss:$0 sm:$0xff] }
 0x291   :  { %2617 = vmatmul.msk.f32.gmra.mxu3 %vm1283_vm2, %v6022_v56  ;;  %2623 = vmatmul.msk.f32.gmra.mxu0 %vm1283_vm2, %v6022_v56 }
 0x292   :  { %2652 = vmatmul.msk.f32.vlgmr.msrb.gmra.mxu1 %vm1283_vm2, %v4777_v63  ;;  %2658 = vmatmul.msk.f32.vlgmr.msrb.gmra.mxu2 %vm1283_vm2, %v4777_v63 }
 0x293   :  { %1983 = vmatpush.msra.mxu3 %v6043_v46  ;;  %2015 = vmatpush.msra.mxu0 %v6044_v22 }
 0x294   :  { %v5213_v48 = vpop.f32.mrf.mxu1 }
 0x295   :  { %1984 = vmatpush.msra.mxu3 %v6045_v57  ;;  %2016 = vmatpush.msra.mxu0 %v6046_v31 }
 0x297   :  { %1985 = vmatpush.msra.mxu3 %v6047_v51  ;;  %2017 = vmatpush.msra.mxu0 %v6048_v12 }
 0x299   :  { %2618 = vmatmul.msk.f32.gmra.mxu3 %vm1283_vm2, %v6026_v61  ;;  %2624 = vmatmul.msk.f32.gmra.mxu0 %vm1283_vm2, %v6026_v61 }
 0x29a   :  { %2653 = vmatmul.msk.f32.gmra.mxu1 %vm1283_vm2, %v4831_v35  ;;  %2659 = vmatmul.msk.f32.gmra.mxu2 %vm1283_vm2, %v4831_v35 }
 0x29b   :  { %1986 = vmatpush.msra.mxu3 %v6049_v24  ;;  %2018 = vmatpush.msra.mxu0 %v6050_v26 }
 0x29c   :  { %v1420_v34 = vpop.f32.mrf.mxu1 }
 0x29d   :  { %1987 = vmatpush.msra.mxu3 %v6051_v47  ;;  %2019 = vmatpush.msra.mxu0 %v6052_v40 }
 0x29f   :  { %1988 = vmatpush.msra.mxu3 %v6053_v10  ;;  %2020 = vmatpush.msra.mxu0 %v6054_v27 }
 0x2a1   :  { %2619 = vmatmul.msk.f32.gmra.mxu3 %vm1283_vm2, %v5107_v41  ;;  %2625 = vmatmul.msk.f32.gmra.mxu0 %vm1283_vm2, %v5107_v41 }
 0x2a2   :  { %2654 = vmatmul.msk.f32.gmra.mxu1 %vm1283_vm2, %v4881_v11  ;;  %2660 = vmatmul.msk.f32.gmra.mxu2 %vm1283_vm2, %v4881_v11 }
 0x2a3   :  { %1989 = vmatpush.msra.mxu3 %v6056_v62  ;;  %2021 = vmatpush.msra.mxu0 %v6057_v33 }
 0x2a5   :  { %1990 = vmatpush.msra.mxu3 %v6058_v59  ;;  %2022 = vmatpush.msra.mxu0 %v4608_v1  ;;  %v5223_v1 = vpop.f32.mrf.mxu2 }
 0x2a9   :  { %2620 = vmatmul.msk.f32.gmra.mxu3 %vm1283_vm2, %v5201_v8  ;;  %2626 = vmatmul.msk.f32.gmra.mxu0 %vm1283_vm2, %v5201_v8 }
 0x2aa   :  { %2655 = vmatmul.msk.f32.gmra.mxu1 %vm1283_vm2, %v4931_v58  ;;  %2661 = vmatmul.msk.f32.gmra.mxu2 %vm1283_vm2, %v4931_v58 }
 0x2ad   :  { %v1452_v49 = vpop.f32.mrf.mxu2 }
 0x2b1   :  { %2640 = vmatmul.msk.f32.vlgmr.msrb.gmra.mxu3 %vm1283_vm2, %v4715_v19  ;;  %2646 = vmatmul.msk.f32.vlgmr.msrb.gmra.mxu0 %vm1283_vm2, %v4715_v19 }
 0x2b2   :  { %2656 = vmatmul.msk.f32.gmra.mxu1 %vm1283_vm2, %v4976_v36  ;;  %2662 = vmatmul.msk.f32.gmra.mxu2 %vm1283_vm2, %v4976_v36 }
 0x2b6   :  { %v1355_v55 = vpop.f32.mrf.mxu0 }
 0x2b9   :  { %2641 = vmatmul.msk.f32.gmra.mxu3 %vm1283_vm2, %v4777_v63  ;;  %2647 = vmatmul.msk.f32.gmra.mxu0 %vm1283_vm2, %v4777_v63  ;;  %v938_v63 = vadd.f32 %v6060_v20, %v6059_v32 }
 0x2ba   :  { %2676 = vmatmul.msk.f32.vlgmr.msra.gmra.mxu1 %vm1283_vm2, %v4831_v35  ;;  %2682 = vmatmul.msk.f32.vlgmr.msra.gmra.mxu2 %vm1283_vm2, %v4831_v35 }
 0x2bb   :  { %v1039_v23 = vadd.f32 %v6061_v0, %v938_v63 }
 0x2bc   :  { %v1323_v19 = vpop.f32.mrf.mxu3 }
 0x2be   :  { %v1358_v50 = vpop.f32.mrf.mxu0 }
 0x2bf   :  { %v1610_v38 = vpop.f32.mrf.mxu1  ;;  %v1444_v7 = vadd.f32 %v5181_v25, %v1358_v50 }
 0x2c1   :  { %2642 = vmatmul.msk.f32.gmra.mxu3 %vm1283_vm2, %v4831_v35  ;;  %2648 = vmatmul.msk.f32.gmra.mxu0 %vm1283_vm2, %v4831_v35  ;;  %v6062_v35 = vld [vmem:[#allocation52_spill] sm:$0xff] }
 0x2c2   :  { %2677 = vmatmul.msk.f32.gmra.mxu1 %vm1283_vm2, %v4881_v11  ;;  %2683 = vmatmul.msk.f32.gmra.mxu2 %vm1283_vm2, %v4881_v11  ;;  %v1140_v9 = vadd.f32 %v6062_v35, %v1039_v23 }
 0x2c4   :  { %v1326_v18 = vpop.f32.mrf.mxu3  ;;  %v1215_v60 = vmax.f32 %v1140_v9, %v1161_v45 }
 0x2c5   :  { %v1642_v39 = vpop.f32.mrf.mxu2 }
 0x2c6   :  { %v1361_v21 = vpop.f32.mrf.mxu0  ;;  %v1222_v30 = vmax.f32 %v6065_v53, %v1215_v60 }
 0x2c7   :  { %v1613_v17 = vpop.f32.mrf.mxu1 }
 0x2c8   :  { %v1229_v46 = vadd.f32 %v2750_v3, %v1222_v30 }
 0x2c9   :  { %2643 = vmatmul.msk.f32.gmra.mxu3 %vm1283_vm2, %v4881_v11  ;;  %2649 = vmatmul.msk.f32.gmra.mxu0 %vm1283_vm2, %v4881_v11 }
 0x2ca   :  { %2678 = vmatmul.msk.f32.gmra.mxu1 %vm1283_vm2, %v4931_v58  ;;  %2684 = vmatmul.msk.f32.gmra.mxu2 %vm1283_vm2, %v4931_v58  ;;  %v1236_v12 = vmax.f32 %v1229_v46, 0.0 }
 0x2cc   :  { %v1329_v37 = vpop.f32.mrf.mxu3 }
 0x2cd   :  { %v1645_v28 = vpop.f32.mrf.mxu2 }
 0x2ce   :  { %v1364_v52 = vpop.f32.mrf.mxu0 }
 0x2cf   :  { %v1616_v11 = vpop.f32.mrf.mxu1 }
 0x2d1   :  { %2644 = vmatmul.msk.f32.gmra.mxu3 %vm1283_vm2, %v4931_v58  ;;  %2650 = vmatmul.msk.f32.gmra.mxu0 %vm1283_vm2, %v4931_v58 }
 0x2d2   :  { %2679 = vmatmul.msk.f32.gmra.mxu1 %vm1283_vm2, %v4976_v36  ;;  %2685 = vmatmul.msk.f32.gmra.mxu2 %vm1283_vm2, %v4976_v36  ;;  %v1441_v36 = vadd.f32 %v5161_v2, %v1355_v55 }
 0x2d4   :  { %v1332_v22 = vpop.f32.mrf.mxu3 }
 0x2d5   :  { %v1648_v57 = vpop.f32.mrf.mxu2 }
 0x2d6   :  { %v1367_v31 = vpop.f32.mrf.mxu0 }
 0x2d7   :  { %v1453_v51 = vadd.f32 %v1452_v49, %v1367_v31  ;;  %v1619_v24 = vpop.f32.mrf.mxu1 }
 0x2d9   :  { %2664 = vmatmul.msk.f32.vlgmr.msra.gmra.mxu3 %vm1283_vm2, %v6021_v13  ;;  %2670 = vmatmul.msk.f32.vlgmr.msra.gmra.mxu0 %vm1283_vm2, %v6021_v13  ;;  %v1409_v13 = vadd.f32 %v5147_v44, %v1323_v19  ;;  %v1447_v44 = vadd.f32 %v5203_v43, %v1361_v21  ;;  %v1450_v43 = vadd.f32 %v5223_v1, %v1364_v52 }
 0x2da   :  { %2680 = vmatmul.msk.f32.gmra.mxu1 %vm1283_vm2, %v1236_v12  ;;  %2686 = vmatmul.msk.f32.gmra.mxu2 %vm1283_vm2, %v1236_v12 }
 0x2dc   :  { %v1335_v58 = vpop.f32.mrf.mxu3 }
 0x2dd   :  { %v1421_v26 = vadd.f32 %v1420_v34, %v1335_v58  ;;  %v1651_v47 = vpop.f32.mrf.mxu2 }
 0x2de   :  { %v1536_v40 = vpop.f32.mrf.mxu0 }
 0x2df   :  { %v1552_v10 = vadd.f32 %v1536_v40, %v1441_v36  ;;  %v1622_v2 = vpop.f32.mrf.mxu1 }
 0x2e1   :  { %2665 = vmatmul.msk.f32.gmra.mxu3 %vm1283_vm2, %v6022_v56  ;;  %2671 = vmatmul.msk.f32.gmra.mxu0 %vm1283_vm2, %v6022_v56  ;;  %v1658_v27 = vadd.f32 %v1642_v39, %v1552_v10  ;;  %v1412_v56 = vadd.f32 %v5167_v4, %v1326_v18  ;;  %v1415_v4 = vadd.f32 %v5195_v5, %v1329_v37 }
 0x2e4   :  { %v1504_v29 = vpop.f32.mrf.mxu3 }
 0x2e5   :  { %v1551_v62 = vadd.f32 %v1504_v29, %v1409_v13  ;;  %v1654_v16 = vpop.f32.mrf.mxu2 }
 0x2e6   :  { %v1539_v33 = vpop.f32.mrf.mxu0 }
 0x2e7   :  { %v1554_v59 = vadd.f32 %v1539_v33, %v1444_v7  ;;  %v1657_v14 = vadd.f32 %v1610_v38, %v1551_v62  ;;  %v5288_v15 = vpop.f32.mrf.mxu1 }
 0x2e9   :  { %2666 = vmatmul.msk.f32.gmra.mxu3 %vm1283_vm2, %v6026_v61  ;;  %2672 = vmatmul.msk.f32.gmra.mxu0 %vm1283_vm2, %v6026_v61  ;;  %v1660_v55 = vadd.f32 %v1645_v28, %v1554_v59 }
 0x2ec   :  { %v1507_v34 = vpop.f32.mrf.mxu3 }
 0x2ed   :  { %v1553_v19 = vadd.f32 %v1507_v34, %v1412_v56  ;;  %v5294_v61 = vpop.f32.mrf.mxu2 }
 0x2ee   :  { %v1542_v25 = vpop.f32.mrf.mxu0 }
 0x2ef   :  { %v1556_v49 = vadd.f32 %v1542_v25, %v1447_v44  ;;  %v1659_v50 = vadd.f32 %v1613_v17, %v1553_v19  ;;  %v5303_v0 = vpop.f32.mrf.mxu1  ;;  %v2163_v25 = vld [vmem:[%s5696_s5 + $0x48] sm:$0xff] }
 0x2f0   :  { %2208 = vmatpush.msrb.mxu2 %v2163_v25  ;;  %v2705_v25 = vld [vmem:[%s5696_s5 + $0xd0] sm:$0xff] }
 0x2f1   :  { %2667 = vmatmul.msk.f32.gmra.mxu3 %vm1283_vm2, %v5107_v41  ;;  %2673 = vmatmul.msk.f32.gmra.mxu0 %vm1283_vm2, %v5107_v41  ;;  %v1662_v38 = vadd.f32 %v1648_v57, %v1556_v49  ;;  %v1418_v41 = vadd.f32 %v5213_v48, %v1332_v22 }
 0x2f4   :  { %v1510_v32 = vpop.f32.mrf.mxu3 }
 0x2f5   :  { %v1555_v20 = vadd.f32 %v1510_v32, %v1415_v4  ;;  %v5305_v23 = vpop.f32.mrf.mxu2  ;;  %v2696_v4 = vld [vmem:[%s5696_s5 + $0x98] sm:$0xff] }
 0x2f6   :  { %v1545_v63 = vpop.f32.mrf.mxu0  ;;  %v2161_v32 = vld [vmem:[%s5696_s5 + $0x38] sm:$0xff]  ;;  %2185 = vmatpush.msrb.mxu3 %v2696_v4 }
 0x2f7   :  { %v1558_v42 = vadd.f32 %v1545_v63, %v1450_v43  ;;  %v1661_v18 = vadd.f32 %v1616_v11, %v1555_v20  ;;  %v5307_v60 = vpop.f32.mrf.mxu1  ;;  %v2160_v20 = vld [vmem:[%s5696_s5 + $0x30] sm:$0xff]  ;;  %v2688_v4 = vld [vmem:[%s5696_s5 + $0x58] sm:$0xff] }
 0x2f9   :  { %2668 = vmatmul.msk.f32.gmra.mxu3 %vm1283_vm2, %v5201_v8  ;;  %2674 = vmatmul.msk.f32.gmra.mxu0 %vm1283_vm2, %v5201_v8  ;;  %v1664_v39 = vadd.f32 %v1651_v47, %v1558_v42  ;;  %v2159_v42 = vld [vmem:[%s5696_s5 + $0x28] sm:$0xff] }
 0x2fc   :  { %v1513_v5 = vpop.f32.mrf.mxu3 }
 0x2fd   :  { %v1557_v21 = vadd.f32 %v1513_v5, %v1418_v41  ;;  %v5309_v28 = vpop.f32.mrf.mxu2 }
 0x2fe   :  { %v1548_v1 = vpop.f32.mrf.mxu0 }
 0x2ff   :  { %v1560_v45 = vadd.f32 %v1548_v1, %v1453_v51  ;;  %v1663_v17 = vadd.f32 %v1619_v24, %v1557_v21  ;;  %v5315_v30 = vpop.f32.mrf.mxu1  ;;  %v2694_v21 = vld [vmem:[%s5696_s5 + $0x88] sm:$0xff]  ;;  %v2157_v1 = vld [vmem:[%s5696_s5 + $0x18] sm:$0xff] }
 0x301   :  { %v1666_v35 = vadd.f32 %v1654_v16, %v1560_v45 }
 0x304   :  { %v1516_v9 = vpop.f32.mrf.mxu3 }
 0x305   :  { %v1559_v37 = vadd.f32 %v1516_v9, %v1421_v26  ;;  %v5321_v46 = vpop.f32.mrf.mxu2 }
 0x306   :  { %v1748_v8 = vpop.f32.mrf.mxu0 }
 0x307   :  { %v5311_v52 = vadd.f32 %v1748_v8, %v1658_v27  ;;  %v1665_v48 = vadd.f32 %v1622_v2, %v1559_v37  ;;  %v5329_v58 = vpop.f32.mrf.mxu1  ;;  %v2708_v37 = vld [vmem:[%s5696_s5 + $0xe8] sm:$0xff]  ;;  %v2692_v8 = vld [vmem:[%s5696_s5 + $0x78] sm:$0xff] }
 0x308   :  { %2242 = vmatpush.msrb.mxu1 %v2708_v37  ;;  %v2716_v37 = vld [vmem:[%s5696_s5 + $0x120] sm:$0xff] }
 0x30c   :  { %v1716_v54 = vpop.f32.mrf.mxu3 }
 0x30d   :  { %v5313_v6 = vadd.f32 %v1716_v54, %v1657_v14  ;;  %v5331_v36 = vpop.f32.mrf.mxu2  ;;  %v2707_v54 = vld [vmem:[%s5696_s5 + $0xe0] sm:$0xff] }
 0x30e   :  { %v1751_v53 = vpop.f32.mrf.mxu0  ;;  %2243 = vmatpush.msrb.mxu1 %v2707_v54 }
 0x30f   :  { %v2126_v11 = vmax.f32 %v5313_v6, %v5311_v52  ;;  %v5319_v3 = vadd.f32 %v1751_v53, %v1660_v55  ;;  %v5339_v27 = vpop.f32.mrf.mxu1  ;;  %v2691_v53 = vld [vmem:[%s5696_s5 + $0x70] sm:$0xff]  ;;  %v2722_v52 = vld [vmem:[%s5696_s5 + $0x148] sm:$0xff] }
 0x314   :  { %v1719_v22 = vpop.f32.mrf.mxu3 }
 0x315   :  { %v5323_v57 = vadd.f32 %v1719_v22, %v1659_v50  ;;  %v5341_v13 = vpop.f32.mrf.mxu2  ;;  %v2154_v22 = vld [vmem:[%s5696_s5] sm:$0xff] }
 0x316   :  { %v1754_v31 = vpop.f32.mrf.mxu0 }
 0x317   :  { %v2127_v51 = vmax.f32 %v5323_v57, %v5319_v3  ;;  %v5327_v12 = vadd.f32 %v1754_v31, %v1662_v38  ;;  %v5349_v14 = vpop.f32.mrf.mxu1  ;;  %v2162_v38 = vld [vmem:[%s5696_s5 + $0x40] sm:$0xff]  ;;  %v2690_v31 = vld [vmem:[%s5696_s5 + $0x68] sm:$0xff] }
 0x318   :  { %2209 = vmatpush.msrb.mxu2 %v2162_v38 }
 0x31a   :  { %2210 = vmatpush.msrb.mxu2 %v2161_v32  ;;  %v2704_v32 = vld [vmem:[%s5696_s5 + $0xc8] sm:$0xff] }
 0x31c   :  { %v1722_v24 = vpop.f32.mrf.mxu3  ;;  %2211 = vmatpush.msrb.mxu2 %v2160_v20  ;;  %v2719_v20 = vld [vmem:[%s5696_s5 + $0x138] sm:$0xff] }
 0x31d   :  { %v5333_v26 = vadd.f32 %v1722_v24, %v1661_v18  ;;  %v5353_v55 = vpop.f32.mrf.mxu2  ;;  %v2695_v18 = vld [vmem:[%s5696_s5 + $0x90] sm:$0xff]  ;;  %v2706_v24 = vld [vmem:[%s5696_s5 + $0xd8] sm:$0xff] }
 0x31e   :  { %v1757_v47 = vpop.f32.mrf.mxu0  ;;  %2212 = vmatpush.msrb.mxu2 %v2159_v42  ;;  %2186 = vmatpush.msrb.mxu3 %v2695_v18  ;;  %v2687_v42 = vld [vmem:[%s5696_s5 + $0x50] sm:$0xff]  ;;  %v2703_v18 = vld [vmem:[%s5696_s5 + $0xc0] sm:$0xff] }
 0x31f   :  { %v2128_v40 = vmax.f32 %v5333_v26, %v5327_v12  ;;  %v5337_v10 = vadd.f32 %v1757_v47, %v1664_v39  ;;  %v5366_v49 = vpop.f32.mrf.mxu1  ;;  %v2158_v39 = vld [vmem:[%s5696_s5 + $0x20] sm:$0xff]  ;;  %2244 = vmatpush.msrb.mxu1 %v2706_v24  ;;  %v2730_v24 = vld [vmem:[%s5696_s5 + $0x188] sm:$0xff] }
 0x320   :  { %2213 = vmatpush.msrb.mxu2 %v2158_v39  ;;  %2187 = vmatpush.msrb.mxu3 %v2694_v21  ;;  %v2718_v39 = vld [vmem:[%s5696_s5 + $0x130] sm:$0xff]  ;;  %v2702_v21 = vld [vmem:[%s5696_s5 + $0xb8] sm:$0xff] }
 0x321   :  { %2245 = vmatpush.msrb.mxu1 %v2705_v25  ;;  %v2729_v25 = vld [vmem:[%s5696_s5 + $0x180] sm:$0xff] }
 0x322   :  { %2214 = vmatpush.msrb.mxu2 %v2157_v1  ;;  %v2717_v1 = vld [vmem:[%s5696_s5 + $0x128] sm:$0xff] }
 0x323   :  { %2246 = vmatpush.msrb.mxu1 %v2704_v32 }
 0x324   :  { %v1725_v29 = vpop.f32.mrf.mxu3 }
 0x325   :  { %v5343_v7 = vadd.f32 %v1725_v29, %v1663_v17  ;;  %v5368_v50 = vpop.f32.mrf.mxu2  ;;  %v2693_v17 = vld [vmem:[%s5696_s5 + $0x80] sm:$0xff]  ;;  %2247 = vmatpush.msrb.mxu1 %v2703_v18  ;;  %v2727_v18 = vld [vmem:[%s5696_s5 + $0x170] sm:$0xff] }
 0x326   :  { %v1760_v62 = vpop.f32.mrf.mxu0  ;;  %2188 = vmatpush.msrb.mxu3 %v2693_v17 }
 0x327   :  { %v2129_v33 = vmax.f32 %v5343_v7, %v5337_v10  ;;  %v5347_v2 = vadd.f32 %v1760_v62, %v1666_v35  ;;  %v5395_v41 = vpop.f32.mrf.mxu1  ;;  %v2156_v35 = vld [vmem:[%s5696_s5 + $0x10] sm:$0xff]  ;;  %2248 = vmatpush.msrb.mxu1 %v2702_v21 }
 0x328   :  { %2215 = vmatpush.msrb.mxu2 %v2156_v35  ;;  %2189 = vmatpush.msrb.mxu3 %v2692_v8  ;;  %v2701_v35 = vld [vmem:[%s5696_s5 + $0xb0] sm:$0xff] }
 0x329   :  { %2249 = vmatpush.msrb.mxu1 %v2701_v35  ;;  %v2726_v35 = vld [vmem:[%s5696_s5 + $0x168] sm:$0xff] }
 0x32a   :  { %2190 = vmatpush.msrb.mxu3 %v2691_v53 }
 0x32c   :  { %v1728_v59 = vpop.f32.mrf.mxu3  ;;  %2191 = vmatpush.msrb.mxu3 %v2690_v31  ;;  %v2715_v31 = vld [vmem:[%s5696_s5 + $0x118] sm:$0xff] }
 0x32d   :  { %v5351_v16 = vadd.f32 %v1728_v59, %v1665_v48  ;;  %v5397_v5 = vpop.f32.mrf.mxu2  ;;  %v2155_v48 = vld [vmem:[%s5696_s5 + $0x8] sm:$0xff]  ;;  %v2689_v59 = vld [vmem:[%s5696_s5 + $0x60] sm:$0xff] }
 0x32e   :  { %v5355_v56 = vpop.f32.mrf.mxu0  ;;  %2216 = vmatpush.msrb.mxu2 %v2155_v48  ;;  %2192 = vmatpush.msrb.mxu3 %v2689_v59  ;;  %v2714_v59 = vld [vmem:[%s5696_s5 + $0x110] sm:$0xff] }
 0x32f   :  { %v2130_v34 = vmax.f32 %v5351_v16, %v5347_v2  ;;  %v5439_v47 = vpop.f32.mrf.mxu1  ;;  %v1887_v8 = vadd.f32 %v5355_v56, %v5294_v61  ;;  %v2699_v56 = vld [vmem:[%s5696_s5 + $0xa0] sm:$0xff]  ;;  %v2343_v2 = vld [vmem:[%s5697_s7 + $0x50] sm:$0xff]  ;;  %v2342_v16 = vld [vmem:[%s5697_s7 + $0x48] sm:$0xff] }
 0x330   :  { %2217 = vmatpush.msrb.mxu2 %v2154_v22  ;;  %2193 = vmatpush.msrb.mxu3 %v2688_v4  ;;  %v2700_v22 = vld [vmem:[%s5696_s5 + $0xa8] sm:$0xff] }
 0x331   :  { %2250 = vmatpush.msrb.mxu1 %v2700_v22  ;;  %v1966_v4 = vadd.f32 %v5341_v13, %v1887_v8  ;;  %v2712_v13 = vld [vmem:[%s5696_s5 + $0x100] sm:$0xff] }
 0x332   :  { %2277 = vmatpush.msra.mxu2 %v2719_v20  ;;  %2194 = vmatpush.msrb.mxu3 %v2687_v42 }
 0x333   :  { %2251 = vmatpush.msrb.mxu1 %v2699_v56 }
 0x334   :  { %v5359_v44 = vpop.f32.mrf.mxu3  ;;  %2278 = vmatpush.msra.mxu2 %v2718_v39  ;;  %2312 = vmatpush.msra.mxu3 %v2730_v24 }
 0x335   :  { %v5441_v29 = vpop.f32.mrf.mxu2  ;;  %v1855_v61 = vadd.f32 %v5359_v44, %v5288_v15  ;;  %v2713_v15 = vld [vmem:[%s5696_s5 + $0x108] sm:$0xff]  ;;  %v2728_v44 = vld [vmem:[%s5696_s5 + $0x178] sm:$0xff] }
 0x336   :  { %v5361_v19 = vpop.f32.mrf.mxu0  ;;  %2279 = vmatpush.msra.mxu2 %v2717_v1  ;;  %2313 = vmatpush.msra.mxu3 %v2729_v25  ;;  %v2723_v25 = vld [vmem:[%s5696_s5 + $0x150] sm:$0xff] }
 0x337   :  { %v2069_v48 = vpop.f32.mrf.mxu1  ;;  %v1965_v20 = vadd.f32 %v5339_v27, %v1855_v61  ;;  %v1890_v39 = vadd.f32 %v5361_v19, %v5305_v23  ;;  %v2711_v27 = vld [vmem:[%s5696_s5 + $0xf8] sm:$0xff]  ;;  %v2710_v19 = vld [vmem:[%s5696_s5 + $0xf0] sm:$0xff]  ;;  %v5540_v61 = vld [vmem:[%s5695_s4] ss:$0 sm:$0xff] }
 0x338   :  { %2280 = vmatpush.msra.mxu2 %v2716_v37  ;;  %2314 = vmatpush.msra.mxu3 %v2728_v44 }
 0x33a   :  { %2281 = vmatpush.msra.mxu2 %v2715_v31  ;;  %2315 = vmatpush.msra.mxu3 %v2727_v18  ;;  %v2725_v31 = vld [vmem:[%s5696_s5 + $0x160] sm:$0xff] }
 0x33c   :  { %v5379_v43 = vpop.f32.mrf.mxu3  ;;  %2282 = vmatpush.msra.mxu2 %v2714_v59  ;;  %2316 = vmatpush.msra.mxu3 %v2726_v35 }
 0x33d   :  { %v2101_v54 = vpop.f32.mrf.mxu2  ;;  %v1858_v37 = vadd.f32 %v5379_v43, %v5303_v0  ;;  %v1968_v0 = vadd.f32 %v5353_v55, %v1890_v39  ;;  %v2724_v43 = vld [vmem:[%s5696_s5 + $0x158] sm:$0xff] }
 0x33e   :  { %v5384_v63 = vpop.f32.mrf.mxu0  ;;  %2283 = vmatpush.msra.mxu2 %v2713_v15  ;;  %2317 = vmatpush.msra.mxu3 %v2725_v31 }
 0x33f   :  { %v2072_v8 = vpop.f32.mrf.mxu1  ;;  %v1967_v56 = vadd.f32 %v5349_v14, %v1858_v37  ;;  %v1893_v55 = vadd.f32 %v5384_v63, %v5309_v28  ;;  %v2721_v28 = vld [vmem:[%s5696_s5 + $0x140] sm:$0xff] }
 0x340   :  { %2284 = vmatpush.msra.mxu2 %v2712_v13  ;;  %2318 = vmatpush.msra.mxu3 %v2724_v43  ;;  %v2347_v13 = vld [vmem:[%s5697_s7 + $0x70] sm:$0xff] }
 0x341   :  { %2357 = vmatpush.msrb.mxu0 %v2347_v13  ;;  %v2384_v13 = vld [vmem:[%s5700_s9 + $0x38] sm:$0xff] }
 0x342   :  { %2285 = vmatpush.msra.mxu2 %v2711_v27  ;;  %2319 = vmatpush.msra.mxu3 %v2723_v25 }
 0x344   :  { %v5405_v45 = vpop.f32.mrf.mxu3  ;;  %2286 = vmatpush.msra.mxu2 %v2710_v19  ;;  %2320 = vmatpush.msra.mxu3 %v2722_v52  ;;  %v2338_v52 = vld [vmem:[%s5697_s7 + $0x28] sm:$0xff] }
 0x345   :  { %v2104_v23 = vpop.f32.mrf.mxu2  ;;  %v1861_v6 = vadd.f32 %v5405_v45, %v5307_v60 }
 0x346   :  { %v5413_v9 = vpop.f32.mrf.mxu0  ;;  %2321 = vmatpush.msra.mxu3 %v2721_v28  ;;  %v2333_v28 = vld [vmem:[%s5697_s7] sm:$0xff] }
 0x347   :  { %v2075_v63 = vpop.f32.mrf.mxu1  ;;  %v1969_v39 = vadd.f32 %v5366_v49, %v1861_v6  ;;  %v2337_v6 = vld [vmem:[%s5697_s7 + $0x20] sm:$0xff] }
 0x34c   :  { %v5443_v62 = vpop.f32.mrf.mxu3 }
 0x34d   :  { %v2107_v60 = vpop.f32.mrf.mxu2  ;;  %v1864_v37 = vadd.f32 %v5443_v62, %v5315_v30 }
 0x34e   :  { %v5451_v38 = vpop.f32.mrf.mxu0 }
 0x34f   :  { %v2078_v57 = vpop.f32.mrf.mxu1  ;;  %v1971_v49 = vadd.f32 %v5395_v41, %v1864_v37  ;;  %v1899_v30 = vadd.f32 %v5451_v38, %v5331_v36 }
 0x351   :  { %v1974_v26 = vadd.f32 %v5441_v29, %v1899_v30  ;;  %v2345_v29 = vld [vmem:[%s5697_s7 + $0x60] sm:$0xff] }
 0x354   :  { %v5477_v17 = vpop.f32.mrf.mxu3 }
 0x356   :  { %v2024_v53 = vpop.f32.mrf.mxu0 }
 0x357   :  { %v2040_v32 = vadd.f32 %v2024_v53, %v1966_v4 }
 0x359   :  { %v2117_v53 = vadd.f32 %v2101_v54, %v2040_v32 }
 0x35c   :  { %v1992_v42 = vpop.f32.mrf.mxu3 }
 0x35d   :  { %v2039_v21 = vadd.f32 %v1992_v42, %v1965_v20  ;;  %v1970_v42 = vadd.f32 %v5368_v50, %v1893_v55  ;;  %v1896_v50 = vadd.f32 %v5413_v9, %v5321_v46  ;;  %v2110_v9 = vpop.f32.mrf.mxu2 }
 0x35e   :  { %v2027_v1 = vpop.f32.mrf.mxu0 }
 0x35f   :  { %v2116_v22 = vadd.f32 %v2069_v48, %v2039_v21  ;;  %v2042_v54 = vadd.f32 %v2027_v1, %v1968_v0  ;;  %v1972_v3 = vadd.f32 %v5397_v5, %v1896_v50  ;;  %v1867_v5 = vadd.f32 %v5477_v17, %v5329_v58  ;;  %v2081_v17 = vpop.f32.mrf.mxu1 }
 0x361   :  { %v2131_v24 = vmax.f32 %v2116_v22, %v2117_v53  ;;  %v2119_v14 = vadd.f32 %v2104_v23, %v2042_v54  ;;  %v1973_v41 = vadd.f32 %v5439_v47, %v1867_v5  ;;  %v2346_v47 = vld [vmem:[%s5697_s7 + $0x68] sm:$0xff] }
 0x362   :  { %2358 = vmatpush.msrb.mxu0 %v2346_v47 }
 0x363   :  { %v2136_v48 = vmax.f32 %v2126_v11, %v2131_v24 }
 0x364   :  { %v1995_v59 = vpop.f32.mrf.mxu3  ;;  %2359 = vmatpush.msrb.mxu0 %v2345_v29 }
 0x365   :  { %v2144_v4 = vadd.f32 %v5540_v61, %v2136_v48  ;;  %v2041_v15 = vadd.f32 %v1995_v59, %v1967_v56  ;;  %v2113_v56 = vpop.f32.mrf.mxu2 }
 0x366   :  { %v2030_v44 = vpop.f32.mrf.mxu0 }
 0x367   :  { %v2149_v11 = vmax.f32 %v2144_v4, 0.0  ;;  %v2118_v32 = vadd.f32 %v2072_v8, %v2041_v15  ;;  %v2044_v18 = vadd.f32 %v2030_v44, %v1970_v42  ;;  %v2344_v15 = vld [vmem:[%s5697_s7 + $0x58] sm:$0xff]  ;;  %v2339_v44 = vld [vmem:[%s5697_s7 + $0x30] sm:$0xff]  ;;  %v2385_v42 = vld [vmem:[%s5700_s9 + $0x40] sm:$0xff] }
 0x368   :  { %2360 = vmatpush.msrb.mxu0 %v2344_v15 }
 0x369   :  { %v2132_v20 = vmax.f32 %v2118_v32, %v2119_v14  ;;  %2698 = vmatmul.msk.f32.vlgmr.msrb.gmra.mxu2 %vm2175_vm3, %v2149_v11  ;;  %v2121_v53 = vadd.f32 %v2107_v60, %v2044_v18  ;;  %v2336_v11 = vld [vmem:[%s5697_s7 + $0x18] sm:$0xff]  ;;  %v2335_v14 = vld [vmem:[%s5697_s7 + $0x10] sm:$0xff]  ;;  %v2334_v32 = vld [vmem:[%s5697_s7 + $0x8] sm:$0xff] }
 0x36a   :  { %2361 = vmatpush.msrb.mxu0 %v2343_v2  ;;  %v2383_v60 = vld [vmem:[%s5700_s9 + $0x30] sm:$0xff]  ;;  %v2381_v18 = vld [vmem:[%s5700_s9 + $0x20] sm:$0xff] }
 0x36b   :  { %v2137_v45 = vmax.f32 %v2127_v51, %v2132_v20  ;;  %v2386_v20 = vld [vmem:[%s5700_s9 + $0x48] sm:$0xff] }
 0x36c   :  { %v1998_v21 = vpop.f32.mrf.mxu3  ;;  %2362 = vmatpush.msrb.mxu0 %v2342_v16 }
 0x36d   :  { %v2145_v1 = vadd.f32 %v5540_v61, %v2137_v45  ;;  %v2043_v27 = vadd.f32 %v1998_v21, %v1969_v39  ;;  %v2382_v45 = vld [vmem:[%s5700_s9 + $0x28] sm:$0xff]  ;;  %v2380_v39 = vld [vmem:[%s5700_s9 + $0x18] sm:$0xff] }
 0x36e   :  { %v2033_v35 = vpop.f32.mrf.mxu0 }
 0x36f   :  { %v2150_v8 = vmax.f32 %v2145_v1, 0.0  ;;  %v2120_v22 = vadd.f32 %v2075_v63, %v2043_v27  ;;  %v2046_v51 = vadd.f32 %v2033_v35, %v1972_v3  ;;  %v2387_v63 = vld [vmem:[%s5700_s9 + $0x50] sm:$0xf] }
 0x370   :  { %2733 = vmatpush.msk.msra.mxu1 %vm1299_vm1, %v2387_v63 }
 0x371   :  { %v2133_v23 = vmax.f32 %v2120_v22, %v2121_v53  ;;  %2697 = vmatmul.msk.f32.vlgmr.msrb.gmra.mxu3 %vm2175_vm3, %v2150_v8  ;;  %v2123_v0 = vadd.f32 %v2110_v9, %v2046_v51  ;;  %v2737_v53 = vld [vmem:[%s5698_s6] ss:$0 sm:$0xff]  ;;  %v2378_v51 = vld [vmem:[%s5700_s9 + $0x8] sm:$0xff] }
 0x372   :  { %2404 = vmatpush.msra.mxu1 %v2386_v20  ;;  %v2738_v9 = vld [vmem:[%s5699_s8] ss:$0 sm:$0xff] }
 0x373   :  { %v2138_v46 = vmax.f32 %v2128_v40, %v2133_v23 }
 0x374   :  { %v2001_v19 = vpop.f32.mrf.mxu3  ;;  %2405 = vmatpush.msra.mxu1 %v2385_v42 }
 0x375   :  { %v2146_v62 = vadd.f32 %v5540_v61, %v2138_v46  ;;  %v2045_v31 = vadd.f32 %v2001_v19, %v1971_v49  ;;  %v2379_v46 = vld [vmem:[%s5700_s9 + $0x10] sm:$0xff]  ;;  %v2377_v49 = vld [vmem:[%s5700_s9] sm:$0xff] }
 0x376   :  { %v2036_v48 = vpop.f32.mrf.mxu0  ;;  %2406 = vmatpush.msra.mxu1 %v2384_v13 }
 0x377   :  { %v2151_v24 = vmax.f32 %v2146_v62, 0.0  ;;  %v2122_v43 = vadd.f32 %v2078_v57, %v2045_v31  ;;  %v2048_v36 = vadd.f32 %v2036_v48, %v1974_v26  ;;  %v2739_v31 = vld [vmem:[%s5701_s10] ss:$0 sm:$0xff] }
 0x378   :  { %2407 = vmatpush.msra.mxu1 %v2383_v60 }
 0x379   :  { %v2134_v12 = vmax.f32 %v2122_v43, %v2123_v0  ;;  %2709 = vmatmul.msk.f32.vlgmr.msrb.gmra.mxu1 %vm2175_vm3, %v2151_v24  ;;  %v2125_v25 = vadd.f32 %v2113_v56, %v2048_v36 }
 0x37a   :  { %2408 = vmatpush.msra.mxu1 %v2382_v45 }
 0x37b   :  { %v2139_v40 = vmax.f32 %v2129_v33, %v2134_v12 }
 0x37c   :  { %v2004_v38 = vpop.f32.mrf.mxu3  ;;  %2409 = vmatpush.msra.mxu1 %v2381_v18 }
 0x37d   :  { %v2147_v54 = vadd.f32 %v5540_v61, %v2139_v40  ;;  %v2047_v58 = vadd.f32 %v2004_v38, %v1973_v41 }
 0x37e   :  { %2410 = vmatpush.msra.mxu1 %v2380_v39 }
 0x37f   :  { %v2152_v59 = vmax.f32 %v2147_v54, 0.0  ;;  %v2124_v55 = vadd.f32 %v2081_v17, %v2047_v58 }
 0x380   :  { %2411 = vmatpush.msra.mxu1 %v2379_v46 }
 0x381   :  { %v2135_v4 = vmax.f32 %v2124_v55, %v2125_v25  ;;  %2720 = vmatmul.msk.f32.vlgmr.msra.gmra.mxu2 %vm2175_vm3, %v2152_v59 }
 0x382   :  { %2412 = vmatpush.msra.mxu1 %v2378_v51 }
 0x383   :  { %v2140_v10 = vmax.f32 %v2130_v34, %v2135_v4  ;;  %v2341_v34 = vld [vmem:[%s5697_s7 + $0x40] sm:$0xff] }
 0x384   :  { %2363 = vmatpush.msrb.mxu0 %v2341_v34  ;;  %2413 = vmatpush.msra.mxu1 %v2377_v49 }
 0x385   :  { %v2148_v7 = vadd.f32 %v5540_v61, %v2140_v10  ;;  %v2340_v61 = vld [vmem:[%s5697_s7 + $0x38] sm:$0xff] }
 0x386   :  { %2364 = vmatpush.msrb.mxu0 %v2340_v61 }
 0x387   :  { %v2153_v33 = vmax.f32 %v2148_v7, 0.0 }
 0x388   :  { %2365 = vmatpush.msrb.mxu0 %v2339_v44 }
 0x389   :  { %2731 = vmatmul.msk.f32.vlgmr.msra.gmra.mxu3 %vm2175_vm3, %v2153_v33 }
 0x38a   :  { %2366 = vmatpush.msrb.mxu0 %v2338_v52 }
 0x38c   :  { %2367 = vmatpush.msrb.mxu0 %v2337_v6 }
 0x38e   :  { %2368 = vmatpush.msrb.mxu0 %v2336_v11 }
 0x390   :  { %2369 = vmatpush.msrb.mxu0 %v2335_v14 }
 0x392   :  { %2370 = vmatpush.msrb.mxu0 %v2334_v32 }
 0x394   :  { %2371 = vmatpush.msrb.mxu0 %v2333_v28 }
 0x3ec   :  { %v2219_v21 = vpop.f32.mrf.mxu2 }
 0x3f4   :  { %v2196_v50 = vpop.f32.mrf.mxu3 }
 0x3f5   :  { %v2220_v1 = vadd.f32 %v2219_v21, %v2196_v50 }
 0x3f6   :  { %v2253_v27 = vpop.f32.mrf.mxu1 }
 0x3f7   :  { %v2256_v37 = vadd.f32 %v2253_v27, %v2220_v1 }
 0x404   :  { %v2288_v35 = vpop.f32.mrf.mxu2 }
 0x405   :  { %v2291_v8 = vadd.f32 %v2288_v35, %v2256_v37 }
 0x40c   :  { %v2323_v22 = vpop.f32.mrf.mxu3 }
 0x40d   :  { %v2326_v23 = vadd.f32 %v2323_v22, %v2291_v8 }
 0x40f   :  { %v2331_v3 = vadd.f32 %v2737_v53, %v2326_v23 }
 0x411   :  { %v2332_v57 = vmax.f32 %v2331_v3, 0.0 }
 0x413   :  { %2732 = vmatmul.msk.f32.vlgmr.msrb.gmra.mxu0 %vm2352_vm4, %v2332_v57 }
 0x490   :  { %v2373_v19 = vpop.f32.mrf.mxu0 }
 0x491   :  { %v2374_v30 = vadd.f32 %v2738_v9, %v2373_v19 }
 0x493   :  { %v2376_v62 = vmax.f32 %v2374_v30, 0.0 }
 0x495   :  { %2734 = vmatmul.msk.f32.vlgmr.msra.gmra.mxu1 %vm1283_vm2, %v2376_v62 }
 0x512   :  { %v2415_v5 = vpop.f32.mrf.mxu1 }
 0x513   :  { %v2416_v24 = vadd.f32 %v2739_v31, %v2415_v5 }
 0x515   :  { %2418 = vst [vmem:[%s5702_s11] sm:$0xff] %v2416_v24 }

</bundles_post_ra>
